<compile_context>
chip_gen: v5e
topology: v5e:2x2
jax: 0.10.0
libtpu: 0.0.40
codegen_flags: <defaults>
</compile_context>

<pallas_src>
import math
import jax
import jax.numpy as jnp
from jax.experimental import pallas as pl
from jax.experimental.pallas import tpu as pltpu

SUBLANE = 8
LANE = 128


def _round_up(x, m):
    return ((x + m - 1) // m) * m


def _encoder_lstm_kernel(toks_ref, emb_ref, wx_ref, wh_ref, b_ref, h0_ref, c0_ref,
                         h_seq_ref, c_seq_ref, x_sc, xg_sc):
    """Whole-sequence batched LSTM in one kernel invocation.

    toks_ref : SMEM (T*B,) int32   tokens, time-major flat (index t*B + b)  [scalar prefetch]
    emb_ref  : VMEM (V, Hp) f32    embedding table (zero-padded lanes H..Hp)
    wx_ref   : VMEM (Hp, 4Hp) f32  [W_ii^T | W_if^T | W_ig^T | W_io^T], padded
    wh_ref   : VMEM (Hp, 4Hp) f32  [W_hi^T | W_hf^T | W_hg^T | W_ho^T], padded
    b_ref    : VMEM (1, 4Hp) f32   [b_i | b_f | b_g | b_o], padded
    h0_ref   : VMEM (B, Hp) f32    initial hidden states
    c0_ref   : VMEM (B, Hp) f32    initial cell states
    h_seq_ref: VMEM (T*B, Hp) f32  per-step hidden outputs (time-major rows)
    c_seq_ref: VMEM (T*B, Hp) f32  per-step cell outputs
    x_sc     : VMEM (T*B, Hp) f32  gathered embedding rows
    xg_sc    : VMEM (T*B, 4Hp) f32 input-side gate pre-activations (x @ Wx + b)
    """
    B, Hp = h0_ref.shape
    TB = x_sc.shape[0]
    T = TB // B
    V = emb_ref.shape[0]

    # ---- pre-pass 1: gather every timestep's embedding rows (off the recurrent path) ----
    def gather(idx, carry):
        tok = toks_ref[idx]
        tok = jnp.minimum(jnp.maximum(tok, 0), V - 1)   # no HW bounds check on VMEM reads
        x_sc[pl.ds(idx, 1), :] = emb_ref[pl.ds(tok, 1), :]
        return carry

    jax.lax.fori_loop(0, TB, gather, 0, unroll=True)

    # ---- pre-pass 2: all input projections + bias in ONE MXU matmul ----
    xg_sc[...] = (jnp.dot(x_sc[...], wx_ref[...], preferred_element_type=jnp.float32)
                  + b_ref[...])

    # ---- recurrence: one (B,Hp)x(Hp,4Hp) dot + vreg-aligned gate math per step ----
    def step(t, carry):
        h, c = carry
        base = t * B
        gates = xg_sc[pl.ds(base, B), :] + jnp.dot(
            h, wh_ref[...], preferred_element_type=jnp.float32)
        gates = jax.nn.sigmoid(gates)        # reference module applies sigmoid to g as well
        i_t = gates[:, 0 * Hp:1 * Hp]        # each gate is a whole-vreg slice (Hp = 128)
        f_t = gates[:, 1 * Hp:2 * Hp]
        g_t = gates[:, 2 * Hp:3 * Hp]
        o_t = gates[:, 3 * Hp:4 * Hp]
        c_t = f_t * c + i_t * g_t
        h_t = o_t * jnp.tanh(c_t)
        h_seq_ref[pl.ds(base, B), :] = h_t
        c_seq_ref[pl.ds(base, B), :] = c_t
        return (h_t, c_t)

    jax.lax.fori_loop(0, T, step, (h0_ref[...], c0_ref[...]), unroll=True)


def _run_batched(toks_flat, h0, c0, emb, wx, wh, b):
    """toks_flat (T*B,) int32 time-major; h0/c0 (B, Hp) f32; weights pre-packed/padded."""
    B, Hp = h0.shape
    TB = toks_flat.shape[0]
    V = emb.shape[0]

    grid_spec = pltpu.PrefetchScalarGridSpec(
        num_scalar_prefetch=1,
        grid=(1,),                                              # time loop is inside the kernel
        in_specs=[
            pl.BlockSpec((V, Hp), lambda i, toks: (0, 0)),          # embedding (VMEM resident)
            pl.BlockSpec((Hp, 4 * Hp), lambda i, toks: (0, 0)),     # Wx (resident)
            pl.BlockSpec((Hp, 4 * Hp), lambda i, toks: (0, 0)),     # Wh (resident)
            pl.BlockSpec((1, 4 * Hp), lambda i, toks: (0, 0)),      # bias (resident)
            pl.BlockSpec((B, Hp), lambda i, toks: (0, 0)),          # h0
            pl.BlockSpec((B, Hp), lambda i, toks: (0, 0)),          # c0
        ],
        out_specs=(
            pl.BlockSpec((TB, Hp), lambda i, toks: (0, 0)),         # h_seq (lane-dense slab)
            pl.BlockSpec((TB, Hp), lambda i, toks: (0, 0)),         # c_seq
        ),
        scratch_shapes=[pltpu.VMEM((TB, Hp), jnp.float32),          # gathered embeddings
                        pltpu.VMEM((TB, 4 * Hp), jnp.float32)],     # input-side gate preacts
    )

    return pl.pallas_call(
        _encoder_lstm_kernel,
        out_shape=(jax.ShapeDtypeStruct((TB, Hp), jnp.float32),
                   jax.ShapeDtypeStruct((TB, Hp), jnp.float32)),
        grid_spec=grid_spec,
        compiler_params=pltpu.CompilerParams(
            dimension_semantics=("arbitrary",)),                    # sequential recurrence
    )(toks_flat, emb, wx, wh, b, h0, c0)


_run_batched_jit = jax.jit(_run_batched)


def encoder_rnn_sequence_batched(tokens_bt, h0_bh, c0_bh, packed):
    """Run B independent sequences in one kernel call.

    tokens_bt: (B, T) int; h0_bh/c0_bh: (B, H) f32.
    Returns (h_seq, c_seq) each of shape (B, T, H).
    """
    H, Hp = packed["H"], packed["Hp"]
    tokens_bt = jnp.asarray(tokens_bt, jnp.int32)
    B, T = tokens_bt.shape
    Bp = _round_up(max(B, 1), SUBLANE)

    toks = jnp.zeros((Bp, T), jnp.int32).at[:B].set(tokens_bt)
    h0 = jnp.zeros((Bp, Hp), jnp.float32).at[:B, :H].set(
        jnp.asarray(h0_bh, jnp.float32).reshape(B, H))
    c0 = jnp.zeros((Bp, Hp), jnp.float32).at[:B, :H].set(
        jnp.asarray(c0_bh, jnp.float32).reshape(B, H))
    toks_flat = toks.T.reshape(T * Bp)                  # time-major: row t*Bp + b

    h_seq, c_seq = _run_batched_jit(toks_flat, h0, c0,
                                    packed["emb"], packed["wx"], packed["wh"], packed["b"])
    h_seq = h_seq.reshape(T, Bp, Hp)[:, :B, :H].transpose(1, 0, 2)
    c_seq = c_seq.reshape(T, Bp, Hp)[:, :B, :H].transpose(1, 0, 2)
    return h_seq, c_seq


def encoder_rnn_sequence(tokens, hidden, cell, packed):
    """Single-sequence convenience wrapper (matches T successive EncoderRNN.forward calls)."""
    H = packed["H"]
    toks = jnp.asarray(tokens, jnp.int32).reshape(1, -1)
    T = toks.shape[1]
    h_seq, c_seq = encoder_rnn_sequence_batched(
        toks, hidden.reshape(1, H), cell.reshape(1, H), packed)
    h_seq, c_seq = h_seq[0], c_seq[0]
    outputs = h_seq.reshape(T, 1, 1, H)
    hidden_out = h_seq[T - 1].reshape(1, 1, H)
    cell_out = c_seq[T - 1].reshape(H, 1)
    return outputs, hidden_out, cell_out, h_seq, c_seq


def encoder_rnn_forward(token, hidden, cell, packed):
    """Single-step forward matching EncoderRNN.forward exactly (T=1 instance of the kernel)."""
    H = packed["H"]
    toks = jnp.asarray(token, jnp.int32).reshape(1, 1)
    h_seq, c_seq = encoder_rnn_sequence_batched(
        toks, hidden.reshape(1, H), cell.reshape(1, H), packed)
    h_t = h_seq[0, 0]
    c_t = c_seq[0, 0]
    return h_t.reshape(1, 1, H), h_t.reshape(1, 1, H), c_t.reshape(H, 1)


def pack_params(params, lane=LANE):
    """One-time weight packing + lane padding (kept f32 so the 1e-5 check stays valid)."""
    V, H = params["embedding"].shape
    Hp = _round_up(H, lane)
    f32 = jnp.float32

    emb = jnp.zeros((V, Hp), f32).at[:, :H].set(params["embedding"].astype(f32))

    def place(dst, w, k):
        # reference computes W @ x (column form); row form uses x_row @ W^T
        return dst.at[:H, k * Hp:k * Hp + H].set(w.astype(f32).T)

    wx = jnp.zeros((Hp, 4 * Hp), f32)
    for k, name in enumerate(("w_ii", "w_if", "w_ig", "w_io")):
        wx = place(wx, params[name], k)
    wh = jnp.zeros((Hp, 4 * Hp), f32)
    for k, name in enumerate(("w_hi", "w_hf", "w_hg", "w_ho")):
        wh = place(wh, params[name], k)

    b = jnp.zeros((1, 4 * Hp), f32)
    for k, name in enumerate(("b_i", "b_f", "b_g", "b_o")):
        b = b.at[0, k * Hp:k * Hp + H].set(params[name].astype(f32).reshape(H))

    return {"emb": emb, "wx": wx, "wh": wh, "b": b, "H": H, "Hp": Hp, "V": V}


def init_params(key, input_size, hidden_size):
    """Deterministic parameter init mirroring the PyTorch module's shapes."""
    stdv = 1.0 / math.sqrt(hidden_size)
    keys = jax.random.split(key, 13)
    u = lambda k, shape: jax.random.uniform(k, shape, jnp.float32, -stdv, stdv)
    return {
        "embedding": jax.random.normal(keys[0], (input_size, hidden_size), jnp.float32),
        "w_ii": u(keys[1], (hidden_size, hidden_size)),
        "w_if": u(keys[2], (hidden_size, hidden_size)),
        "w_ig": u(keys[3], (hidden_size, hidden_size)),
        "w_io": u(keys[4], (hidden_size, hidden_size)),
        "w_hi": u(keys[5], (hidden_size, hidden_size)),
        "w_hf": u(keys[6], (hidden_size, hidden_size)),
        "w_hg": u(keys[7], (hidden_size, hidden_size)),
        "w_ho": u(keys[8], (hidden_size, hidden_size)),
        "b_i": u(keys[9], (hidden_size, 1)),
        "b_f": u(keys[10], (hidden_size, 1)),
        "b_g": u(keys[11], (hidden_size, 1)),
        "b_o": u(keys[12], (hidden_size, 1)),
    }


def _reference_step(token, hidden, cell, params):
    """Pure-JAX reference matching the PyTorch code line-by-line."""
    H = params["embedding"].shape[1]
    x = params["embedding"][token].reshape(H, 1)
    h = hidden.reshape(H, 1)
    c = cell.reshape(H, 1)
    sig = jax.nn.sigmoid
    i_t = sig(params["w_ii"] @ x + params["w_hi"] @ h + params["b_i"])
    f_t = sig(params["w_if"] @ x + params["w_hf"] @ h + params["b_f"])
    g_t = sig(params["w_ig"] @ x + params["w_hg"] @ h + params["b_g"])  # sigmoid as in reference
    o_t = sig(params["w_io"] @ x + params["w_ho"] @ h + params["b_o"])
    c_t = f_t * c + i_t * g_t
    h_t = o_t * jnp.tanh(c_t)
    return h_t.reshape(1, 1, H), h_t.reshape(1, 1, H), c_t


if __name__ == "__main__":
    INPUT_SIZE = 16    # vocab size
    HIDDEN_SIZE = 32
    SEQ_LEN = 8
    BATCH = 8          # multiple of 8 sublanes; independent sequences share one kernel call

    key = jax.random.PRNGKey(0)
    pkey, hkey, ckey, tkey = jax.random.split(key, 4)
    params = init_params(pkey, INPUT_SIZE, HIDDEN_SIZE)
    packed = pack_params(params)   # hoisted out of the per-step path

    tokens = jax.random.randint(tkey, (BATCH, SEQ_LEN), 0, INPUT_SIZE, dtype=jnp.int32)
    h0 = jax.random.normal(hkey, (BATCH, HIDDEN_SIZE), jnp.float32)
    c0 = jax.random.normal(ckey, (BATCH, HIDDEN_SIZE), jnp.float32)

    # --- batched full-sequence kernel (one pallas_call, time loop inside) ---
    h_seq, c_seq = encoder_rnn_sequence_batched(tokens, h0, c0, packed)
    jax.block_until_ready((h_seq, c_seq))

    # --- pure-JAX reference: iterate the PyTorch-equivalent step per sequence ---
    ref_h_rows, ref_c_rows = [], []
    for b in range(BATCH):
        rh, rc = h0[b], c0[b]
        hrows, crows = [], []
        for t in range(SEQ_LEN):
            _, rh, rc = _reference_step(int(tokens[b, t]), rh, rc, params)
            hrows.append(rh.reshape(HIDDEN_SIZE))
            crows.append(rc.reshape(HIDDEN_SIZE))
        ref_h_rows.append(jnp.stack(hrows))
        ref_c_rows.append(jnp.stack(crows))
    ref_h_seq = jnp.stack(ref_h_rows)   # (B, T, H)
    ref_c_seq = jnp.stack(ref_c_rows)   # (B, T, H)

    assert h_seq.shape == (BATCH, SEQ_LEN, HIDDEN_SIZE)
    assert c_seq.shape == (BATCH, SEQ_LEN, HIDDEN_SIZE)
    assert jnp.allclose(h_seq, ref_h_seq, atol=1e-5), "batched per-step hidden mismatch"
    assert jnp.allclose(c_seq, ref_c_seq, atol=1e-5), "batched per-step cell mismatch"

    # --- single-sequence API parity ---
    outputs, h_fin, c_fin, h_seq0, c_seq0 = encoder_rnn_sequence(
        tokens[0], h0[0], c0[0], packed)
    jax.block_until_ready((outputs, h_fin, c_fin))
    assert outputs.shape == (SEQ_LEN, 1, 1, HIDDEN_SIZE)
    assert h_fin.shape == (1, 1, HIDDEN_SIZE)
    assert c_fin.shape == (HIDDEN_SIZE, 1)
    assert jnp.allclose(h_seq0, ref_h_seq[0], atol=1e-5), "sequence hidden mismatch"
    assert jnp.allclose(c_seq0, ref_c_seq[0], atol=1e-5), "sequence cell mismatch"

    # --- single-step API parity with EncoderRNN.forward ---
    out1, h1, c1 = encoder_rnn_forward(tokens[0, 0], h0[0], c0[0], packed)
    jax.block_until_ready((out1, h1, c1))
    r_out1, r_h1, r_c1 = _reference_step(int(tokens[0, 0]), h0[0], c0[0], params)
    assert out1.shape == (1, 1, HIDDEN_SIZE) and c1.shape == (HIDDEN_SIZE, 1)
    assert jnp.allclose(out1, r_out1, atol=1e-5), "single-step hidden mismatch"
    assert jnp.allclose(c1, r_c1, atol=1e-5), "single-step cell mismatch"

    print("KERNEL_OK")
</pallas_src>

<mosaic_0001>
module attributes {stable_mosaic.version = 11 : i64} {
  func.func @_encoder_lstm_kernel(%arg0: i32, %arg1: memref<64xi32, #tpu.memory_space<smem>>, %arg2: memref<16x128xf32, #tpu.memory_space<vmem>>, %arg3: memref<128x512xf32, #tpu.memory_space<vmem>>, %arg4: memref<128x512xf32, #tpu.memory_space<vmem>>, %arg5: memref<1x512xf32, #tpu.memory_space<vmem>>, %arg6: memref<8x128xf32, #tpu.memory_space<vmem>>, %arg7: memref<8x128xf32, #tpu.memory_space<vmem>>, %arg8: memref<64x128xf32, #tpu.memory_space<vmem>>, %arg9: memref<64x128xf32, #tpu.memory_space<vmem>>, %arg10: memref<64x128xf32, #tpu.memory_space<vmem>>, %arg11: memref<64x512xf32, #tpu.memory_space<vmem>>) attributes {dimension_semantics = [#tpu.dimension_semantics<arbitrary>], iteration_bounds = array<i64: 1>, scalar_prefetch = 1 : i64, scratch_operands = 2 : i64, tpu.core_type = #tpu.core_type<tc>, window_params = [{pipeline_mode = #tpu.pipeline_mode<synchronous>, transform_indices = @transform_0, window_bounds = array<i64: 16, 128>}, {pipeline_mode = #tpu.pipeline_mode<synchronous>, transform_indices = @transform_1, window_bounds = array<i64: 128, 512>}, {pipeline_mode = #tpu.pipeline_mode<synchronous>, transform_indices = @transform_2, window_bounds = array<i64: 128, 512>}, {pipeline_mode = #tpu.pipeline_mode<synchronous>, transform_indices = @transform_3, window_bounds = array<i64: 1, 512>}, {pipeline_mode = #tpu.pipeline_mode<synchronous>, transform_indices = @transform_4, window_bounds = array<i64: 8, 128>}, {pipeline_mode = #tpu.pipeline_mode<synchronous>, transform_indices = @transform_5, window_bounds = array<i64: 8, 128>}, {pipeline_mode = #tpu.pipeline_mode<synchronous>, transform_indices = @transform_6, window_bounds = array<i64: 64, 128>}, {pipeline_mode = #tpu.pipeline_mode<synchronous>, transform_indices = @transform_7, window_bounds = array<i64: 64, 128>}]} {
    %c0_i32 = arith.constant 0 : i32
    %0 = arith.index_cast %c0_i32 : i32 to index
    %1 = memref.load %arg1[%0] : memref<64xi32, #tpu.memory_space<smem>>
    %c0_i32_0 = arith.constant 0 : i32
    %2 = arith.maxsi %1, %c0_i32_0 : i32
    %c15_i32 = arith.constant 15 : i32
    %3 = arith.minsi %2, %c15_i32 : i32
    %4 = arith.index_cast %3 : i32 to index
    %c0 = arith.constant 0 : index
    %5 = vector.load %arg2[%4, %c0] : memref<16x128xf32, #tpu.memory_space<vmem>>, vector<1x128xf32>
    %6 = arith.index_cast %c0_i32 : i32 to index
    %c0_1 = arith.constant 0 : index
    %7 = vector.load %arg10[%6, %c0_1] : memref<64x128xf32, #tpu.memory_space<vmem>>, vector<1x128xf32>
    tpu.vector_store %arg10[%6, %c0_1], %5 {strides = array<i32>} : memref<64x128xf32, #tpu.memory_space<vmem>>, vector<1x128xf32>,
    %c1_i32 = arith.constant 1 : i32
    %8 = arith.index_cast %c1_i32 : i32 to index
    %9 = memref.load %arg1[%8] : memref<64xi32, #tpu.memory_space<smem>>
    %c0_i32_2 = arith.constant 0 : i32
    %10 = arith.maxsi %9, %c0_i32_2 : i32
    %c15_i32_3 = arith.constant 15 : i32
    %11 = arith.minsi %10, %c15_i32_3 : i32
    %12 = arith.index_cast %11 : i32 to index
    %c0_4 = arith.constant 0 : index
    %13 = vector.load %arg2[%12, %c0_4] : memref<16x128xf32, #tpu.memory_space<vmem>>, vector<1x128xf32>
    %14 = arith.index_cast %c1_i32 : i32 to index
    %c0_5 = arith.constant 0 : index
    %15 = vector.load %arg10[%14, %c0_5] : memref<64x128xf32, #tpu.memory_space<vmem>>, vector<1x128xf32>
    tpu.vector_store %arg10[%14, %c0_5], %13 {strides = array<i32>} : memref<64x128xf32, #tpu.memory_space<vmem>>, vector<1x128xf32>,
    %c2_i32 = arith.constant 2 : i32
    %16 = arith.index_cast %c2_i32 : i32 to index
    %17 = memref.load %arg1[%16] : memref<64xi32, #tpu.memory_space<smem>>
    %c0_i32_6 = arith.constant 0 : i32
    %18 = arith.maxsi %17, %c0_i32_6 : i32
    %c15_i32_7 = arith.constant 15 : i32
    %19 = arith.minsi %18, %c15_i32_7 : i32
    %20 = arith.index_cast %19 : i32 to index
    %c0_8 = arith.constant 0 : index
    %21 = vector.load %arg2[%20, %c0_8] : memref<16x128xf32, #tpu.memory_space<vmem>>, vector<1x128xf32>
    %22 = arith.index_cast %c2_i32 : i32 to index
    %c0_9 = arith.constant 0 : index
    %23 = vector.load %arg10[%22, %c0_9] : memref<64x128xf32, #tpu.memory_space<vmem>>, vector<1x128xf32>
    tpu.vector_store %arg10[%22, %c0_9], %21 {strides = array<i32>} : memref<64x128xf32, #tpu.memory_space<vmem>>, vector<1x128xf32>,
    %c3_i32 = arith.constant 3 : i32
    %24 = arith.index_cast %c3_i32 : i32 to index
    %25 = memref.load %arg1[%24] : memref<64xi32, #tpu.memory_space<smem>>
    %c0_i32_10 = arith.constant 0 : i32
    %26 = arith.maxsi %25, %c0_i32_10 : i32
    %c15_i32_11 = arith.constant 15 : i32
    %27 = arith.minsi %26, %c15_i32_11 : i32
    %28 = arith.index_cast %27 : i32 to index
    %c0_12 = arith.constant 0 : index
    %29 = vector.load %arg2[%28, %c0_12] : memref<16x128xf32, #tpu.memory_space<vmem>>, vector<1x128xf32>
    %30 = arith.index_cast %c3_i32 : i32 to index
    %c0_13 = arith.constant 0 : index
    %31 = vector.load %arg10[%30, %c0_13] : memref<64x128xf32, #tpu.memory_space<vmem>>, vector<1x128xf32>
    tpu.vector_store %arg10[%30, %c0_13], %29 {strides = array<i32>} : memref<64x128xf32, #tpu.memory_space<vmem>>, vector<1x128xf32>,
    %c4_i32 = arith.constant 4 : i32
    %32 = arith.index_cast %c4_i32 : i32 to index
    %33 = memref.load %arg1[%32] : memref<64xi32, #tpu.memory_space<smem>>
    %c0_i32_14 = arith.constant 0 : i32
    %34 = arith.maxsi %33, %c0_i32_14 : i32
    %c15_i32_15 = arith.constant 15 : i32
    %35 = arith.minsi %34, %c15_i32_15 : i32
    %36 = arith.index_cast %35 : i32 to index
    %c0_16 = arith.constant 0 : index
    %37 = vector.load %arg2[%36, %c0_16] : memref<16x128xf32, #tpu.memory_space<vmem>>, vector<1x128xf32>
    %38 = arith.index_cast %c4_i32 : i32 to index
    %c0_17 = arith.constant 0 : index
    %39 = vector.load %arg10[%38, %c0_17] : memref<64x128xf32, #tpu.memory_space<vmem>>, vector<1x128xf32>
    tpu.vector_store %arg10[%38, %c0_17], %37 {strides = array<i32>} : memref<64x128xf32, #tpu.memory_space<vmem>>, vector<1x128xf32>,
    %c5_i32 = arith.constant 5 : i32
    %40 = arith.index_cast %c5_i32 : i32 to index
    %41 = memref.load %arg1[%40] : memref<64xi32, #tpu.memory_space<smem>>
    %c0_i32_18 = arith.constant 0 : i32
    %42 = arith.maxsi %41, %c0_i32_18 : i32
    %c15_i32_19 = arith.constant 15 : i32
    %43 = arith.minsi %42, %c15_i32_19 : i32
    %44 = arith.index_cast %43 : i32 to index
    %c0_20 = arith.constant 0 : index
    %45 = vector.load %arg2[%44, %c0_20] : memref<16x128xf32, #tpu.memory_space<vmem>>, vector<1x128xf32>
    %46 = arith.index_cast %c5_i32 : i32 to index
    %c0_21 = arith.constant 0 : index
    %47 = vector.load %arg10[%46, %c0_21] : memref<64x128xf32, #tpu.memory_space<vmem>>, vector<1x128xf32>
    tpu.vector_store %arg10[%46, %c0_21], %45 {strides = array<i32>} : memref<64x128xf32, #tpu.memory_space<vmem>>, vector<1x128xf32>,
    %c6_i32 = arith.constant 6 : i32
    %48 = arith.index_cast %c6_i32 : i32 to index
    %49 = memref.load %arg1[%48] : memref<64xi32, #tpu.memory_space<smem>>
    %c0_i32_22 = arith.constant 0 : i32
    %50 = arith.maxsi %49, %c0_i32_22 : i32
    %c15_i32_23 = arith.constant 15 : i32
    %51 = arith.minsi %50, %c15_i32_23 : i32
    %52 = arith.index_cast %51 : i32 to index
    %c0_24 = arith.constant 0 : index
    %53 = vector.load %arg2[%52, %c0_24] : memref<16x128xf32, #tpu.memory_space<vmem>>, vector<1x128xf32>
    %54 = arith.index_cast %c6_i32 : i32 to index
    %c0_25 = arith.constant 0 : index
    %55 = vector.load %arg10[%54, %c0_25] : memref<64x128xf32, #tpu.memory_space<vmem>>, vector<1x128xf32>
    tpu.vector_store %arg10[%54, %c0_25], %53 {strides = array<i32>} : memref<64x128xf32, #tpu.memory_space<vmem>>, vector<1x128xf32>,
    %c7_i32 = arith.constant 7 : i32
    %56 = arith.index_cast %c7_i32 : i32 to index
    %57 = memref.load %arg1[%56] : memref<64xi32, #tpu.memory_space<smem>>
    %c0_i32_26 = arith.constant 0 : i32
    %58 = arith.maxsi %57, %c0_i32_26 : i32
    %c15_i32_27 = arith.constant 15 : i32
    %59 = arith.minsi %58, %c15_i32_27 : i32
    %60 = arith.index_cast %59 : i32 to index
    %c0_28 = arith.constant 0 : index
    %61 = vector.load %arg2[%60, %c0_28] : memref<16x128xf32, #tpu.memory_space<vmem>>, vector<1x128xf32>
    %62 = arith.index_cast %c7_i32 : i32 to index
    %c0_29 = arith.constant 0 : index
    %63 = vector.load %arg10[%62, %c0_29] : memref<64x128xf32, #tpu.memory_space<vmem>>, vector<1x128xf32>
    tpu.vector_store %arg10[%62, %c0_29], %61 {strides = array<i32>} : memref<64x128xf32, #tpu.memory_space<vmem>>, vector<1x128xf32>,
    %c8_i32 = arith.constant 8 : i32
    %64 = arith.index_cast %c8_i32 : i32 to index
    %65 = memref.load %arg1[%64] : memref<64xi32, #tpu.memory_space<smem>>
    %c0_i32_30 = arith.constant 0 : i32
    %66 = arith.maxsi %65, %c0_i32_30 : i32
    %c15_i32_31 = arith.constant 15 : i32
    %67 = arith.minsi %66, %c15_i32_31 : i32
    %68 = arith.index_cast %67 : i32 to index
    %c0_32 = arith.constant 0 : index
    %69 = vector.load %arg2[%68, %c0_32] : memref<16x128xf32, #tpu.memory_space<vmem>>, vector<1x128xf32>
    %70 = arith.index_cast %c8_i32 : i32 to index
    %c0_33 = arith.constant 0 : index
    %71 = vector.load %arg10[%70, %c0_33] : memref<64x128xf32, #tpu.memory_space<vmem>>, vector<1x128xf32>
    tpu.vector_store %arg10[%70, %c0_33], %69 {strides = array<i32>} : memref<64x128xf32, #tpu.memory_space<vmem>>, vector<1x128xf32>,
    %c9_i32 = arith.constant 9 : i32
    %72 = arith.index_cast %c9_i32 : i32 to index
    %73 = memref.load %arg1[%72] : memref<64xi32, #tpu.memory_space<smem>>
    %c0_i32_34 = arith.constant 0 : i32
    %74 = arith.maxsi %73, %c0_i32_34 : i32
    %c15_i32_35 = arith.constant 15 : i32
    %75 = arith.minsi %74, %c15_i32_35 : i32
    %76 = arith.index_cast %75 : i32 to index
    %c0_36 = arith.constant 0 : index
    %77 = vector.load %arg2[%76, %c0_36] : memref<16x128xf32, #tpu.memory_space<vmem>>, vector<1x128xf32>
    %78 = arith.index_cast %c9_i32 : i32 to index
    %c0_37 = arith.constant 0 : index
    %79 = vector.load %arg10[%78, %c0_37] : memref<64x128xf32, #tpu.memory_space<vmem>>, vector<1x128xf32>
    tpu.vector_store %arg10[%78, %c0_37], %77 {strides = array<i32>} : memref<64x128xf32, #tpu.memory_space<vmem>>, vector<1x128xf32>,
    %c10_i32 = arith.constant 10 : i32
    %80 = arith.index_cast %c10_i32 : i32 to index
    %81 = memref.load %arg1[%80] : memref<64xi32, #tpu.memory_space<smem>>
    %c0_i32_38 = arith.constant 0 : i32
    %82 = arith.maxsi %81, %c0_i32_38 : i32
    %c15_i32_39 = arith.constant 15 : i32
    %83 = arith.minsi %82, %c15_i32_39 : i32
    %84 = arith.index_cast %83 : i32 to index
    %c0_40 = arith.constant 0 : index
    %85 = vector.load %arg2[%84, %c0_40] : memref<16x128xf32, #tpu.memory_space<vmem>>, vector<1x128xf32>
    %86 = arith.index_cast %c10_i32 : i32 to index
    %c0_41 = arith.constant 0 : index
    %87 = vector.load %arg10[%86, %c0_41] : memref<64x128xf32, #tpu.memory_space<vmem>>, vector<1x128xf32>
    tpu.vector_store %arg10[%86, %c0_41], %85 {strides = array<i32>} : memref<64x128xf32, #tpu.memory_space<vmem>>, vector<1x128xf32>,
    %c11_i32 = arith.constant 11 : i32
    %88 = arith.index_cast %c11_i32 : i32 to index
    %89 = memref.load %arg1[%88] : memref<64xi32, #tpu.memory_space<smem>>
    %c0_i32_42 = arith.constant 0 : i32
    %90 = arith.maxsi %89, %c0_i32_42 : i32
    %c15_i32_43 = arith.constant 15 : i32
    %91 = arith.minsi %90, %c15_i32_43 : i32
    %92 = arith.index_cast %91 : i32 to index
    %c0_44 = arith.constant 0 : index
    %93 = vector.load %arg2[%92, %c0_44] : memref<16x128xf32, #tpu.memory_space<vmem>>, vector<1x128xf32>
    %94 = arith.index_cast %c11_i32 : i32 to index
    %c0_45 = arith.constant 0 : index
    %95 = vector.load %arg10[%94, %c0_45] : memref<64x128xf32, #tpu.memory_space<vmem>>, vector<1x128xf32>
    tpu.vector_store %arg10[%94, %c0_45], %93 {strides = array<i32>} : memref<64x128xf32, #tpu.memory_space<vmem>>, vector<1x128xf32>,
    %c12_i32 = arith.constant 12 : i32
    %96 = arith.index_cast %c12_i32 : i32 to index
    %97 = memref.load %arg1[%96] : memref<64xi32, #tpu.memory_space<smem>>
    %c0_i32_46 = arith.constant 0 : i32
    %98 = arith.maxsi %97, %c0_i32_46 : i32
    %c15_i32_47 = arith.constant 15 : i32
    %99 = arith.minsi %98, %c15_i32_47 : i32
    %100 = arith.index_cast %99 : i32 to index
    %c0_48 = arith.constant 0 : index
    %101 = vector.load %arg2[%100, %c0_48] : memref<16x128xf32, #tpu.memory_space<vmem>>, vector<1x128xf32>
    %102 = arith.index_cast %c12_i32 : i32 to index
    %c0_49 = arith.constant 0 : index
    %103 = vector.load %arg10[%102, %c0_49] : memref<64x128xf32, #tpu.memory_space<vmem>>, vector<1x128xf32>
    tpu.vector_store %arg10[%102, %c0_49], %101 {strides = array<i32>} : memref<64x128xf32, #tpu.memory_space<vmem>>, vector<1x128xf32>,
    %c13_i32 = arith.constant 13 : i32
    %104 = arith.index_cast %c13_i32 : i32 to index
    %105 = memref.load %arg1[%104] : memref<64xi32, #tpu.memory_space<smem>>
    %c0_i32_50 = arith.constant 0 : i32
    %106 = arith.maxsi %105, %c0_i32_50 : i32
    %c15_i32_51 = arith.constant 15 : i32
    %107 = arith.minsi %106, %c15_i32_51 : i32
    %108 = arith.index_cast %107 : i32 to index
    %c0_52 = arith.constant 0 : index
    %109 = vector.load %arg2[%108, %c0_52] : memref<16x128xf32, #tpu.memory_space<vmem>>, vector<1x128xf32>
    %110 = arith.index_cast %c13_i32 : i32 to index
    %c0_53 = arith.constant 0 : index
    %111 = vector.load %arg10[%110, %c0_53] : memref<64x128xf32, #tpu.memory_space<vmem>>, vector<1x128xf32>
    tpu.vector_store %arg10[%110, %c0_53], %109 {strides = array<i32>} : memref<64x128xf32, #tpu.memory_space<vmem>>, vector<1x128xf32>,
    %c14_i32 = arith.constant 14 : i32
    %112 = arith.index_cast %c14_i32 : i32 to index
    %113 = memref.load %arg1[%112] : memref<64xi32, #tpu.memory_space<smem>>
    %c0_i32_54 = arith.constant 0 : i32
    %114 = arith.maxsi %113, %c0_i32_54 : i32
    %c15_i32_55 = arith.constant 15 : i32
    %115 = arith.minsi %114, %c15_i32_55 : i32
    %116 = arith.index_cast %115 : i32 to index
    %c0_56 = arith.constant 0 : index
    %117 = vector.load %arg2[%116, %c0_56] : memref<16x128xf32, #tpu.memory_space<vmem>>, vector<1x128xf32>
    %118 = arith.index_cast %c14_i32 : i32 to index
    %c0_57 = arith.constant 0 : index
    %119 = vector.load %arg10[%118, %c0_57] : memref<64x128xf32, #tpu.memory_space<vmem>>, vector<1x128xf32>
    tpu.vector_store %arg10[%118, %c0_57], %117 {strides = array<i32>} : memref<64x128xf32, #tpu.memory_space<vmem>>, vector<1x128xf32>,
    %c15_i32_58 = arith.constant 15 : i32
    %120 = arith.index_cast %c15_i32_58 : i32 to index
    %121 = memref.load %arg1[%120] : memref<64xi32, #tpu.memory_space<smem>>
    %c0_i32_59 = arith.constant 0 : i32
    %122 = arith.maxsi %121, %c0_i32_59 : i32
    %c15_i32_60 = arith.constant 15 : i32
    %123 = arith.minsi %122, %c15_i32_60 : i32
    %124 = arith.index_cast %123 : i32 to index
    %c0_61 = arith.constant 0 : index
    %125 = vector.load %arg2[%124, %c0_61] : memref<16x128xf32, #tpu.memory_space<vmem>>, vector<1x128xf32>
    %126 = arith.index_cast %c15_i32_58 : i32 to index
    %c0_62 = arith.constant 0 : index
    %127 = vector.load %arg10[%126, %c0_62] : memref<64x128xf32, #tpu.memory_space<vmem>>, vector<1x128xf32>
    tpu.vector_store %arg10[%126, %c0_62], %125 {strides = array<i32>} : memref<64x128xf32, #tpu.memory_space<vmem>>, vector<1x128xf32>,
    %c16_i32 = arith.constant 16 : i32
    %128 = arith.index_cast %c16_i32 : i32 to index
    %129 = memref.load %arg1[%128] : memref<64xi32, #tpu.memory_space<smem>>
    %c0_i32_63 = arith.constant 0 : i32
    %130 = arith.maxsi %129, %c0_i32_63 : i32
    %c15_i32_64 = arith.constant 15 : i32
    %131 = arith.minsi %130, %c15_i32_64 : i32
    %132 = arith.index_cast %131 : i32 to index
    %c0_65 = arith.constant 0 : index
    %133 = vector.load %arg2[%132, %c0_65] : memref<16x128xf32, #tpu.memory_space<vmem>>, vector<1x128xf32>
    %134 = arith.index_cast %c16_i32 : i32 to index
    %c0_66 = arith.constant 0 : index
    %135 = vector.load %arg10[%134, %c0_66] : memref<64x128xf32, #tpu.memory_space<vmem>>, vector<1x128xf32>
    tpu.vector_store %arg10[%134, %c0_66], %133 {strides = array<i32>} : memref<64x128xf32, #tpu.memory_space<vmem>>, vector<1x128xf32>,
    %c17_i32 = arith.constant 17 : i32
    %136 = arith.index_cast %c17_i32 : i32 to index
    %137 = memref.load %arg1[%136] : memref<64xi32, #tpu.memory_space<smem>>
    %c0_i32_67 = arith.constant 0 : i32
    %138 = arith.maxsi %137, %c0_i32_67 : i32
    %c15_i32_68 = arith.constant 15 : i32
    %139 = arith.minsi %138, %c15_i32_68 : i32
    %140 = arith.index_cast %139 : i32 to index
    %c0_69 = arith.constant 0 : index
    %141 = vector.load %arg2[%140, %c0_69] : memref<16x128xf32, #tpu.memory_space<vmem>>, vector<1x128xf32>
    %142 = arith.index_cast %c17_i32 : i32 to index
    %c0_70 = arith.constant 0 : index
    %143 = vector.load %arg10[%142, %c0_70] : memref<64x128xf32, #tpu.memory_space<vmem>>, vector<1x128xf32>
    tpu.vector_store %arg10[%142, %c0_70], %141 {strides = array<i32>} : memref<64x128xf32, #tpu.memory_space<vmem>>, vector<1x128xf32>,
    %c18_i32 = arith.constant 18 : i32
    %144 = arith.index_cast %c18_i32 : i32 to index
    %145 = memref.load %arg1[%144] : memref<64xi32, #tpu.memory_space<smem>>
    %c0_i32_71 = arith.constant 0 : i32
    %146 = arith.maxsi %145, %c0_i32_71 : i32
    %c15_i32_72 = arith.constant 15 : i32
    %147 = arith.minsi %146, %c15_i32_72 : i32
    %148 = arith.index_cast %147 : i32 to index
    %c0_73 = arith.constant 0 : index
    %149 = vector.load %arg2[%148, %c0_73] : memref<16x128xf32, #tpu.memory_space<vmem>>, vector<1x128xf32>
    %150 = arith.index_cast %c18_i32 : i32 to index
    %c0_74 = arith.constant 0 : index
    %151 = vector.load %arg10[%150, %c0_74] : memref<64x128xf32, #tpu.memory_space<vmem>>, vector<1x128xf32>
    tpu.vector_store %arg10[%150, %c0_74], %149 {strides = array<i32>} : memref<64x128xf32, #tpu.memory_space<vmem>>, vector<1x128xf32>,
    %c19_i32 = arith.constant 19 : i32
    %152 = arith.index_cast %c19_i32 : i32 to index
    %153 = memref.load %arg1[%152] : memref<64xi32, #tpu.memory_space<smem>>
    %c0_i32_75 = arith.constant 0 : i32
    %154 = arith.maxsi %153, %c0_i32_75 : i32
    %c15_i32_76 = arith.constant 15 : i32
    %155 = arith.minsi %154, %c15_i32_76 : i32
    %156 = arith.index_cast %155 : i32 to index
    %c0_77 = arith.constant 0 : index
    %157 = vector.load %arg2[%156, %c0_77] : memref<16x128xf32, #tpu.memory_space<vmem>>, vector<1x128xf32>
    %158 = arith.index_cast %c19_i32 : i32 to index
    %c0_78 = arith.constant 0 : index
    %159 = vector.load %arg10[%158, %c0_78] : memref<64x128xf32, #tpu.memory_space<vmem>>, vector<1x128xf32>
    tpu.vector_store %arg10[%158, %c0_78], %157 {strides = array<i32>} : memref<64x128xf32, #tpu.memory_space<vmem>>, vector<1x128xf32>,
    %c20_i32 = arith.constant 20 : i32
    %160 = arith.index_cast %c20_i32 : i32 to index
    %161 = memref.load %arg1[%160] : memref<64xi32, #tpu.memory_space<smem>>
    %c0_i32_79 = arith.constant 0 : i32
    %162 = arith.maxsi %161, %c0_i32_79 : i32
    %c15_i32_80 = arith.constant 15 : i32
    %163 = arith.minsi %162, %c15_i32_80 : i32
    %164 = arith.index_cast %163 : i32 to index
    %c0_81 = arith.constant 0 : index
    %165 = vector.load %arg2[%164, %c0_81] : memref<16x128xf32, #tpu.memory_space<vmem>>, vector<1x128xf32>
    %166 = arith.index_cast %c20_i32 : i32 to index
    %c0_82 = arith.constant 0 : index
    %167 = vector.load %arg10[%166, %c0_82] : memref<64x128xf32, #tpu.memory_space<vmem>>, vector<1x128xf32>
    tpu.vector_store %arg10[%166, %c0_82], %165 {strides = array<i32>} : memref<64x128xf32, #tpu.memory_space<vmem>>, vector<1x128xf32>,
    %c21_i32 = arith.constant 21 : i32
    %168 = arith.index_cast %c21_i32 : i32 to index
    %169 = memref.load %arg1[%168] : memref<64xi32, #tpu.memory_space<smem>>
    %c0_i32_83 = arith.constant 0 : i32
    %170 = arith.maxsi %169, %c0_i32_83 : i32
    %c15_i32_84 = arith.constant 15 : i32
    %171 = arith.minsi %170, %c15_i32_84 : i32
    %172 = arith.index_cast %171 : i32 to index
    %c0_85 = arith.constant 0 : index
    %173 = vector.load %arg2[%172, %c0_85] : memref<16x128xf32, #tpu.memory_space<vmem>>, vector<1x128xf32>
    %174 = arith.index_cast %c21_i32 : i32 to index
    %c0_86 = arith.constant 0 : index
    %175 = vector.load %arg10[%174, %c0_86] : memref<64x128xf32, #tpu.memory_space<vmem>>, vector<1x128xf32>
    tpu.vector_store %arg10[%174, %c0_86], %173 {strides = array<i32>} : memref<64x128xf32, #tpu.memory_space<vmem>>, vector<1x128xf32>,
    %c22_i32 = arith.constant 22 : i32
    %176 = arith.index_cast %c22_i32 : i32 to index
    %177 = memref.load %arg1[%176] : memref<64xi32, #tpu.memory_space<smem>>
    %c0_i32_87 = arith.constant 0 : i32
    %178 = arith.maxsi %177, %c0_i32_87 : i32
    %c15_i32_88 = arith.constant 15 : i32
    %179 = arith.minsi %178, %c15_i32_88 : i32
    %180 = arith.index_cast %179 : i32 to index
    %c0_89 = arith.constant 0 : index
    %181 = vector.load %arg2[%180, %c0_89] : memref<16x128xf32, #tpu.memory_space<vmem>>, vector<1x128xf32>
    %182 = arith.index_cast %c22_i32 : i32 to index
    %c0_90 = arith.constant 0 : index
    %183 = vector.load %arg10[%182, %c0_90] : memref<64x128xf32, #tpu.memory_space<vmem>>, vector<1x128xf32>
    tpu.vector_store %arg10[%182, %c0_90], %181 {strides = array<i32>} : memref<64x128xf32, #tpu.memory_space<vmem>>, vector<1x128xf32>,
    %c23_i32 = arith.constant 23 : i32
    %184 = arith.index_cast %c23_i32 : i32 to index
    %185 = memref.load %arg1[%184] : memref<64xi32, #tpu.memory_space<smem>>
    %c0_i32_91 = arith.constant 0 : i32
    %186 = arith.maxsi %185, %c0_i32_91 : i32
    %c15_i32_92 = arith.constant 15 : i32
    %187 = arith.minsi %186, %c15_i32_92 : i32
    %188 = arith.index_cast %187 : i32 to index
    %c0_93 = arith.constant 0 : index
    %189 = vector.load %arg2[%188, %c0_93] : memref<16x128xf32, #tpu.memory_space<vmem>>, vector<1x128xf32>
    %190 = arith.index_cast %c23_i32 : i32 to index
    %c0_94 = arith.constant 0 : index
    %191 = vector.load %arg10[%190, %c0_94] : memref<64x128xf32, #tpu.memory_space<vmem>>, vector<1x128xf32>
    tpu.vector_store %arg10[%190, %c0_94], %189 {strides = array<i32>} : memref<64x128xf32, #tpu.memory_space<vmem>>, vector<1x128xf32>,
    %c24_i32 = arith.constant 24 : i32
    %192 = arith.index_cast %c24_i32 : i32 to index
    %193 = memref.load %arg1[%192] : memref<64xi32, #tpu.memory_space<smem>>
    %c0_i32_95 = arith.constant 0 : i32
    %194 = arith.maxsi %193, %c0_i32_95 : i32
    %c15_i32_96 = arith.constant 15 : i32
    %195 = arith.minsi %194, %c15_i32_96 : i32
    %196 = arith.index_cast %195 : i32 to index
    %c0_97 = arith.constant 0 : index
    %197 = vector.load %arg2[%196, %c0_97] : memref<16x128xf32, #tpu.memory_space<vmem>>, vector<1x128xf32>
    %198 = arith.index_cast %c24_i32 : i32 to index
    %c0_98 = arith.constant 0 : index
    %199 = vector.load %arg10[%198, %c0_98] : memref<64x128xf32, #tpu.memory_space<vmem>>, vector<1x128xf32>
    tpu.vector_store %arg10[%198, %c0_98], %197 {strides = array<i32>} : memref<64x128xf32, #tpu.memory_space<vmem>>, vector<1x128xf32>,
    %c25_i32 = arith.constant 25 : i32
    %200 = arith.index_cast %c25_i32 : i32 to index
    %201 = memref.load %arg1[%200] : memref<64xi32, #tpu.memory_space<smem>>
    %c0_i32_99 = arith.constant 0 : i32
    %202 = arith.maxsi %201, %c0_i32_99 : i32
    %c15_i32_100 = arith.constant 15 : i32
    %203 = arith.minsi %202, %c15_i32_100 : i32
    %204 = arith.index_cast %203 : i32 to index
    %c0_101 = arith.constant 0 : index
    %205 = vector.load %arg2[%204, %c0_101] : memref<16x128xf32, #tpu.memory_space<vmem>>, vector<1x128xf32>
    %206 = arith.index_cast %c25_i32 : i32 to index
    %c0_102 = arith.constant 0 : index
    %207 = vector.load %arg10[%206, %c0_102] : memref<64x128xf32, #tpu.memory_space<vmem>>, vector<1x128xf32>
    tpu.vector_store %arg10[%206, %c0_102], %205 {strides = array<i32>} : memref<64x128xf32, #tpu.memory_space<vmem>>, vector<1x128xf32>,
    %c26_i32 = arith.constant 26 : i32
    %208 = arith.index_cast %c26_i32 : i32 to index
    %209 = memref.load %arg1[%208] : memref<64xi32, #tpu.memory_space<smem>>
    %c0_i32_103 = arith.constant 0 : i32
    %210 = arith.maxsi %209, %c0_i32_103 : i32
    %c15_i32_104 = arith.constant 15 : i32
    %211 = arith.minsi %210, %c15_i32_104 : i32
    %212 = arith.index_cast %211 : i32 to index
    %c0_105 = arith.constant 0 : index
    %213 = vector.load %arg2[%212, %c0_105] : memref<16x128xf32, #tpu.memory_space<vmem>>, vector<1x128xf32>
    %214 = arith.index_cast %c26_i32 : i32 to index
    %c0_106 = arith.constant 0 : index
    %215 = vector.load %arg10[%214, %c0_106] : memref<64x128xf32, #tpu.memory_space<vmem>>, vector<1x128xf32>
    tpu.vector_store %arg10[%214, %c0_106], %213 {strides = array<i32>} : memref<64x128xf32, #tpu.memory_space<vmem>>, vector<1x128xf32>,
    %c27_i32 = arith.constant 27 : i32
    %216 = arith.index_cast %c27_i32 : i32 to index
    %217 = memref.load %arg1[%216] : memref<64xi32, #tpu.memory_space<smem>>
    %c0_i32_107 = arith.constant 0 : i32
    %218 = arith.maxsi %217, %c0_i32_107 : i32
    %c15_i32_108 = arith.constant 15 : i32
    %219 = arith.minsi %218, %c15_i32_108 : i32
    %220 = arith.index_cast %219 : i32 to index
    %c0_109 = arith.constant 0 : index
    %221 = vector.load %arg2[%220, %c0_109] : memref<16x128xf32, #tpu.memory_space<vmem>>, vector<1x128xf32>
    %222 = arith.index_cast %c27_i32 : i32 to index
    %c0_110 = arith.constant 0 : index
    %223 = vector.load %arg10[%222, %c0_110] : memref<64x128xf32, #tpu.memory_space<vmem>>, vector<1x128xf32>
    tpu.vector_store %arg10[%222, %c0_110], %221 {strides = array<i32>} : memref<64x128xf32, #tpu.memory_space<vmem>>, vector<1x128xf32>,
    %c28_i32 = arith.constant 28 : i32
    %224 = arith.index_cast %c28_i32 : i32 to index
    %225 = memref.load %arg1[%224] : memref<64xi32, #tpu.memory_space<smem>>
    %c0_i32_111 = arith.constant 0 : i32
    %226 = arith.maxsi %225, %c0_i32_111 : i32
    %c15_i32_112 = arith.constant 15 : i32
    %227 = arith.minsi %226, %c15_i32_112 : i32
    %228 = arith.index_cast %227 : i32 to index
    %c0_113 = arith.constant 0 : index
    %229 = vector.load %arg2[%228, %c0_113] : memref<16x128xf32, #tpu.memory_space<vmem>>, vector<1x128xf32>
    %230 = arith.index_cast %c28_i32 : i32 to index
    %c0_114 = arith.constant 0 : index
    %231 = vector.load %arg10[%230, %c0_114] : memref<64x128xf32, #tpu.memory_space<vmem>>, vector<1x128xf32>
    tpu.vector_store %arg10[%230, %c0_114], %229 {strides = array<i32>} : memref<64x128xf32, #tpu.memory_space<vmem>>, vector<1x128xf32>,
    %c29_i32 = arith.constant 29 : i32
    %232 = arith.index_cast %c29_i32 : i32 to index
    %233 = memref.load %arg1[%232] : memref<64xi32, #tpu.memory_space<smem>>
    %c0_i32_115 = arith.constant 0 : i32
    %234 = arith.maxsi %233, %c0_i32_115 : i32
    %c15_i32_116 = arith.constant 15 : i32
    %235 = arith.minsi %234, %c15_i32_116 : i32
    %236 = arith.index_cast %235 : i32 to index
    %c0_117 = arith.constant 0 : index
    %237 = vector.load %arg2[%236, %c0_117] : memref<16x128xf32, #tpu.memory_space<vmem>>, vector<1x128xf32>
    %238 = arith.index_cast %c29_i32 : i32 to index
    %c0_118 = arith.constant 0 : index
    %239 = vector.load %arg10[%238, %c0_118] : memref<64x128xf32, #tpu.memory_space<vmem>>, vector<1x128xf32>
    tpu.vector_store %arg10[%238, %c0_118], %237 {strides = array<i32>} : memref<64x128xf32, #tpu.memory_space<vmem>>, vector<1x128xf32>,
    %c30_i32 = arith.constant 30 : i32
    %240 = arith.index_cast %c30_i32 : i32 to index
    %241 = memref.load %arg1[%240] : memref<64xi32, #tpu.memory_space<smem>>
    %c0_i32_119 = arith.constant 0 : i32
    %242 = arith.maxsi %241, %c0_i32_119 : i32
    %c15_i32_120 = arith.constant 15 : i32
    %243 = arith.minsi %242, %c15_i32_120 : i32
    %244 = arith.index_cast %243 : i32 to index
    %c0_121 = arith.constant 0 : index
    %245 = vector.load %arg2[%244, %c0_121] : memref<16x128xf32, #tpu.memory_space<vmem>>, vector<1x128xf32>
    %246 = arith.index_cast %c30_i32 : i32 to index
    %c0_122 = arith.constant 0 : index
    %247 = vector.load %arg10[%246, %c0_122] : memref<64x128xf32, #tpu.memory_space<vmem>>, vector<1x128xf32>
    tpu.vector_store %arg10[%246, %c0_122], %245 {strides = array<i32>} : memref<64x128xf32, #tpu.memory_space<vmem>>, vector<1x128xf32>,
    %c31_i32 = arith.constant 31 : i32
    %248 = arith.index_cast %c31_i32 : i32 to index
    %249 = memref.load %arg1[%248] : memref<64xi32, #tpu.memory_space<smem>>
    %c0_i32_123 = arith.constant 0 : i32
    %250 = arith.maxsi %249, %c0_i32_123 : i32
    %c15_i32_124 = arith.constant 15 : i32
    %251 = arith.minsi %250, %c15_i32_124 : i32
    %252 = arith.index_cast %251 : i32 to index
    %c0_125 = arith.constant 0 : index
    %253 = vector.load %arg2[%252, %c0_125] : memref<16x128xf32, #tpu.memory_space<vmem>>, vector<1x128xf32>
    %254 = arith.index_cast %c31_i32 : i32 to index
    %c0_126 = arith.constant 0 : index
    %255 = vector.load %arg10[%254, %c0_126] : memref<64x128xf32, #tpu.memory_space<vmem>>, vector<1x128xf32>
    tpu.vector_store %arg10[%254, %c0_126], %253 {strides = array<i32>} : memref<64x128xf32, #tpu.memory_space<vmem>>, vector<1x128xf32>,
    %c32_i32 = arith.constant 32 : i32
    %256 = arith.index_cast %c32_i32 : i32 to index
    %257 = memref.load %arg1[%256] : memref<64xi32, #tpu.memory_space<smem>>
    %c0_i32_127 = arith.constant 0 : i32
    %258 = arith.maxsi %257, %c0_i32_127 : i32
    %c15_i32_128 = arith.constant 15 : i32
    %259 = arith.minsi %258, %c15_i32_128 : i32
    %260 = arith.index_cast %259 : i32 to index
    %c0_129 = arith.constant 0 : index
    %261 = vector.load %arg2[%260, %c0_129] : memref<16x128xf32, #tpu.memory_space<vmem>>, vector<1x128xf32>
    %262 = arith.index_cast %c32_i32 : i32 to index
    %c0_130 = arith.constant 0 : index
    %263 = vector.load %arg10[%262, %c0_130] : memref<64x128xf32, #tpu.memory_space<vmem>>, vector<1x128xf32>
    tpu.vector_store %arg10[%262, %c0_130], %261 {strides = array<i32>} : memref<64x128xf32, #tpu.memory_space<vmem>>, vector<1x128xf32>,
    %c33_i32 = arith.constant 33 : i32
    %264 = arith.index_cast %c33_i32 : i32 to index
    %265 = memref.load %arg1[%264] : memref<64xi32, #tpu.memory_space<smem>>
    %c0_i32_131 = arith.constant 0 : i32
    %266 = arith.maxsi %265, %c0_i32_131 : i32
    %c15_i32_132 = arith.constant 15 : i32
    %267 = arith.minsi %266, %c15_i32_132 : i32
    %268 = arith.index_cast %267 : i32 to index
    %c0_133 = arith.constant 0 : index
    %269 = vector.load %arg2[%268, %c0_133] : memref<16x128xf32, #tpu.memory_space<vmem>>, vector<1x128xf32>
    %270 = arith.index_cast %c33_i32 : i32 to index
    %c0_134 = arith.constant 0 : index
    %271 = vector.load %arg10[%270, %c0_134] : memref<64x128xf32, #tpu.memory_space<vmem>>, vector<1x128xf32>
    tpu.vector_store %arg10[%270, %c0_134], %269 {strides = array<i32>} : memref<64x128xf32, #tpu.memory_space<vmem>>, vector<1x128xf32>,
    %c34_i32 = arith.constant 34 : i32
    %272 = arith.index_cast %c34_i32 : i32 to index
    %273 = memref.load %arg1[%272] : memref<64xi32, #tpu.memory_space<smem>>
    %c0_i32_135 = arith.constant 0 : i32
    %274 = arith.maxsi %273, %c0_i32_135 : i32
    %c15_i32_136 = arith.constant 15 : i32
    %275 = arith.minsi %274, %c15_i32_136 : i32
    %276 = arith.index_cast %275 : i32 to index
    %c0_137 = arith.constant 0 : index
    %277 = vector.load %arg2[%276, %c0_137] : memref<16x128xf32, #tpu.memory_space<vmem>>, vector<1x128xf32>
    %278 = arith.index_cast %c34_i32 : i32 to index
    %c0_138 = arith.constant 0 : index
    %279 = vector.load %arg10[%278, %c0_138] : memref<64x128xf32, #tpu.memory_space<vmem>>, vector<1x128xf32>
    tpu.vector_store %arg10[%278, %c0_138], %277 {strides = array<i32>} : memref<64x128xf32, #tpu.memory_space<vmem>>, vector<1x128xf32>,
    %c35_i32 = arith.constant 35 : i32
    %280 = arith.index_cast %c35_i32 : i32 to index
    %281 = memref.load %arg1[%280] : memref<64xi32, #tpu.memory_space<smem>>
    %c0_i32_139 = arith.constant 0 : i32
    %282 = arith.maxsi %281, %c0_i32_139 : i32
    %c15_i32_140 = arith.constant 15 : i32
    %283 = arith.minsi %282, %c15_i32_140 : i32
    %284 = arith.index_cast %283 : i32 to index
    %c0_141 = arith.constant 0 : index
    %285 = vector.load %arg2[%284, %c0_141] : memref<16x128xf32, #tpu.memory_space<vmem>>, vector<1x128xf32>
    %286 = arith.index_cast %c35_i32 : i32 to index
    %c0_142 = arith.constant 0 : index
    %287 = vector.load %arg10[%286, %c0_142] : memref<64x128xf32, #tpu.memory_space<vmem>>, vector<1x128xf32>
    tpu.vector_store %arg10[%286, %c0_142], %285 {strides = array<i32>} : memref<64x128xf32, #tpu.memory_space<vmem>>, vector<1x128xf32>,
    %c36_i32 = arith.constant 36 : i32
    %288 = arith.index_cast %c36_i32 : i32 to index
    %289 = memref.load %arg1[%288] : memref<64xi32, #tpu.memory_space<smem>>
    %c0_i32_143 = arith.constant 0 : i32
    %290 = arith.maxsi %289, %c0_i32_143 : i32
    %c15_i32_144 = arith.constant 15 : i32
    %291 = arith.minsi %290, %c15_i32_144 : i32
    %292 = arith.index_cast %291 : i32 to index
    %c0_145 = arith.constant 0 : index
    %293 = vector.load %arg2[%292, %c0_145] : memref<16x128xf32, #tpu.memory_space<vmem>>, vector<1x128xf32>
    %294 = arith.index_cast %c36_i32 : i32 to index
    %c0_146 = arith.constant 0 : index
    %295 = vector.load %arg10[%294, %c0_146] : memref<64x128xf32, #tpu.memory_space<vmem>>, vector<1x128xf32>
    tpu.vector_store %arg10[%294, %c0_146], %293 {strides = array<i32>} : memref<64x128xf32, #tpu.memory_space<vmem>>, vector<1x128xf32>,
    %c37_i32 = arith.constant 37 : i32
    %296 = arith.index_cast %c37_i32 : i32 to index
    %297 = memref.load %arg1[%296] : memref<64xi32, #tpu.memory_space<smem>>
    %c0_i32_147 = arith.constant 0 : i32
    %298 = arith.maxsi %297, %c0_i32_147 : i32
    %c15_i32_148 = arith.constant 15 : i32
    %299 = arith.minsi %298, %c15_i32_148 : i32
    %300 = arith.index_cast %299 : i32 to index
    %c0_149 = arith.constant 0 : index
    %301 = vector.load %arg2[%300, %c0_149] : memref<16x128xf32, #tpu.memory_space<vmem>>, vector<1x128xf32>
    %302 = arith.index_cast %c37_i32 : i32 to index
    %c0_150 = arith.constant 0 : index
    %303 = vector.load %arg10[%302, %c0_150] : memref<64x128xf32, #tpu.memory_space<vmem>>, vector<1x128xf32>
    tpu.vector_store %arg10[%302, %c0_150], %301 {strides = array<i32>} : memref<64x128xf32, #tpu.memory_space<vmem>>, vector<1x128xf32>,
    %c38_i32 = arith.constant 38 : i32
    %304 = arith.index_cast %c38_i32 : i32 to index
    %305 = memref.load %arg1[%304] : memref<64xi32, #tpu.memory_space<smem>>
    %c0_i32_151 = arith.constant 0 : i32
    %306 = arith.maxsi %305, %c0_i32_151 : i32
    %c15_i32_152 = arith.constant 15 : i32
    %307 = arith.minsi %306, %c15_i32_152 : i32
    %308 = arith.index_cast %307 : i32 to index
    %c0_153 = arith.constant 0 : index
    %309 = vector.load %arg2[%308, %c0_153] : memref<16x128xf32, #tpu.memory_space<vmem>>, vector<1x128xf32>
    %310 = arith.index_cast %c38_i32 : i32 to index
    %c0_154 = arith.constant 0 : index
    %311 = vector.load %arg10[%310, %c0_154] : memref<64x128xf32, #tpu.memory_space<vmem>>, vector<1x128xf32>
    tpu.vector_store %arg10[%310, %c0_154], %309 {strides = array<i32>} : memref<64x128xf32, #tpu.memory_space<vmem>>, vector<1x128xf32>,
    %c39_i32 = arith.constant 39 : i32
    %312 = arith.index_cast %c39_i32 : i32 to index
    %313 = memref.load %arg1[%312] : memref<64xi32, #tpu.memory_space<smem>>
    %c0_i32_155 = arith.constant 0 : i32
    %314 = arith.maxsi %313, %c0_i32_155 : i32
    %c15_i32_156 = arith.constant 15 : i32
    %315 = arith.minsi %314, %c15_i32_156 : i32
    %316 = arith.index_cast %315 : i32 to index
    %c0_157 = arith.constant 0 : index
    %317 = vector.load %arg2[%316, %c0_157] : memref<16x128xf32, #tpu.memory_space<vmem>>, vector<1x128xf32>
    %318 = arith.index_cast %c39_i32 : i32 to index
    %c0_158 = arith.constant 0 : index
    %319 = vector.load %arg10[%318, %c0_158] : memref<64x128xf32, #tpu.memory_space<vmem>>, vector<1x128xf32>
    tpu.vector_store %arg10[%318, %c0_158], %317 {strides = array<i32>} : memref<64x128xf32, #tpu.memory_space<vmem>>, vector<1x128xf32>,
    %c40_i32 = arith.constant 40 : i32
    %320 = arith.index_cast %c40_i32 : i32 to index
    %321 = memref.load %arg1[%320] : memref<64xi32, #tpu.memory_space<smem>>
    %c0_i32_159 = arith.constant 0 : i32
    %322 = arith.maxsi %321, %c0_i32_159 : i32
    %c15_i32_160 = arith.constant 15 : i32
    %323 = arith.minsi %322, %c15_i32_160 : i32
    %324 = arith.index_cast %323 : i32 to index
    %c0_161 = arith.constant 0 : index
    %325 = vector.load %arg2[%324, %c0_161] : memref<16x128xf32, #tpu.memory_space<vmem>>, vector<1x128xf32>
    %326 = arith.index_cast %c40_i32 : i32 to index
    %c0_162 = arith.constant 0 : index
    %327 = vector.load %arg10[%326, %c0_162] : memref<64x128xf32, #tpu.memory_space<vmem>>, vector<1x128xf32>
    tpu.vector_store %arg10[%326, %c0_162], %325 {strides = array<i32>} : memref<64x128xf32, #tpu.memory_space<vmem>>, vector<1x128xf32>,
    %c41_i32 = arith.constant 41 : i32
    %328 = arith.index_cast %c41_i32 : i32 to index
    %329 = memref.load %arg1[%328] : memref<64xi32, #tpu.memory_space<smem>>
    %c0_i32_163 = arith.constant 0 : i32
    %330 = arith.maxsi %329, %c0_i32_163 : i32
    %c15_i32_164 = arith.constant 15 : i32
    %331 = arith.minsi %330, %c15_i32_164 : i32
    %332 = arith.index_cast %331 : i32 to index
    %c0_165 = arith.constant 0 : index
    %333 = vector.load %arg2[%332, %c0_165] : memref<16x128xf32, #tpu.memory_space<vmem>>, vector<1x128xf32>
    %334 = arith.index_cast %c41_i32 : i32 to index
    %c0_166 = arith.constant 0 : index
    %335 = vector.load %arg10[%334, %c0_166] : memref<64x128xf32, #tpu.memory_space<vmem>>, vector<1x128xf32>
    tpu.vector_store %arg10[%334, %c0_166], %333 {strides = array<i32>} : memref<64x128xf32, #tpu.memory_space<vmem>>, vector<1x128xf32>,
    %c42_i32 = arith.constant 42 : i32
    %336 = arith.index_cast %c42_i32 : i32 to index
    %337 = memref.load %arg1[%336] : memref<64xi32, #tpu.memory_space<smem>>
    %c0_i32_167 = arith.constant 0 : i32
    %338 = arith.maxsi %337, %c0_i32_167 : i32
    %c15_i32_168 = arith.constant 15 : i32
    %339 = arith.minsi %338, %c15_i32_168 : i32
    %340 = arith.index_cast %339 : i32 to index
    %c0_169 = arith.constant 0 : index
    %341 = vector.load %arg2[%340, %c0_169] : memref<16x128xf32, #tpu.memory_space<vmem>>, vector<1x128xf32>
    %342 = arith.index_cast %c42_i32 : i32 to index
    %c0_170 = arith.constant 0 : index
    %343 = vector.load %arg10[%342, %c0_170] : memref<64x128xf32, #tpu.memory_space<vmem>>, vector<1x128xf32>
    tpu.vector_store %arg10[%342, %c0_170], %341 {strides = array<i32>} : memref<64x128xf32, #tpu.memory_space<vmem>>, vector<1x128xf32>,
    %c43_i32 = arith.constant 43 : i32
    %344 = arith.index_cast %c43_i32 : i32 to index
    %345 = memref.load %arg1[%344] : memref<64xi32, #tpu.memory_space<smem>>
    %c0_i32_171 = arith.constant 0 : i32
    %346 = arith.maxsi %345, %c0_i32_171 : i32
    %c15_i32_172 = arith.constant 15 : i32
    %347 = arith.minsi %346, %c15_i32_172 : i32
    %348 = arith.index_cast %347 : i32 to index
    %c0_173 = arith.constant 0 : index
    %349 = vector.load %arg2[%348, %c0_173] : memref<16x128xf32, #tpu.memory_space<vmem>>, vector<1x128xf32>
    %350 = arith.index_cast %c43_i32 : i32 to index
    %c0_174 = arith.constant 0 : index
    %351 = vector.load %arg10[%350, %c0_174] : memref<64x128xf32, #tpu.memory_space<vmem>>, vector<1x128xf32>
    tpu.vector_store %arg10[%350, %c0_174], %349 {strides = array<i32>} : memref<64x128xf32, #tpu.memory_space<vmem>>, vector<1x128xf32>,
    %c44_i32 = arith.constant 44 : i32
    %352 = arith.index_cast %c44_i32 : i32 to index
    %353 = memref.load %arg1[%352] : memref<64xi32, #tpu.memory_space<smem>>
    %c0_i32_175 = arith.constant 0 : i32
    %354 = arith.maxsi %353, %c0_i32_175 : i32
    %c15_i32_176 = arith.constant 15 : i32
    %355 = arith.minsi %354, %c15_i32_176 : i32
    %356 = arith.index_cast %355 : i32 to index
    %c0_177 = arith.constant 0 : index
    %357 = vector.load %arg2[%356, %c0_177] : memref<16x128xf32, #tpu.memory_space<vmem>>, vector<1x128xf32>
    %358 = arith.index_cast %c44_i32 : i32 to index
    %c0_178 = arith.constant 0 : index
    %359 = vector.load %arg10[%358, %c0_178] : memref<64x128xf32, #tpu.memory_space<vmem>>, vector<1x128xf32>
    tpu.vector_store %arg10[%358, %c0_178], %357 {strides = array<i32>} : memref<64x128xf32, #tpu.memory_space<vmem>>, vector<1x128xf32>,
    %c45_i32 = arith.constant 45 : i32
    %360 = arith.index_cast %c45_i32 : i32 to index
    %361 = memref.load %arg1[%360] : memref<64xi32, #tpu.memory_space<smem>>
    %c0_i32_179 = arith.constant 0 : i32
    %362 = arith.maxsi %361, %c0_i32_179 : i32
    %c15_i32_180 = arith.constant 15 : i32
    %363 = arith.minsi %362, %c15_i32_180 : i32
    %364 = arith.index_cast %363 : i32 to index
    %c0_181 = arith.constant 0 : index
    %365 = vector.load %arg2[%364, %c0_181] : memref<16x128xf32, #tpu.memory_space<vmem>>, vector<1x128xf32>
    %366 = arith.index_cast %c45_i32 : i32 to index
    %c0_182 = arith.constant 0 : index
    %367 = vector.load %arg10[%366, %c0_182] : memref<64x128xf32, #tpu.memory_space<vmem>>, vector<1x128xf32>
    tpu.vector_store %arg10[%366, %c0_182], %365 {strides = array<i32>} : memref<64x128xf32, #tpu.memory_space<vmem>>, vector<1x128xf32>,
    %c46_i32 = arith.constant 46 : i32
    %368 = arith.index_cast %c46_i32 : i32 to index
    %369 = memref.load %arg1[%368] : memref<64xi32, #tpu.memory_space<smem>>
    %c0_i32_183 = arith.constant 0 : i32
    %370 = arith.maxsi %369, %c0_i32_183 : i32
    %c15_i32_184 = arith.constant 15 : i32
    %371 = arith.minsi %370, %c15_i32_184 : i32
    %372 = arith.index_cast %371 : i32 to index
    %c0_185 = arith.constant 0 : index
    %373 = vector.load %arg2[%372, %c0_185] : memref<16x128xf32, #tpu.memory_space<vmem>>, vector<1x128xf32>
    %374 = arith.index_cast %c46_i32 : i32 to index
    %c0_186 = arith.constant 0 : index
    %375 = vector.load %arg10[%374, %c0_186] : memref<64x128xf32, #tpu.memory_space<vmem>>, vector<1x128xf32>
    tpu.vector_store %arg10[%374, %c0_186], %373 {strides = array<i32>} : memref<64x128xf32, #tpu.memory_space<vmem>>, vector<1x128xf32>,
    %c47_i32 = arith.constant 47 : i32
    %376 = arith.index_cast %c47_i32 : i32 to index
    %377 = memref.load %arg1[%376] : memref<64xi32, #tpu.memory_space<smem>>
    %c0_i32_187 = arith.constant 0 : i32
    %378 = arith.maxsi %377, %c0_i32_187 : i32
    %c15_i32_188 = arith.constant 15 : i32
    %379 = arith.minsi %378, %c15_i32_188 : i32
    %380 = arith.index_cast %379 : i32 to index
    %c0_189 = arith.constant 0 : index
    %381 = vector.load %arg2[%380, %c0_189] : memref<16x128xf32, #tpu.memory_space<vmem>>, vector<1x128xf32>
    %382 = arith.index_cast %c47_i32 : i32 to index
    %c0_190 = arith.constant 0 : index
    %383 = vector.load %arg10[%382, %c0_190] : memref<64x128xf32, #tpu.memory_space<vmem>>, vector<1x128xf32>
    tpu.vector_store %arg10[%382, %c0_190], %381 {strides = array<i32>} : memref<64x128xf32, #tpu.memory_space<vmem>>, vector<1x128xf32>,
    %c48_i32 = arith.constant 48 : i32
    %384 = arith.index_cast %c48_i32 : i32 to index
    %385 = memref.load %arg1[%384] : memref<64xi32, #tpu.memory_space<smem>>
    %c0_i32_191 = arith.constant 0 : i32
    %386 = arith.maxsi %385, %c0_i32_191 : i32
    %c15_i32_192 = arith.constant 15 : i32
    %387 = arith.minsi %386, %c15_i32_192 : i32
    %388 = arith.index_cast %387 : i32 to index
    %c0_193 = arith.constant 0 : index
    %389 = vector.load %arg2[%388, %c0_193] : memref<16x128xf32, #tpu.memory_space<vmem>>, vector<1x128xf32>
    %390 = arith.index_cast %c48_i32 : i32 to index
    %c0_194 = arith.constant 0 : index
    %391 = vector.load %arg10[%390, %c0_194] : memref<64x128xf32, #tpu.memory_space<vmem>>, vector<1x128xf32>
    tpu.vector_store %arg10[%390, %c0_194], %389 {strides = array<i32>} : memref<64x128xf32, #tpu.memory_space<vmem>>, vector<1x128xf32>,
    %c49_i32 = arith.constant 49 : i32
    %392 = arith.index_cast %c49_i32 : i32 to index
    %393 = memref.load %arg1[%392] : memref<64xi32, #tpu.memory_space<smem>>
    %c0_i32_195 = arith.constant 0 : i32
    %394 = arith.maxsi %393, %c0_i32_195 : i32
    %c15_i32_196 = arith.constant 15 : i32
    %395 = arith.minsi %394, %c15_i32_196 : i32
    %396 = arith.index_cast %395 : i32 to index
    %c0_197 = arith.constant 0 : index
    %397 = vector.load %arg2[%396, %c0_197] : memref<16x128xf32, #tpu.memory_space<vmem>>, vector<1x128xf32>
    %398 = arith.index_cast %c49_i32 : i32 to index
    %c0_198 = arith.constant 0 : index
    %399 = vector.load %arg10[%398, %c0_198] : memref<64x128xf32, #tpu.memory_space<vmem>>, vector<1x128xf32>
    tpu.vector_store %arg10[%398, %c0_198], %397 {strides = array<i32>} : memref<64x128xf32, #tpu.memory_space<vmem>>, vector<1x128xf32>,
    %c50_i32 = arith.constant 50 : i32
    %400 = arith.index_cast %c50_i32 : i32 to index
    %401 = memref.load %arg1[%400] : memref<64xi32, #tpu.memory_space<smem>>
    %c0_i32_199 = arith.constant 0 : i32
    %402 = arith.maxsi %401, %c0_i32_199 : i32
    %c15_i32_200 = arith.constant 15 : i32
    %403 = arith.minsi %402, %c15_i32_200 : i32
    %404 = arith.index_cast %403 : i32 to index
    %c0_201 = arith.constant 0 : index
    %405 = vector.load %arg2[%404, %c0_201] : memref<16x128xf32, #tpu.memory_space<vmem>>, vector<1x128xf32>
    %406 = arith.index_cast %c50_i32 : i32 to index
    %c0_202 = arith.constant 0 : index
    %407 = vector.load %arg10[%406, %c0_202] : memref<64x128xf32, #tpu.memory_space<vmem>>, vector<1x128xf32>
    tpu.vector_store %arg10[%406, %c0_202], %405 {strides = array<i32>} : memref<64x128xf32, #tpu.memory_space<vmem>>, vector<1x128xf32>,
    %c51_i32 = arith.constant 51 : i32
    %408 = arith.index_cast %c51_i32 : i32 to index
    %409 = memref.load %arg1[%408] : memref<64xi32, #tpu.memory_space<smem>>
    %c0_i32_203 = arith.constant 0 : i32
    %410 = arith.maxsi %409, %c0_i32_203 : i32
    %c15_i32_204 = arith.constant 15 : i32
    %411 = arith.minsi %410, %c15_i32_204 : i32
    %412 = arith.index_cast %411 : i32 to index
    %c0_205 = arith.constant 0 : index
    %413 = vector.load %arg2[%412, %c0_205] : memref<16x128xf32, #tpu.memory_space<vmem>>, vector<1x128xf32>
    %414 = arith.index_cast %c51_i32 : i32 to index
    %c0_206 = arith.constant 0 : index
    %415 = vector.load %arg10[%414, %c0_206] : memref<64x128xf32, #tpu.memory_space<vmem>>, vector<1x128xf32>
    tpu.vector_store %arg10[%414, %c0_206], %413 {strides = array<i32>} : memref<64x128xf32, #tpu.memory_space<vmem>>, vector<1x128xf32>,
    %c52_i32 = arith.constant 52 : i32
    %416 = arith.index_cast %c52_i32 : i32 to index
    %417 = memref.load %arg1[%416] : memref<64xi32, #tpu.memory_space<smem>>
    %c0_i32_207 = arith.constant 0 : i32
    %418 = arith.maxsi %417, %c0_i32_207 : i32
    %c15_i32_208 = arith.constant 15 : i32
    %419 = arith.minsi %418, %c15_i32_208 : i32
    %420 = arith.index_cast %419 : i32 to index
    %c0_209 = arith.constant 0 : index
    %421 = vector.load %arg2[%420, %c0_209] : memref<16x128xf32, #tpu.memory_space<vmem>>, vector<1x128xf32>
    %422 = arith.index_cast %c52_i32 : i32 to index
    %c0_210 = arith.constant 0 : index
    %423 = vector.load %arg10[%422, %c0_210] : memref<64x128xf32, #tpu.memory_space<vmem>>, vector<1x128xf32>
    tpu.vector_store %arg10[%422, %c0_210], %421 {strides = array<i32>} : memref<64x128xf32, #tpu.memory_space<vmem>>, vector<1x128xf32>,
    %c53_i32 = arith.constant 53 : i32
    %424 = arith.index_cast %c53_i32 : i32 to index
    %425 = memref.load %arg1[%424] : memref<64xi32, #tpu.memory_space<smem>>
    %c0_i32_211 = arith.constant 0 : i32
    %426 = arith.maxsi %425, %c0_i32_211 : i32
    %c15_i32_212 = arith.constant 15 : i32
    %427 = arith.minsi %426, %c15_i32_212 : i32
    %428 = arith.index_cast %427 : i32 to index
    %c0_213 = arith.constant 0 : index
    %429 = vector.load %arg2[%428, %c0_213] : memref<16x128xf32, #tpu.memory_space<vmem>>, vector<1x128xf32>
    %430 = arith.index_cast %c53_i32 : i32 to index
    %c0_214 = arith.constant 0 : index
    %431 = vector.load %arg10[%430, %c0_214] : memref<64x128xf32, #tpu.memory_space<vmem>>, vector<1x128xf32>
    tpu.vector_store %arg10[%430, %c0_214], %429 {strides = array<i32>} : memref<64x128xf32, #tpu.memory_space<vmem>>, vector<1x128xf32>,
    %c54_i32 = arith.constant 54 : i32
    %432 = arith.index_cast %c54_i32 : i32 to index
    %433 = memref.load %arg1[%432] : memref<64xi32, #tpu.memory_space<smem>>
    %c0_i32_215 = arith.constant 0 : i32
    %434 = arith.maxsi %433, %c0_i32_215 : i32
    %c15_i32_216 = arith.constant 15 : i32
    %435 = arith.minsi %434, %c15_i32_216 : i32
    %436 = arith.index_cast %435 : i32 to index
    %c0_217 = arith.constant 0 : index
    %437 = vector.load %arg2[%436, %c0_217] : memref<16x128xf32, #tpu.memory_space<vmem>>, vector<1x128xf32>
    %438 = arith.index_cast %c54_i32 : i32 to index
    %c0_218 = arith.constant 0 : index
    %439 = vector.load %arg10[%438, %c0_218] : memref<64x128xf32, #tpu.memory_space<vmem>>, vector<1x128xf32>
    tpu.vector_store %arg10[%438, %c0_218], %437 {strides = array<i32>} : memref<64x128xf32, #tpu.memory_space<vmem>>, vector<1x128xf32>,
    %c55_i32 = arith.constant 55 : i32
    %440 = arith.index_cast %c55_i32 : i32 to index
    %441 = memref.load %arg1[%440] : memref<64xi32, #tpu.memory_space<smem>>
    %c0_i32_219 = arith.constant 0 : i32
    %442 = arith.maxsi %441, %c0_i32_219 : i32
    %c15_i32_220 = arith.constant 15 : i32
    %443 = arith.minsi %442, %c15_i32_220 : i32
    %444 = arith.index_cast %443 : i32 to index
    %c0_221 = arith.constant 0 : index
    %445 = vector.load %arg2[%444, %c0_221] : memref<16x128xf32, #tpu.memory_space<vmem>>, vector<1x128xf32>
    %446 = arith.index_cast %c55_i32 : i32 to index
    %c0_222 = arith.constant 0 : index
    %447 = vector.load %arg10[%446, %c0_222] : memref<64x128xf32, #tpu.memory_space<vmem>>, vector<1x128xf32>
    tpu.vector_store %arg10[%446, %c0_222], %445 {strides = array<i32>} : memref<64x128xf32, #tpu.memory_space<vmem>>, vector<1x128xf32>,
    %c56_i32 = arith.constant 56 : i32
    %448 = arith.index_cast %c56_i32 : i32 to index
    %449 = memref.load %arg1[%448] : memref<64xi32, #tpu.memory_space<smem>>
    %c0_i32_223 = arith.constant 0 : i32
    %450 = arith.maxsi %449, %c0_i32_223 : i32
    %c15_i32_224 = arith.constant 15 : i32
    %451 = arith.minsi %450, %c15_i32_224 : i32
    %452 = arith.index_cast %451 : i32 to index
    %c0_225 = arith.constant 0 : index
    %453 = vector.load %arg2[%452, %c0_225] : memref<16x128xf32, #tpu.memory_space<vmem>>, vector<1x128xf32>
    %454 = arith.index_cast %c56_i32 : i32 to index
    %c0_226 = arith.constant 0 : index
    %455 = vector.load %arg10[%454, %c0_226] : memref<64x128xf32, #tpu.memory_space<vmem>>, vector<1x128xf32>
    tpu.vector_store %arg10[%454, %c0_226], %453 {strides = array<i32>} : memref<64x128xf32, #tpu.memory_space<vmem>>, vector<1x128xf32>,
    %c57_i32 = arith.constant 57 : i32
    %456 = arith.index_cast %c57_i32 : i32 to index
    %457 = memref.load %arg1[%456] : memref<64xi32, #tpu.memory_space<smem>>
    %c0_i32_227 = arith.constant 0 : i32
    %458 = arith.maxsi %457, %c0_i32_227 : i32
    %c15_i32_228 = arith.constant 15 : i32
    %459 = arith.minsi %458, %c15_i32_228 : i32
    %460 = arith.index_cast %459 : i32 to index
    %c0_229 = arith.constant 0 : index
    %461 = vector.load %arg2[%460, %c0_229] : memref<16x128xf32, #tpu.memory_space<vmem>>, vector<1x128xf32>
    %462 = arith.index_cast %c57_i32 : i32 to index
    %c0_230 = arith.constant 0 : index
    %463 = vector.load %arg10[%462, %c0_230] : memref<64x128xf32, #tpu.memory_space<vmem>>, vector<1x128xf32>
    tpu.vector_store %arg10[%462, %c0_230], %461 {strides = array<i32>} : memref<64x128xf32, #tpu.memory_space<vmem>>, vector<1x128xf32>,
    %c58_i32 = arith.constant 58 : i32
    %464 = arith.index_cast %c58_i32 : i32 to index
    %465 = memref.load %arg1[%464] : memref<64xi32, #tpu.memory_space<smem>>
    %c0_i32_231 = arith.constant 0 : i32
    %466 = arith.maxsi %465, %c0_i32_231 : i32
    %c15_i32_232 = arith.constant 15 : i32
    %467 = arith.minsi %466, %c15_i32_232 : i32
    %468 = arith.index_cast %467 : i32 to index
    %c0_233 = arith.constant 0 : index
    %469 = vector.load %arg2[%468, %c0_233] : memref<16x128xf32, #tpu.memory_space<vmem>>, vector<1x128xf32>
    %470 = arith.index_cast %c58_i32 : i32 to index
    %c0_234 = arith.constant 0 : index
    %471 = vector.load %arg10[%470, %c0_234] : memref<64x128xf32, #tpu.memory_space<vmem>>, vector<1x128xf32>
    tpu.vector_store %arg10[%470, %c0_234], %469 {strides = array<i32>} : memref<64x128xf32, #tpu.memory_space<vmem>>, vector<1x128xf32>,
    %c59_i32 = arith.constant 59 : i32
    %472 = arith.index_cast %c59_i32 : i32 to index
    %473 = memref.load %arg1[%472] : memref<64xi32, #tpu.memory_space<smem>>
    %c0_i32_235 = arith.constant 0 : i32
    %474 = arith.maxsi %473, %c0_i32_235 : i32
    %c15_i32_236 = arith.constant 15 : i32
    %475 = arith.minsi %474, %c15_i32_236 : i32
    %476 = arith.index_cast %475 : i32 to index
    %c0_237 = arith.constant 0 : index
    %477 = vector.load %arg2[%476, %c0_237] : memref<16x128xf32, #tpu.memory_space<vmem>>, vector<1x128xf32>
    %478 = arith.index_cast %c59_i32 : i32 to index
    %c0_238 = arith.constant 0 : index
    %479 = vector.load %arg10[%478, %c0_238] : memref<64x128xf32, #tpu.memory_space<vmem>>, vector<1x128xf32>
    tpu.vector_store %arg10[%478, %c0_238], %477 {strides = array<i32>} : memref<64x128xf32, #tpu.memory_space<vmem>>, vector<1x128xf32>,
    %c60_i32 = arith.constant 60 : i32
    %480 = arith.index_cast %c60_i32 : i32 to index
    %481 = memref.load %arg1[%480] : memref<64xi32, #tpu.memory_space<smem>>
    %c0_i32_239 = arith.constant 0 : i32
    %482 = arith.maxsi %481, %c0_i32_239 : i32
    %c15_i32_240 = arith.constant 15 : i32
    %483 = arith.minsi %482, %c15_i32_240 : i32
    %484 = arith.index_cast %483 : i32 to index
    %c0_241 = arith.constant 0 : index
    %485 = vector.load %arg2[%484, %c0_241] : memref<16x128xf32, #tpu.memory_space<vmem>>, vector<1x128xf32>
    %486 = arith.index_cast %c60_i32 : i32 to index
    %c0_242 = arith.constant 0 : index
    %487 = vector.load %arg10[%486, %c0_242] : memref<64x128xf32, #tpu.memory_space<vmem>>, vector<1x128xf32>
    tpu.vector_store %arg10[%486, %c0_242], %485 {strides = array<i32>} : memref<64x128xf32, #tpu.memory_space<vmem>>, vector<1x128xf32>,
    %c61_i32 = arith.constant 61 : i32
    %488 = arith.index_cast %c61_i32 : i32 to index
    %489 = memref.load %arg1[%488] : memref<64xi32, #tpu.memory_space<smem>>
    %c0_i32_243 = arith.constant 0 : i32
    %490 = arith.maxsi %489, %c0_i32_243 : i32
    %c15_i32_244 = arith.constant 15 : i32
    %491 = arith.minsi %490, %c15_i32_244 : i32
    %492 = arith.index_cast %491 : i32 to index
    %c0_245 = arith.constant 0 : index
    %493 = vector.load %arg2[%492, %c0_245] : memref<16x128xf32, #tpu.memory_space<vmem>>, vector<1x128xf32>
    %494 = arith.index_cast %c61_i32 : i32 to index
    %c0_246 = arith.constant 0 : index
    %495 = vector.load %arg10[%494, %c0_246] : memref<64x128xf32, #tpu.memory_space<vmem>>, vector<1x128xf32>
    tpu.vector_store %arg10[%494, %c0_246], %493 {strides = array<i32>} : memref<64x128xf32, #tpu.memory_space<vmem>>, vector<1x128xf32>,
    %c62_i32 = arith.constant 62 : i32
    %496 = arith.index_cast %c62_i32 : i32 to index
    %497 = memref.load %arg1[%496] : memref<64xi32, #tpu.memory_space<smem>>
    %c0_i32_247 = arith.constant 0 : i32
    %498 = arith.maxsi %497, %c0_i32_247 : i32
    %c15_i32_248 = arith.constant 15 : i32
    %499 = arith.minsi %498, %c15_i32_248 : i32
    %500 = arith.index_cast %499 : i32 to index
    %c0_249 = arith.constant 0 : index
    %501 = vector.load %arg2[%500, %c0_249] : memref<16x128xf32, #tpu.memory_space<vmem>>, vector<1x128xf32>
    %502 = arith.index_cast %c62_i32 : i32 to index
    %c0_250 = arith.constant 0 : index
    %503 = vector.load %arg10[%502, %c0_250] : memref<64x128xf32, #tpu.memory_space<vmem>>, vector<1x128xf32>
    tpu.vector_store %arg10[%502, %c0_250], %501 {strides = array<i32>} : memref<64x128xf32, #tpu.memory_space<vmem>>, vector<1x128xf32>,
    %c63_i32 = arith.constant 63 : i32
    %504 = arith.index_cast %c63_i32 : i32 to index
    %505 = memref.load %arg1[%504] : memref<64xi32, #tpu.memory_space<smem>>
    %c0_i32_251 = arith.constant 0 : i32
    %506 = arith.maxsi %505, %c0_i32_251 : i32
    %c15_i32_252 = arith.constant 15 : i32
    %507 = arith.minsi %506, %c15_i32_252 : i32
    %508 = arith.index_cast %507 : i32 to index
    %c0_253 = arith.constant 0 : index
    %509 = vector.load %arg2[%508, %c0_253] : memref<16x128xf32, #tpu.memory_space<vmem>>, vector<1x128xf32>
    %510 = arith.index_cast %c63_i32 : i32 to index
    %c0_254 = arith.constant 0 : index
    %511 = vector.load %arg10[%510, %c0_254] : memref<64x128xf32, #tpu.memory_space<vmem>>, vector<1x128xf32>
    tpu.vector_store %arg10[%510, %c0_254], %509 {strides = array<i32>} : memref<64x128xf32, #tpu.memory_space<vmem>>, vector<1x128xf32>,
    %c64_i32 = arith.constant 64 : i32
    %c0_255 = arith.constant 0 : index
    %c0_256 = arith.constant 0 : index
    %512 = vector.load %arg10[%c0_255, %c0_256] : memref<64x128xf32, #tpu.memory_space<vmem>>, vector<64x128xf32>
    %c0_257 = arith.constant 0 : index
    %c0_258 = arith.constant 0 : index
    %513 = vector.load %arg3[%c0_257, %c0_258] : memref<128x512xf32, #tpu.memory_space<vmem>>, vector<128x512xf32>
    %cst = arith.constant dense<0.000000e+00> : vector<64x512xf32>
    %514 = tpu.matmul %512, %513, %cst {dimension_numbers = #tpu.dot_dimension_numbers<[1], [0], [0], [1], [0, 0, 1, 1], [], []>} : vector<64x128xf32>, vector<128x512xf32>, vector<64x512xf32> -> vector<64x512xf32>
    %c0_259 = arith.constant 0 : index
    %c0_260 = arith.constant 0 : index
    %515 = vector.load %arg5[%c0_259, %c0_260] : memref<1x512xf32, #tpu.memory_space<vmem>>, vector<1x512xf32>
    %516 = vector.broadcast %515 : vector<1x512xf32> to vector<64x512xf32>
    %517 = arith.addf %514, %516 : vector<64x512xf32>
    %c0_261 = arith.constant 0 : index
    %c0_262 = arith.constant 0 : index
    %518 = vector.load %arg11[%c0_261, %c0_262] : memref<64x512xf32, #tpu.memory_space<vmem>>, vector<64x512xf32>
    tpu.vector_store %arg11[%c0_261, %c0_262], %517 {strides = array<i32>} : memref<64x512xf32, #tpu.memory_space<vmem>>, vector<64x512xf32>,
    %c0_263 = arith.constant 0 : index
    %c0_264 = arith.constant 0 : index
    %519 = vector.load %arg6[%c0_263, %c0_264] : memref<8x128xf32, #tpu.memory_space<vmem>>, vector<8x128xf32>
    %c0_265 = arith.constant 0 : index
    %c0_266 = arith.constant 0 : index
    %520 = vector.load %arg7[%c0_265, %c0_266] : memref<8x128xf32, #tpu.memory_space<vmem>>, vector<8x128xf32>
    %c0_i32_267 = arith.constant 0 : i32
    %c8_i32_268 = arith.constant 8 : i32
    %521 = arith.muli %c0_i32_267, %c8_i32_268 : i32
    %522 = arith.index_cast %521 : i32 to index
    %c0_269 = arith.constant 0 : index
    %523 = vector.load %arg11[%522, %c0_269] : memref<64x512xf32, #tpu.memory_space<vmem>>, vector<8x512xf32>
    %c0_270 = arith.constant 0 : index
    %c0_271 = arith.constant 0 : index
    %524 = vector.load %arg4[%c0_270, %c0_271] : memref<128x512xf32, #tpu.memory_space<vmem>>, vector<128x512xf32>
    %cst_272 = arith.constant dense<0.000000e+00> : vector<8x512xf32>
    %525 = tpu.matmul %519, %524, %cst_272 {dimension_numbers = #tpu.dot_dimension_numbers<[1], [0], [0], [1], [0, 0, 1, 1], [], []>} : vector<8x128xf32>, vector<128x512xf32>, vector<8x512xf32> -> vector<8x512xf32>
    %526 = arith.addf %523, %525 : vector<8x512xf32>
    %527 = arith.negf %526 : vector<8x512xf32>
    %528 = math.exp %527 : vector<8x512xf32>
    %cst_273 = arith.constant 1.000000e+00 : f32
    %529 = vector.broadcast %cst_273 : f32 to vector<8x512xf32>
    %530 = arith.addf %529, %528 : vector<8x512xf32>
    %531 = arith.divf %529, %530 : vector<8x512xf32>
    %532 = vector.extract_strided_slice %531 {offsets = [0, 0], sizes = [8, 128], strides = [1, 1]} : vector<8x512xf32> to vector<8x128xf32>
    %533 = vector.extract_strided_slice %531 {offsets = [0, 128], sizes = [8, 128], strides = [1, 1]} : vector<8x512xf32> to vector<8x128xf32>
    %534 = vector.extract_strided_slice %531 {offsets = [0, 256], sizes = [8, 128], strides = [1, 1]} : vector<8x512xf32> to vector<8x128xf32>
    %535 = vector.extract_strided_slice %531 {offsets = [0, 384], sizes = [8, 128], strides = [1, 1]} : vector<8x512xf32> to vector<8x128xf32>
    %536 = arith.mulf %533, %520 : vector<8x128xf32>
    %537 = arith.mulf %532, %534 : vector<8x128xf32>
    %538 = arith.addf %536, %537 : vector<8x128xf32>
    %539 = math.tanh %538 : vector<8x128xf32>
    %540 = arith.mulf %535, %539 : vector<8x128xf32>
    %541 = arith.index_cast %521 : i32 to index
    %c0_274 = arith.constant 0 : index
    %542 = vector.load %arg8[%541, %c0_274] : memref<64x128xf32, #tpu.memory_space<vmem>>, vector<8x128xf32>
    tpu.vector_store %arg8[%541, %c0_274], %540 {strides = array<i32>} : memref<64x128xf32, #tpu.memory_space<vmem>>, vector<8x128xf32>,
    %543 = arith.index_cast %521 : i32 to index
    %c0_275 = arith.constant 0 : index
    %544 = vector.load %arg9[%543, %c0_275] : memref<64x128xf32, #tpu.memory_space<vmem>>, vector<8x128xf32>
    tpu.vector_store %arg9[%543, %c0_275], %538 {strides = array<i32>} : memref<64x128xf32, #tpu.memory_space<vmem>>, vector<8x128xf32>,
    %c1_i32_276 = arith.constant 1 : i32
    %c8_i32_277 = arith.constant 8 : i32
    %545 = arith.muli %c1_i32_276, %c8_i32_277 : i32
    %546 = arith.index_cast %545 : i32 to index
    %c0_278 = arith.constant 0 : index
    %547 = vector.load %arg11[%546, %c0_278] : memref<64x512xf32, #tpu.memory_space<vmem>>, vector<8x512xf32>
    %c0_279 = arith.constant 0 : index
    %c0_280 = arith.constant 0 : index
    %548 = vector.load %arg4[%c0_279, %c0_280] : memref<128x512xf32, #tpu.memory_space<vmem>>, vector<128x512xf32>
    %cst_281 = arith.constant dense<0.000000e+00> : vector<8x512xf32>
    %549 = tpu.matmul %540, %548, %cst_281 {dimension_numbers = #tpu.dot_dimension_numbers<[1], [0], [0], [1], [0, 0, 1, 1], [], []>} : vector<8x128xf32>, vector<128x512xf32>, vector<8x512xf32> -> vector<8x512xf32>
    %550 = arith.addf %547, %549 : vector<8x512xf32>
    %551 = arith.negf %550 : vector<8x512xf32>
    %552 = math.exp %551 : vector<8x512xf32>
    %cst_282 = arith.constant 1.000000e+00 : f32
    %553 = vector.broadcast %cst_282 : f32 to vector<8x512xf32>
    %554 = arith.addf %553, %552 : vector<8x512xf32>
    %555 = arith.divf %553, %554 : vector<8x512xf32>
    %556 = vector.extract_strided_slice %555 {offsets = [0, 0], sizes = [8, 128], strides = [1, 1]} : vector<8x512xf32> to vector<8x128xf32>
    %557 = vector.extract_strided_slice %555 {offsets = [0, 128], sizes = [8, 128], strides = [1, 1]} : vector<8x512xf32> to vector<8x128xf32>
    %558 = vector.extract_strided_slice %555 {offsets = [0, 256], sizes = [8, 128], strides = [1, 1]} : vector<8x512xf32> to vector<8x128xf32>
    %559 = vector.extract_strided_slice %555 {offsets = [0, 384], sizes = [8, 128], strides = [1, 1]} : vector<8x512xf32> to vector<8x128xf32>
    %560 = arith.mulf %557, %538 : vector<8x128xf32>
    %561 = arith.mulf %556, %558 : vector<8x128xf32>
    %562 = arith.addf %560, %561 : vector<8x128xf32>
    %563 = math.tanh %562 : vector<8x128xf32>
    %564 = arith.mulf %559, %563 : vector<8x128xf32>
    %565 = arith.index_cast %545 : i32 to index
    %c0_283 = arith.constant 0 : index
    %566 = vector.load %arg8[%565, %c0_283] : memref<64x128xf32, #tpu.memory_space<vmem>>, vector<8x128xf32>
    tpu.vector_store %arg8[%565, %c0_283], %564 {strides = array<i32>} : memref<64x128xf32, #tpu.memory_space<vmem>>, vector<8x128xf32>,
    %567 = arith.index_cast %545 : i32 to index
    %c0_284 = arith.constant 0 : index
    %568 = vector.load %arg9[%567, %c0_284] : memref<64x128xf32, #tpu.memory_space<vmem>>, vector<8x128xf32>
    tpu.vector_store %arg9[%567, %c0_284], %562 {strides = array<i32>} : memref<64x128xf32, #tpu.memory_space<vmem>>, vector<8x128xf32>,
    %c2_i32_285 = arith.constant 2 : i32
    %c8_i32_286 = arith.constant 8 : i32
    %569 = arith.muli %c2_i32_285, %c8_i32_286 : i32
    %570 = arith.index_cast %569 : i32 to index
    %c0_287 = arith.constant 0 : index
    %571 = vector.load %arg11[%570, %c0_287] : memref<64x512xf32, #tpu.memory_space<vmem>>, vector<8x512xf32>
    %c0_288 = arith.constant 0 : index
    %c0_289 = arith.constant 0 : index
    %572 = vector.load %arg4[%c0_288, %c0_289] : memref<128x512xf32, #tpu.memory_space<vmem>>, vector<128x512xf32>
    %cst_290 = arith.constant dense<0.000000e+00> : vector<8x512xf32>
    %573 = tpu.matmul %564, %572, %cst_290 {dimension_numbers = #tpu.dot_dimension_numbers<[1], [0], [0], [1], [0, 0, 1, 1], [], []>} : vector<8x128xf32>, vector<128x512xf32>, vector<8x512xf32> -> vector<8x512xf32>
    %574 = arith.addf %571, %573 : vector<8x512xf32>
    %575 = arith.negf %574 : vector<8x512xf32>
    %576 = math.exp %575 : vector<8x512xf32>
    %cst_291 = arith.constant 1.000000e+00 : f32
    %577 = vector.broadcast %cst_291 : f32 to vector<8x512xf32>
    %578 = arith.addf %577, %576 : vector<8x512xf32>
    %579 = arith.divf %577, %578 : vector<8x512xf32>
    %580 = vector.extract_strided_slice %579 {offsets = [0, 0], sizes = [8, 128], strides = [1, 1]} : vector<8x512xf32> to vector<8x128xf32>
    %581 = vector.extract_strided_slice %579 {offsets = [0, 128], sizes = [8, 128], strides = [1, 1]} : vector<8x512xf32> to vector<8x128xf32>
    %582 = vector.extract_strided_slice %579 {offsets = [0, 256], sizes = [8, 128], strides = [1, 1]} : vector<8x512xf32> to vector<8x128xf32>
    %583 = vector.extract_strided_slice %579 {offsets = [0, 384], sizes = [8, 128], strides = [1, 1]} : vector<8x512xf32> to vector<8x128xf32>
    %584 = arith.mulf %581, %562 : vector<8x128xf32>
    %585 = arith.mulf %580, %582 : vector<8x128xf32>
    %586 = arith.addf %584, %585 : vector<8x128xf32>
    %587 = math.tanh %586 : vector<8x128xf32>
    %588 = arith.mulf %583, %587 : vector<8x128xf32>
    %589 = arith.index_cast %569 : i32 to index
    %c0_292 = arith.constant 0 : index
    %590 = vector.load %arg8[%589, %c0_292] : memref<64x128xf32, #tpu.memory_space<vmem>>, vector<8x128xf32>
    tpu.vector_store %arg8[%589, %c0_292], %588 {strides = array<i32>} : memref<64x128xf32, #tpu.memory_space<vmem>>, vector<8x128xf32>,
    %591 = arith.index_cast %569 : i32 to index
    %c0_293 = arith.constant 0 : index
    %592 = vector.load %arg9[%591, %c0_293] : memref<64x128xf32, #tpu.memory_space<vmem>>, vector<8x128xf32>
    tpu.vector_store %arg9[%591, %c0_293], %586 {strides = array<i32>} : memref<64x128xf32, #tpu.memory_space<vmem>>, vector<8x128xf32>,
    %c3_i32_294 = arith.constant 3 : i32
    %c8_i32_295 = arith.constant 8 : i32
    %593 = arith.muli %c3_i32_294, %c8_i32_295 : i32
    %594 = arith.index_cast %593 : i32 to index
    %c0_296 = arith.constant 0 : index
    %595 = vector.load %arg11[%594, %c0_296] : memref<64x512xf32, #tpu.memory_space<vmem>>, vector<8x512xf32>
    %c0_297 = arith.constant 0 : index
    %c0_298 = arith.constant 0 : index
    %596 = vector.load %arg4[%c0_297, %c0_298] : memref<128x512xf32, #tpu.memory_space<vmem>>, vector<128x512xf32>
    %cst_299 = arith.constant dense<0.000000e+00> : vector<8x512xf32>
    %597 = tpu.matmul %588, %596, %cst_299 {dimension_numbers = #tpu.dot_dimension_numbers<[1], [0], [0], [1], [0, 0, 1, 1], [], []>} : vector<8x128xf32>, vector<128x512xf32>, vector<8x512xf32> -> vector<8x512xf32>
    %598 = arith.addf %595, %597 : vector<8x512xf32>
    %599 = arith.negf %598 : vector<8x512xf32>
    %600 = math.exp %599 : vector<8x512xf32>
    %cst_300 = arith.constant 1.000000e+00 : f32
    %601 = vector.broadcast %cst_300 : f32 to vector<8x512xf32>
    %602 = arith.addf %601, %600 : vector<8x512xf32>
    %603 = arith.divf %601, %602 : vector<8x512xf32>
    %604 = vector.extract_strided_slice %603 {offsets = [0, 0], sizes = [8, 128], strides = [1, 1]} : vector<8x512xf32> to vector<8x128xf32>
    %605 = vector.extract_strided_slice %603 {offsets = [0, 128], sizes = [8, 128], strides = [1, 1]} : vector<8x512xf32> to vector<8x128xf32>
    %606 = vector.extract_strided_slice %603 {offsets = [0, 256], sizes = [8, 128], strides = [1, 1]} : vector<8x512xf32> to vector<8x128xf32>
    %607 = vector.extract_strided_slice %603 {offsets = [0, 384], sizes = [8, 128], strides = [1, 1]} : vector<8x512xf32> to vector<8x128xf32>
    %608 = arith.mulf %605, %586 : vector<8x128xf32>
    %609 = arith.mulf %604, %606 : vector<8x128xf32>
    %610 = arith.addf %608, %609 : vector<8x128xf32>
    %611 = math.tanh %610 : vector<8x128xf32>
    %612 = arith.mulf %607, %611 : vector<8x128xf32>
    %613 = arith.index_cast %593 : i32 to index
    %c0_301 = arith.constant 0 : index
    %614 = vector.load %arg8[%613, %c0_301] : memref<64x128xf32, #tpu.memory_space<vmem>>, vector<8x128xf32>
    tpu.vector_store %arg8[%613, %c0_301], %612 {strides = array<i32>} : memref<64x128xf32, #tpu.memory_space<vmem>>, vector<8x128xf32>,
    %615 = arith.index_cast %593 : i32 to index
    %c0_302 = arith.constant 0 : index
    %616 = vector.load %arg9[%615, %c0_302] : memref<64x128xf32, #tpu.memory_space<vmem>>, vector<8x128xf32>
    tpu.vector_store %arg9[%615, %c0_302], %610 {strides = array<i32>} : memref<64x128xf32, #tpu.memory_space<vmem>>, vector<8x128xf32>,
    %c4_i32_303 = arith.constant 4 : i32
    %c8_i32_304 = arith.constant 8 : i32
    %617 = arith.muli %c4_i32_303, %c8_i32_304 : i32
    %618 = arith.index_cast %617 : i32 to index
    %c0_305 = arith.constant 0 : index
    %619 = vector.load %arg11[%618, %c0_305] : memref<64x512xf32, #tpu.memory_space<vmem>>, vector<8x512xf32>
    %c0_306 = arith.constant 0 : index
    %c0_307 = arith.constant 0 : index
    %620 = vector.load %arg4[%c0_306, %c0_307] : memref<128x512xf32, #tpu.memory_space<vmem>>, vector<128x512xf32>
    %cst_308 = arith.constant dense<0.000000e+00> : vector<8x512xf32>
    %621 = tpu.matmul %612, %620, %cst_308 {dimension_numbers = #tpu.dot_dimension_numbers<[1], [0], [0], [1], [0, 0, 1, 1], [], []>} : vector<8x128xf32>, vector<128x512xf32>, vector<8x512xf32> -> vector<8x512xf32>
    %622 = arith.addf %619, %621 : vector<8x512xf32>
    %623 = arith.negf %622 : vector<8x512xf32>
    %624 = math.exp %623 : vector<8x512xf32>
    %cst_309 = arith.constant 1.000000e+00 : f32
    %625 = vector.broadcast %cst_309 : f32 to vector<8x512xf32>
    %626 = arith.addf %625, %624 : vector<8x512xf32>
    %627 = arith.divf %625, %626 : vector<8x512xf32>
    %628 = vector.extract_strided_slice %627 {offsets = [0, 0], sizes = [8, 128], strides = [1, 1]} : vector<8x512xf32> to vector<8x128xf32>
    %629 = vector.extract_strided_slice %627 {offsets = [0, 128], sizes = [8, 128], strides = [1, 1]} : vector<8x512xf32> to vector<8x128xf32>
    %630 = vector.extract_strided_slice %627 {offsets = [0, 256], sizes = [8, 128], strides = [1, 1]} : vector<8x512xf32> to vector<8x128xf32>
    %631 = vector.extract_strided_slice %627 {offsets = [0, 384], sizes = [8, 128], strides = [1, 1]} : vector<8x512xf32> to vector<8x128xf32>
    %632 = arith.mulf %629, %610 : vector<8x128xf32>
    %633 = arith.mulf %628, %630 : vector<8x128xf32>
    %634 = arith.addf %632, %633 : vector<8x128xf32>
    %635 = math.tanh %634 : vector<8x128xf32>
    %636 = arith.mulf %631, %635 : vector<8x128xf32>
    %637 = arith.index_cast %617 : i32 to index
    %c0_310 = arith.constant 0 : index
    %638 = vector.load %arg8[%637, %c0_310] : memref<64x128xf32, #tpu.memory_space<vmem>>, vector<8x128xf32>
    tpu.vector_store %arg8[%637, %c0_310], %636 {strides = array<i32>} : memref<64x128xf32, #tpu.memory_space<vmem>>, vector<8x128xf32>,
    %639 = arith.index_cast %617 : i32 to index
    %c0_311 = arith.constant 0 : index
    %640 = vector.load %arg9[%639, %c0_311] : memref<64x128xf32, #tpu.memory_space<vmem>>, vector<8x128xf32>
    tpu.vector_store %arg9[%639, %c0_311], %634 {strides = array<i32>} : memref<64x128xf32, #tpu.memory_space<vmem>>, vector<8x128xf32>,
    %c5_i32_312 = arith.constant 5 : i32
    %c8_i32_313 = arith.constant 8 : i32
    %641 = arith.muli %c5_i32_312, %c8_i32_313 : i32
    %642 = arith.index_cast %641 : i32 to index
    %c0_314 = arith.constant 0 : index
    %643 = vector.load %arg11[%642, %c0_314] : memref<64x512xf32, #tpu.memory_space<vmem>>, vector<8x512xf32>
    %c0_315 = arith.constant 0 : index
    %c0_316 = arith.constant 0 : index
    %644 = vector.load %arg4[%c0_315, %c0_316] : memref<128x512xf32, #tpu.memory_space<vmem>>, vector<128x512xf32>
    %cst_317 = arith.constant dense<0.000000e+00> : vector<8x512xf32>
    %645 = tpu.matmul %636, %644, %cst_317 {dimension_numbers = #tpu.dot_dimension_numbers<[1], [0], [0], [1], [0, 0, 1, 1], [], []>} : vector<8x128xf32>, vector<128x512xf32>, vector<8x512xf32> -> vector<8x512xf32>
    %646 = arith.addf %643, %645 : vector<8x512xf32>
    %647 = arith.negf %646 : vector<8x512xf32>
    %648 = math.exp %647 : vector<8x512xf32>
    %cst_318 = arith.constant 1.000000e+00 : f32
    %649 = vector.broadcast %cst_318 : f32 to vector<8x512xf32>
    %650 = arith.addf %649, %648 : vector<8x512xf32>
    %651 = arith.divf %649, %650 : vector<8x512xf32>
    %652 = vector.extract_strided_slice %651 {offsets = [0, 0], sizes = [8, 128], strides = [1, 1]} : vector<8x512xf32> to vector<8x128xf32>
    %653 = vector.extract_strided_slice %651 {offsets = [0, 128], sizes = [8, 128], strides = [1, 1]} : vector<8x512xf32> to vector<8x128xf32>
    %654 = vector.extract_strided_slice %651 {offsets = [0, 256], sizes = [8, 128], strides = [1, 1]} : vector<8x512xf32> to vector<8x128xf32>
    %655 = vector.extract_strided_slice %651 {offsets = [0, 384], sizes = [8, 128], strides = [1, 1]} : vector<8x512xf32> to vector<8x128xf32>
    %656 = arith.mulf %653, %634 : vector<8x128xf32>
    %657 = arith.mulf %652, %654 : vector<8x128xf32>
    %658 = arith.addf %656, %657 : vector<8x128xf32>
    %659 = math.tanh %658 : vector<8x128xf32>
    %660 = arith.mulf %655, %659 : vector<8x128xf32>
    %661 = arith.index_cast %641 : i32 to index
    %c0_319 = arith.constant 0 : index
    %662 = vector.load %arg8[%661, %c0_319] : memref<64x128xf32, #tpu.memory_space<vmem>>, vector<8x128xf32>
    tpu.vector_store %arg8[%661, %c0_319], %660 {strides = array<i32>} : memref<64x128xf32, #tpu.memory_space<vmem>>, vector<8x128xf32>,
    %663 = arith.index_cast %641 : i32 to index
    %c0_320 = arith.constant 0 : index
    %664 = vector.load %arg9[%663, %c0_320] : memref<64x128xf32, #tpu.memory_space<vmem>>, vector<8x128xf32>
    tpu.vector_store %arg9[%663, %c0_320], %658 {strides = array<i32>} : memref<64x128xf32, #tpu.memory_space<vmem>>, vector<8x128xf32>,
    %c6_i32_321 = arith.constant 6 : i32
    %c8_i32_322 = arith.constant 8 : i32
    %665 = arith.muli %c6_i32_321, %c8_i32_322 : i32
    %666 = arith.index_cast %665 : i32 to index
    %c0_323 = arith.constant 0 : index
    %667 = vector.load %arg11[%666, %c0_323] : memref<64x512xf32, #tpu.memory_space<vmem>>, vector<8x512xf32>
    %c0_324 = arith.constant 0 : index
    %c0_325 = arith.constant 0 : index
    %668 = vector.load %arg4[%c0_324, %c0_325] : memref<128x512xf32, #tpu.memory_space<vmem>>, vector<128x512xf32>
    %cst_326 = arith.constant dense<0.000000e+00> : vector<8x512xf32>
    %669 = tpu.matmul %660, %668, %cst_326 {dimension_numbers = #tpu.dot_dimension_numbers<[1], [0], [0], [1], [0, 0, 1, 1], [], []>} : vector<8x128xf32>, vector<128x512xf32>, vector<8x512xf32> -> vector<8x512xf32>
    %670 = arith.addf %667, %669 : vector<8x512xf32>
    %671 = arith.negf %670 : vector<8x512xf32>
    %672 = math.exp %671 : vector<8x512xf32>
    %cst_327 = arith.constant 1.000000e+00 : f32
    %673 = vector.broadcast %cst_327 : f32 to vector<8x512xf32>
    %674 = arith.addf %673, %672 : vector<8x512xf32>
    %675 = arith.divf %673, %674 : vector<8x512xf32>
    %676 = vector.extract_strided_slice %675 {offsets = [0, 0], sizes = [8, 128], strides = [1, 1]} : vector<8x512xf32> to vector<8x128xf32>
    %677 = vector.extract_strided_slice %675 {offsets = [0, 128], sizes = [8, 128], strides = [1, 1]} : vector<8x512xf32> to vector<8x128xf32>
    %678 = vector.extract_strided_slice %675 {offsets = [0, 256], sizes = [8, 128], strides = [1, 1]} : vector<8x512xf32> to vector<8x128xf32>
    %679 = vector.extract_strided_slice %675 {offsets = [0, 384], sizes = [8, 128], strides = [1, 1]} : vector<8x512xf32> to vector<8x128xf32>
    %680 = arith.mulf %677, %658 : vector<8x128xf32>
    %681 = arith.mulf %676, %678 : vector<8x128xf32>
    %682 = arith.addf %680, %681 : vector<8x128xf32>
    %683 = math.tanh %682 : vector<8x128xf32>
    %684 = arith.mulf %679, %683 : vector<8x128xf32>
    %685 = arith.index_cast %665 : i32 to index
    %c0_328 = arith.constant 0 : index
    %686 = vector.load %arg8[%685, %c0_328] : memref<64x128xf32, #tpu.memory_space<vmem>>, vector<8x128xf32>
    tpu.vector_store %arg8[%685, %c0_328], %684 {strides = array<i32>} : memref<64x128xf32, #tpu.memory_space<vmem>>, vector<8x128xf32>,
    %687 = arith.index_cast %665 : i32 to index
    %c0_329 = arith.constant 0 : index
    %688 = vector.load %arg9[%687, %c0_329] : memref<64x128xf32, #tpu.memory_space<vmem>>, vector<8x128xf32>
    tpu.vector_store %arg9[%687, %c0_329], %682 {strides = array<i32>} : memref<64x128xf32, #tpu.memory_space<vmem>>, vector<8x128xf32>,
    %c7_i32_330 = arith.constant 7 : i32
    %c8_i32_331 = arith.constant 8 : i32
    %689 = arith.muli %c7_i32_330, %c8_i32_331 : i32
    %690 = arith.index_cast %689 : i32 to index
    %c0_332 = arith.constant 0 : index
    %691 = vector.load %arg11[%690, %c0_332] : memref<64x512xf32, #tpu.memory_space<vmem>>, vector<8x512xf32>
    %c0_333 = arith.constant 0 : index
    %c0_334 = arith.constant 0 : index
    %692 = vector.load %arg4[%c0_333, %c0_334] : memref<128x512xf32, #tpu.memory_space<vmem>>, vector<128x512xf32>
    %cst_335 = arith.constant dense<0.000000e+00> : vector<8x512xf32>
    %693 = tpu.matmul %684, %692, %cst_335 {dimension_numbers = #tpu.dot_dimension_numbers<[1], [0], [0], [1], [0, 0, 1, 1], [], []>} : vector<8x128xf32>, vector<128x512xf32>, vector<8x512xf32> -> vector<8x512xf32>
    %694 = arith.addf %691, %693 : vector<8x512xf32>
    %695 = arith.negf %694 : vector<8x512xf32>
    %696 = math.exp %695 : vector<8x512xf32>
    %cst_336 = arith.constant 1.000000e+00 : f32
    %697 = vector.broadcast %cst_336 : f32 to vector<8x512xf32>
    %698 = arith.addf %697, %696 : vector<8x512xf32>
    %699 = arith.divf %697, %698 : vector<8x512xf32>
    %700 = vector.extract_strided_slice %699 {offsets = [0, 0], sizes = [8, 128], strides = [1, 1]} : vector<8x512xf32> to vector<8x128xf32>
    %701 = vector.extract_strided_slice %699 {offsets = [0, 128], sizes = [8, 128], strides = [1, 1]} : vector<8x512xf32> to vector<8x128xf32>
    %702 = vector.extract_strided_slice %699 {offsets = [0, 256], sizes = [8, 128], strides = [1, 1]} : vector<8x512xf32> to vector<8x128xf32>
    %703 = vector.extract_strided_slice %699 {offsets = [0, 384], sizes = [8, 128], strides = [1, 1]} : vector<8x512xf32> to vector<8x128xf32>
    %704 = arith.mulf %701, %682 : vector<8x128xf32>
    %705 = arith.mulf %700, %702 : vector<8x128xf32>
    %706 = arith.addf %704, %705 : vector<8x128xf32>
    %707 = math.tanh %706 : vector<8x128xf32>
    %708 = arith.mulf %703, %707 : vector<8x128xf32>
    %709 = arith.index_cast %689 : i32 to index
    %c0_337 = arith.constant 0 : index
    %710 = vector.load %arg8[%709, %c0_337] : memref<64x128xf32, #tpu.memory_space<vmem>>, vector<8x128xf32>
    tpu.vector_store %arg8[%709, %c0_337], %708 {strides = array<i32>} : memref<64x128xf32, #tpu.memory_space<vmem>>, vector<8x128xf32>,
    %711 = arith.index_cast %689 : i32 to index
    %c0_338 = arith.constant 0 : index
    %712 = vector.load %arg9[%711, %c0_338] : memref<64x128xf32, #tpu.memory_space<vmem>>, vector<8x128xf32>
    tpu.vector_store %arg9[%711, %c0_338], %706 {strides = array<i32>} : memref<64x128xf32, #tpu.memory_space<vmem>>, vector<8x128xf32>,
    %c8_i32_339 = arith.constant 8 : i32
    return
  }
  func.func @transform_0(%arg0: i32, %arg1: memref<64xi32, #tpu.memory_space<smem>>) -> (i32, i32) {
    %c0_i32 = arith.constant 0 : i32
    %c0_i32_0 = arith.constant 0 : i32
    %c0_i32_1 = arith.constant 0 : i32
    return %c0_i32, %c0_i32_0 : i32, i32
  }
  func.func @transform_1(%arg0: i32, %arg1: memref<64xi32, #tpu.memory_space<smem>>) -> (i32, i32) {
    %c0_i32 = arith.constant 0 : i32
    %c0_i32_0 = arith.constant 0 : i32
    %c0_i32_1 = arith.constant 0 : i32
    return %c0_i32, %c0_i32_0 : i32, i32
  }
  func.func @transform_2(%arg0: i32, %arg1: memref<64xi32, #tpu.memory_space<smem>>) -> (i32, i32) {
    %c0_i32 = arith.constant 0 : i32
    %c0_i32_0 = arith.constant 0 : i32
    %c0_i32_1 = arith.constant 0 : i32
    return %c0_i32, %c0_i32_0 : i32, i32
  }
  func.func @transform_3(%arg0: i32, %arg1: memref<64xi32, #tpu.memory_space<smem>>) -> (i32, i32) {
    %c0_i32 = arith.constant 0 : i32
    %c0_i32_0 = arith.constant 0 : i32
    %c0_i32_1 = arith.constant 0 : i32
    return %c0_i32, %c0_i32_0 : i32, i32
  }
  func.func @transform_4(%arg0: i32, %arg1: memref<64xi32, #tpu.memory_space<smem>>) -> (i32, i32) {
    %c0_i32 = arith.constant 0 : i32
    %c0_i32_0 = arith.constant 0 : i32
    %c0_i32_1 = arith.constant 0 : i32
    return %c0_i32, %c0_i32_0 : i32, i32
  }
  func.func @transform_5(%arg0: i32, %arg1: memref<64xi32, #tpu.memory_space<smem>>) -> (i32, i32) {
    %c0_i32 = arith.constant 0 : i32
    %c0_i32_0 = arith.constant 0 : i32
    %c0_i32_1 = arith.constant 0 : i32
    return %c0_i32, %c0_i32_0 : i32, i32
  }
  func.func @transform_6(%arg0: i32, %arg1: memref<64xi32, #tpu.memory_space<smem>>) -> (i32, i32) {
    %c0_i32 = arith.constant 0 : i32
    %c0_i32_0 = arith.constant 0 : i32
    %c0_i32_1 = arith.constant 0 : i32
    return %c0_i32, %c0_i32_0 : i32, i32
  }
  func.func @transform_7(%arg0: i32, %arg1: memref<64xi32, #tpu.memory_space<smem>>) -> (i32, i32) {
    %c0_i32 = arith.constant 0 : i32
    %c0_i32_0 = arith.constant 0 : i32
    %c0_i32_1 = arith.constant 0 : i32
    return %c0_i32, %c0_i32_0 : i32, i32
  }
}

</mosaic_0001>

<bundles_post_ra>
// kernel: _run_batched.1
= control target key start
LH: loop header
LB: loop body
LE: loop exit
PB: predicated region body
PF: predicated region fallthrough
CT: control target
= control target key end

     0   :  { %s3776_s30 = smov [#allocation5]   ;;  %s5395_s0 = inlined_call_operand.hbm [shape: s32[64], index: 0, kind: input, shape index: {}]   ;;  %s5396_s1 = inlined_call_operand.hbm [shape: f32[16,128], index: 1, kind: input, shape index: {}]   ;;  %s5397_s2 = inlined_call_operand.hbm [shape: f32[128,512], index: 2, kind: input, shape index: {}]   ;;  %s5398_s3 = inlined_call_operand.hbm [shape: f32[128,512], index: 3, kind: input, shape index: {}]   ;;  %s5399_s4 = inlined_call_operand.vmem [shape: f32[1,512], index: 4, kind: input, shape index: {}]   ;;  %s5400_s5 = inlined_call_operand.hbm [shape: f32[8,128], index: 5, kind: input, shape index: {}]   ;;  %s5401_s6 = inlined_call_operand.hbm [shape: f32[8,128], index: 6, kind: input, shape index: {}]   ;;  %s5402_s7 = inlined_call_operand.hbm [shape: f32[64,128], index: 7, kind: output, shape index: {0}]   ;;  %s5403_s8 = inlined_call_operand.hbm [shape: f32[64,128], index: 8, kind: output, shape index: {1}]  }
   0x1   :  { %s15_s29 = sshll.u32 %s5395_s0, 4  ;;  %s16_s29 = int_to_ptr.hbm [resolvable:$true] %s15_s29 }
   0x2   :  { %18 = dma.hbm_to_smem %s16_s29, 16, %s3776_s30, [#allocation4] }
   0x3   :  { %3764 = dma.done.wait [#allocation4], 16 }
   0x4   :  { %3765 = vsyncadd [#allocation4], 4294967280 }
   0x5   :  { %21 = sfence }
   0x6   :  { %22 = vsyncpa [#allocation7], 0 }
   0x7   :  { %23 = vsyncpa [#allocation10], 0 }
   0x8   :  { %24 = vsyncpa [#allocation13], 0 }
   0x9   :  { %25 = vsyncpa [#allocation8], 0  ;;  %s44_s11 = sshll.u32 %s5397_s2, 4  ;;  %s45_s11 = int_to_ptr.hbm [resolvable:$true] %s44_s11 }
   0xa   :  { %26 = vsyncpa [#allocation17], 0  ;;  %s3777_s12 = smov [#allocation9]   ;;  %s73_s15 = sshll.u32 %s5400_s5, 4  ;;  %s74_s15 = int_to_ptr.hbm [resolvable:$true] %s73_s15 }
   0xb   :  { %s46_s13 = sshll.u32 %s3777_s12, 4  ;;  %s3778_s16 = smov 512   ;;  %s47_s13 = int_to_ptr.vmem [resolvable:$true] %s46_s13 }
   0xc   :  { %s3779_s17 = smov 32   ;;  %s3780_s18 = smov [#allocation12]  }
   0xd   :  { %52 = dma.hbm_to_vmem [thread:$0]  %s45_s11, 8192, %s47_s13, [#allocation10], %s3778_s16, %s3778_s16, %s3779_s17  }
   0xe   :  { %s75_s19 = sshll.u32 %s3780_s18, 4  ;;  %s31_s22 = sshll.u32 %s5396_s1, 4  ;;  %s76_s19 = int_to_ptr.vmem [resolvable:$true] %s75_s19  ;;  %s32_s22 = int_to_ptr.hbm [resolvable:$true] %s31_s22 }
   0xf   :  { %78 = dma.hbm_to_vmem [thread:$0]  %s74_s15, 128, %s76_s19, [#allocation13]  }
  0x10   :  { %s3781_s2 = smov [#allocation6]   ;;  %s57_s5 = sshll.u32 %s5398_s3, 4  ;;  %s58_s5 = int_to_ptr.hbm [resolvable:$true] %s57_s5 }
  0x11   :  { %s33_s23 = sshll.u32 %s3781_s2, 4  ;;  %s3782_s26 = smov 128   ;;  %s34_s23 = int_to_ptr.vmem [resolvable:$true] %s33_s23 }
  0x12   :  { %s3783_s27 = smov 8   ;;  %s3784_s28 = smov [#allocation11]  }
  0x13   :  { %39 = dma.hbm_to_vmem [thread:$0]  %s32_s22, 256, %s34_s23, [#allocation7], %s3782_s26, %s3782_s26, %s3783_s27  }
  0x14   :  { %s59_s29 = sshll.u32 %s3784_s28, 4  ;;  %s84_s9 = sshll.u32 %s5401_s6, 4  ;;  %s60_s29 = int_to_ptr.vmem [resolvable:$true] %s59_s29  ;;  %s85_s9 = int_to_ptr.hbm [resolvable:$true] %s84_s9 }
  0x15   :  { %65 = dma.hbm_to_vmem [thread:$0]  %s58_s5, 8192, %s60_s29, [#allocation10], %s3778_s16, %s3778_s16, %s3779_s17  }
  0x16   :  { %s3785_s10 = smov [#allocation14]  }
  0x17   :  { %s86_s11 = sshll.u32 %s3785_s10, 4  ;;  %s87_s11 = int_to_ptr.vmem [resolvable:$true] %s86_s11 }
  0x18   :  { %89 = dma.hbm_to_vmem [thread:$0]  %s85_s9, 128, %s87_s11, [#allocation13]  }
  0x19   :  { %3766 = dma.done.wait [#allocation7], 256  }
  0x1a   :  { %3767 = vsyncadd [#allocation7], 4294967040 }
  0x1b   :  { %3768 = dma.done.wait [#allocation10], 16384  }
  0x1c   :  { %3769 = vsyncadd [#allocation10], 4294950912 }
  0x1d   :  { %3770 = dma.done.wait [#allocation13], 256  }
  0x1e   :  { %3771 = vsyncadd [#allocation13], 4294967040  ;;  %s3854_s3 = sld [smem:[#allocation5]]  ;;  %v690_v0 = vld [vmem:[#allocation9 + $0x1e0] sm:$0xff]  ;;  %v691_v1 = vld [vmem:[#allocation9 + $0x1e8] sm:$0xff] }
  0x1f   :  { %s3856_s12 = sld [smem:[#allocation5 + $0x1]]  ;;  %v692_v2 = vld [vmem:[#allocation9 + $0x1f0] sm:$0xff]  ;;  %704 = vmatpush.msra.mxu0 %v690_v0  ;;  %745 = vmatpush.msra.mxu1 %v691_v1  ;;  %v693_v3 = vld [vmem:[#allocation9 + $0x1f8] sm:$0xff]  ;;  %v686_v4 = vld [vmem:[#allocation9 + $0x1c0] sm:$0xff] }
  0x20   :  { %s3858_s6 = sld [smem:[#allocation5 + $0x2]]  ;;  %v687_v5 = vld [vmem:[#allocation9 + $0x1c8] sm:$0xff]  ;;  %786 = vmatpush.msra.mxu2 %v692_v2  ;;  %827 = vmatpush.msra.mxu3 %v693_v3  ;;  %v688_v6 = vld [vmem:[#allocation9 + $0x1d0] sm:$0xff]  ;;  %v689_v7 = vld [vmem:[#allocation9 + $0x1d8] sm:$0xff] }
  0x21   :  { %s3860_s13 = sld [smem:[#allocation5 + $0x3]]  ;;  %v682_v8 = vld [vmem:[#allocation9 + $0x1a0] sm:$0xff]  ;;  %705 = vmatpush.msra.mxu0 %v686_v4  ;;  %746 = vmatpush.msra.mxu1 %v687_v5  ;;  %v683_v9 = vld [vmem:[#allocation9 + $0x1a8] sm:$0xff]  ;;  %v684_v10 = vld [vmem:[#allocation9 + $0x1b0] sm:$0xff] }
  0x22   :  { %s3862_s0 = sld [smem:[#allocation5 + $0x4]]  ;;  %v685_v11 = vld [vmem:[#allocation9 + $0x1b8] sm:$0xff]  ;;  %787 = vmatpush.msra.mxu2 %v688_v6  ;;  %828 = vmatpush.msra.mxu3 %v689_v7  ;;  %v678_v12 = vld [vmem:[#allocation9 + $0x180] sm:$0xff]  ;;  %v679_v13 = vld [vmem:[#allocation9 + $0x188] sm:$0xff] }
  0x23   :  { %s3864_s14 = sld [smem:[#allocation5 + $0x5]]  ;;  %706 = vmatpush.msra.mxu0 %v682_v8  ;;  %747 = vmatpush.msra.mxu1 %v683_v9  ;;  %v680_v14 = vld [vmem:[#allocation9 + $0x190] sm:$0xff]  ;;  %v681_v15 = vld [vmem:[#allocation9 + $0x198] sm:$0xff]  ;;  %v674_v16 = vld [vmem:[#allocation9 + $0x160] sm:$0xff] }
  0x24   :  { %p111_p0 = scmp.gt.s32.totalorder %s3854_s3, 0  ;;  %p2885_p1 = scmp.lt.s32.totalorder %s3854_s3, 15  ;;  %788 = vmatpush.msra.mxu2 %v684_v10  ;;  %829 = vmatpush.msra.mxu3 %v685_v11  ;;  %v675_v17 = vld [vmem:[#allocation9 + $0x168] sm:$0xff]  ;;  %v676_v18 = vld [vmem:[#allocation9 + $0x170] sm:$0xff]  ;;  %v677_v19 = vld [vmem:[#allocation9 + $0x178] sm:$0xff] }
  0x25   :  { %p119_p2 = scmp.gt.s32.totalorder %s3856_s12, 0  ;;  %p2891_p3 = scmp.lt.s32.totalorder %s3856_s12, 15  ;;  %707 = vmatpush.msra.mxu0 %v678_v12  ;;  %748 = vmatpush.msra.mxu1 %v679_v13  ;;  %v670_v20 = vld [vmem:[#allocation9 + $0x140] sm:$0xff]  ;;  %v671_v21 = vld [vmem:[#allocation9 + $0x148] sm:$0xff]  ;;  %v672_v22 = vld [vmem:[#allocation9 + $0x150] sm:$0xff] }
  0x26   :  { %s112_s15 = scalar_select %p111_p0, %s3854_s3, 0  ;;  %789 = vmatpush.msra.mxu2 %v680_v14  ;;  %830 = vmatpush.msra.mxu3 %v681_v15  ;;  %v673_v23 = vld [vmem:[#allocation9 + $0x158] sm:$0xff]  ;;  %v666_v24 = vld [vmem:[#allocation9 + $0x120] sm:$0xff]  ;;  %v667_v25 = vld [vmem:[#allocation9 + $0x128] sm:$0xff] }
  0x27   :  { %s120_s16 = scalar_select %p119_p2, %s3856_s12, 0  ;;  %708 = vmatpush.msra.mxu0 %v674_v16  ;;  %749 = vmatpush.msra.mxu1 %v675_v17  ;;  %v668_v26 = vld [vmem:[#allocation9 + $0x130] sm:$0xff]  ;;  %v669_v27 = vld [vmem:[#allocation9 + $0x138] sm:$0xff]  ;;  %v662_v28 = vld [vmem:[#allocation9 + $0x100] sm:$0xff] }
  0x28   :  { %s5662_s15 = smov (!%p2885_p1, %s112_s15), 15  ;;  %p127_p4 = scmp.gt.s32.totalorder %s3858_s6, 0  ;;  %790 = vmatpush.msra.mxu2 %v676_v18  ;;  %831 = vmatpush.msra.mxu3 %v677_v19  ;;  %v663_v29 = vld [vmem:[#allocation9 + $0x108] sm:$0xff]  ;;  %v664_v30 = vld [vmem:[#allocation9 + $0x110] sm:$0xff]  ;;  %v665_v31 = vld [vmem:[#allocation9 + $0x118] sm:$0xff] }
  0x29   :  { %s5664_s16 = smov (!%p2891_p3, %s120_s16), 15  ;;  %p2897_p5 = scmp.lt.s32.totalorder %s3858_s6, 15  ;;  %709 = vmatpush.msra.mxu0 %v670_v20  ;;  %750 = vmatpush.msra.mxu1 %v671_v21  ;;  %v658_v32 = vld [vmem:[#allocation9 + $0xe0] sm:$0xff]  ;;  %v659_v33 = vld [vmem:[#allocation9 + $0xe8] sm:$0xff]  ;;  %v660_v34 = vld [vmem:[#allocation9 + $0xf0] sm:$0xff] }
  0x2a   :  { %s128_s17 = scalar_select %p127_p4, %s3858_s6, 0  ;;  %791 = vmatpush.msra.mxu2 %v672_v22  ;;  %832 = vmatpush.msra.mxu3 %v673_v23  ;;  %v661_v35 = vld [vmem:[#allocation9 + $0xf8] sm:$0xff]  ;;  %v654_v36 = vld [vmem:[#allocation9 + $0xc0] sm:$0xff]  ;;  %v655_v37 = vld [vmem:[#allocation9 + $0xc8] sm:$0xff] }
  0x2b   :  { %p135_p6 = scmp.gt.s32.totalorder %s3860_s13, 0  ;;  %p2903_p7 = scmp.lt.s32.totalorder %s3860_s13, 15  ;;  %710 = vmatpush.msra.mxu0 %v666_v24  ;;  %751 = vmatpush.msra.mxu1 %v667_v25  ;;  %v656_v38 = vld [vmem:[#allocation9 + $0xd0] sm:$0xff]  ;;  %v657_v39 = vld [vmem:[#allocation9 + $0xd8] sm:$0xff]  ;;  %v650_v40 = vld [vmem:[#allocation9 + $0xa0] sm:$0xff] }
  0x2c   :  { %s5666_s17 = smov (!%p2897_p5, %s128_s17), 15  ;;  %p143_p8 = scmp.gt.s32.totalorder %s3862_s0, 0  ;;  %792 = vmatpush.msra.mxu2 %v668_v26  ;;  %833 = vmatpush.msra.mxu3 %v669_v27  ;;  %v651_v41 = vld [vmem:[#allocation9 + $0xa8] sm:$0xff]  ;;  %v652_v42 = vld [vmem:[#allocation9 + $0xb0] sm:$0xff]  ;;  %v653_v43 = vld [vmem:[#allocation9 + $0xb8] sm:$0xff] }
  0x2d   :  { %s136_s18 = scalar_select %p135_p6, %s3860_s13, 0  ;;  %711 = vmatpush.msra.mxu0 %v662_v28  ;;  %752 = vmatpush.msra.mxu1 %v663_v29  ;;  %v646_v44 = vld [vmem:[#allocation9 + $0x80] sm:$0xff]  ;;  %v647_v45 = vld [vmem:[#allocation9 + $0x88] sm:$0xff]  ;;  %v648_v46 = vld [vmem:[#allocation9 + $0x90] sm:$0xff] }
  0x2e   :  { %s144_s19 = scalar_select %p143_p8, %s3862_s0, 0  ;;  %793 = vmatpush.msra.mxu2 %v664_v30  ;;  %834 = vmatpush.msra.mxu3 %v665_v31  ;;  %v649_v47 = vld [vmem:[#allocation9 + $0x98] sm:$0xff]  ;;  %v642_v48 = vld [vmem:[#allocation9 + $0x60] sm:$0xff]  ;;  %v643_v49 = vld [vmem:[#allocation9 + $0x68] sm:$0xff] }
  0x2f   :  { %s5668_s18 = smov (!%p2903_p7, %s136_s18), 15  ;;  %p2909_p9 = scmp.lt.s32.totalorder %s3862_s0, 15  ;;  %712 = vmatpush.msra.mxu0 %v658_v32  ;;  %753 = vmatpush.msra.mxu1 %v659_v33  ;;  %v644_v50 = vld [vmem:[#allocation9 + $0x70] sm:$0xff]  ;;  %v645_v51 = vld [vmem:[#allocation9 + $0x78] sm:$0xff]  ;;  %v638_v54 = vld [vmem:[#allocation9 + $0x40] sm:$0xff] }
  0x30   :  { %p151_p10 = scmp.gt.s32.totalorder %s3864_s14, 0  ;;  %p2915_p11 = scmp.lt.s32.totalorder %s3864_s14, 15  ;;  %794 = vmatpush.msra.mxu2 %v660_v34  ;;  %835 = vmatpush.msra.mxu3 %v661_v35  ;;  %v639_v57 = vld [vmem:[#allocation9 + $0x48] sm:$0xff]  ;;  %v640_v60 = vld [vmem:[#allocation9 + $0x50] sm:$0xff]  ;;  %v641_v61 = vld [vmem:[#allocation9 + $0x58] sm:$0xff] }
  0x31   :  { %s5670_s19 = smov (!%p2909_p9, %s144_s19), 15  ;;  %713 = vmatpush.msra.mxu0 %v654_v36  ;;  %754 = vmatpush.msra.mxu1 %v655_v37  ;;  %s3904_s21 = sld [smem:[#allocation5 + $0x6]]  ;;  %v634_v62 = vld [vmem:[#allocation9 + $0x20] sm:$0xff]  ;;  %v635_v63 = vld [vmem:[#allocation9 + $0x28] sm:$0xff]  ;;  %v636_v0 = vld [vmem:[#allocation9 + $0x30] sm:$0xff] }
  0x32   :  { %s152_s20 = scalar_select %p151_p10, %s3864_s14, 0  ;;  %795 = vmatpush.msra.mxu2 %v656_v38  ;;  %836 = vmatpush.msra.mxu3 %v657_v39  ;;  %v637_v1 = vld [vmem:[#allocation9 + $0x38] sm:$0xff]  ;;  %v630_v2 = vld [vmem:[#allocation9] sm:$0xff]  ;;  %v631_v3 = vld [vmem:[#allocation9 + $0x8] sm:$0xff] }
  0x33   :  { %714 = vmatpush.msra.mxu0 %v650_v40  ;;  %755 = vmatpush.msra.mxu1 %v651_v41  ;;  %s115_s22 = scalar_lea.vmem [#allocation6], %s5662_s15  ;;  %s123_s2 = scalar_lea.vmem [#allocation6], %s5664_s16  ;;  %v632_v4 = vld [vmem:[#allocation9 + $0x10] sm:$0xff]  ;;  %v633_v5 = vld [vmem:[#allocation9 + $0x18] sm:$0xff]  ;;  %v966_v7 = vld [vmem:[#allocation11 + $0x1e0] sm:$0xff] }
  0x34   :  { %s5672_s20 = smov (!%p2915_p11, %s152_s20), 15  ;;  %v116_v52 = vld [vmem:[%s115_s22] sm:$0x1]  ;;  %796 = vmatpush.msra.mxu2 %v652_v42  ;;  %837 = vmatpush.msra.mxu3 %v653_v43  ;;  %s131_s23 = scalar_lea.vmem [#allocation6], %s5666_s17  ;;  %v967_v8 = vld [vmem:[#allocation11 + $0x1e8] sm:$0xff]  ;;  %v962_v17 = vld [vmem:[#allocation11 + $0x1c0] sm:$0xff] }
  0x35   :  { %v124_v53 = vld [vmem:[%s123_s2] sm:$0x1]  ;;  %117 = vst [vmem:[#allocation2] sm:$0x1] %v116_v52  ;;  %s139_s24 = scalar_lea.vmem [#allocation6], %s5668_s18  ;;  %715 = vmatpush.msra.mxu0 %v646_v44  ;;  %756 = vmatpush.msra.mxu1 %v647_v45  ;;  %s147_s25 = scalar_lea.vmem [#allocation6], %s5670_s19 }
  0x36   :  { %v132_v55 = vld [vmem:[%s131_s23] sm:$0x1]  ;;  %125 = vst [vmem:[#allocation2 + $0x1] sm:$0x1] %v124_v53  ;;  %797 = vmatpush.msra.mxu2 %v648_v46  ;;  %838 = vmatpush.msra.mxu3 %v649_v47  ;;  %s155_s5 = scalar_lea.vmem [#allocation6], %s5672_s20  ;;  %s3913_s28 = sld [smem:[#allocation5 + $0x7]] }
  0x37   :  { %v140_v56 = vld [vmem:[%s139_s24] sm:$0x1]  ;;  %133 = vst [vmem:[#allocation2 + $0x2] sm:$0x1] %v132_v55  ;;  %716 = vmatpush.msra.mxu0 %v642_v48  ;;  %757 = vmatpush.msra.mxu1 %v643_v49  ;;  %p159_p12 = scmp.gt.s32.totalorder %s3904_s21, 0  ;;  %p2921_p13 = scmp.lt.s32.totalorder %s3904_s21, 15 }
  0x38   :  { %v148_v58 = vld [vmem:[%s147_s25] sm:$0x1]  ;;  %141 = vst [vmem:[#allocation2 + $0x3] sm:$0x1] %v140_v56  ;;  %798 = vmatpush.msra.mxu2 %v644_v50  ;;  %839 = vmatpush.msra.mxu3 %v645_v51  ;;  %s3917_s29 = sld [smem:[#allocation5 + $0x8]]  ;;  %v963_v18 = vld [vmem:[#allocation11 + $0x1c8] sm:$0xff] }
  0x39   :  { %v156_v59 = vld [vmem:[%s155_s5] sm:$0x1]  ;;  %149 = vst [vmem:[#allocation2 + $0x4] sm:$0x1] %v148_v58  ;;  %717 = vmatpush.msra.mxu0 %v638_v54  ;;  %758 = vmatpush.msra.mxu1 %v639_v57  ;;  %s160_s1 = scalar_select %p159_p12, %s3904_s21, 0  ;;  %v969_v19 = vld [vmem:[#allocation11 + $0x1f8] sm:$0xff] }
  0x3a   :  { %157 = vst [vmem:[#allocation2 + $0x5] sm:$0x1] %v156_v59  ;;  %799 = vmatpush.msra.mxu2 %v640_v60  ;;  %840 = vmatpush.msra.mxu3 %v641_v61  ;;  %s3920_s30 = sld [smem:[#allocation5 + $0x9]]  ;;  %v968_v6 = vld [vmem:[#allocation11 + $0x1f0] sm:$0xff]  ;;  %v958_v21 = vld [vmem:[#allocation11 + $0x1a0] sm:$0xff]  ;;  %v959_v22 = vld [vmem:[#allocation11 + $0x1a8] sm:$0xff] }
  0x3b   :  { %718 = vmatpush.msra.mxu0 %v634_v62  ;;  %759 = vmatpush.msra.mxu1 %v635_v63  ;;  %s5674_s1 = smov (!%p2921_p13, %s160_s1), 15  ;;  %s3926_s9 = sld [smem:[#allocation5 + $0xa]]  ;;  %v964_v10 = vld [vmem:[#allocation11 + $0x1d0] sm:$0xff]  ;;  %v965_v23 = vld [vmem:[#allocation11 + $0x1d8] sm:$0xff]  ;;  %v954_v34 = vld [vmem:[#allocation11 + $0x180] sm:$0xff] }
  0x3c   :  { %800 = vmatpush.msra.mxu2 %v636_v0  ;;  %841 = vmatpush.msra.mxu3 %v637_v1  ;;  %p167_p0 = scmp.gt.s32.totalorder %s3913_s28, 0  ;;  %p2927_p1 = scmp.lt.s32.totalorder %s3913_s28, 15  ;;  %v960_v16 = vld [vmem:[#allocation11 + $0x1b0] sm:$0xff]  ;;  %v955_v35 = vld [vmem:[#allocation11 + $0x188] sm:$0xff]  ;;  %v961_v36 = vld [vmem:[#allocation11 + $0x1b8] sm:$0xff] }
  0x3d   :  { %719 = vmatpush.msra.mxu0 %v630_v2  ;;  %760 = vmatpush.msra.mxu1 %v631_v3  ;;  %s163_s10 = scalar_lea.vmem [#allocation6], %s5674_s1  ;;  %s3940_s13 = sld [smem:[#allocation5 + $0xb]]  ;;  %v956_v20 = vld [vmem:[#allocation11 + $0x190] sm:$0xff]  ;;  %v950_v38 = vld [vmem:[#allocation11 + $0x160] sm:$0xff]  ;;  %v951_v39 = vld [vmem:[#allocation11 + $0x168] sm:$0xff] }
  0x3e   :  { %801 = vmatpush.msra.mxu2 %v632_v4  ;;  %842 = vmatpush.msra.mxu3 %v633_v5  ;;  %v164_v9 = vld [vmem:[%s163_s10] sm:$0x1]  ;;  %s168_s11 = scalar_select %p167_p0, %s3913_s28, 0  ;;  %v957_v40 = vld [vmem:[#allocation11 + $0x198] sm:$0xff]  ;;  %v946_v51 = vld [vmem:[#allocation11 + $0x140] sm:$0xff] }
  0x3f   :  { %165 = vst [vmem:[#allocation2 + $0x6] sm:$0x1] %v164_v9  ;;  %970 = vmatpush.msrb.mxu0 %v966_v7  ;;  %p175_p2 = scmp.gt.s32.totalorder %s3917_s29, 0  ;;  %p2933_p3 = scmp.lt.s32.totalorder %s3917_s29, 15  ;;  %990 = vmatpush.msrb.mxu1 %v967_v8  ;;  %v952_v33 = vld [vmem:[#allocation11 + $0x170] sm:$0xff]  ;;  %v947_v52 = vld [vmem:[#allocation11 + $0x148] sm:$0xff] }
  0x40   :  { %1010 = vmatpush.msrb.mxu2 %v968_v6  ;;  %s5676_s11 = smov (!%p2927_p1, %s168_s11), 15  ;;  %p183_p4 = scmp.gt.s32.totalorder %s3920_s30, 0  ;;  %1030 = vmatpush.msrb.mxu3 %v969_v19  ;;  %v948_v37 = vld [vmem:[#allocation11 + $0x150] sm:$0xff]  ;;  %v953_v53 = vld [vmem:[#allocation11 + $0x178] sm:$0xff]  ;;  %v942_v55 = vld [vmem:[#allocation11 + $0x120] sm:$0xff] }
  0x41   :  { %s5678_s29 = smov (!%p175_p2, %s3917_s29), 0  ;;  %s171_s3 = scalar_lea.vmem [#allocation6], %s5676_s11  ;;  %971 = vmatpush.msrb.mxu0 %v962_v17  ;;  %991 = vmatpush.msrb.mxu1 %v963_v18  ;;  %v944_v50 = vld [vmem:[#allocation11 + $0x130] sm:$0xff]  ;;  %v943_v56 = vld [vmem:[#allocation11 + $0x128] sm:$0xff]  ;;  %v949_v57 = vld [vmem:[#allocation11 + $0x158] sm:$0xff] }
  0x42   :  { %1011 = vmatpush.msrb.mxu2 %v964_v10  ;;  %v172_v11 = vld [vmem:[%s171_s3] sm:$0x1]  ;;  %s5680_s29 = smov (!%p2933_p3, %s5678_s29), 15  ;;  %p2939_p5 = scmp.lt.s32.totalorder %s3920_s30, 15  ;;  %1031 = vmatpush.msrb.mxu3 %v965_v23  ;;  %v4028_v4 = vld [vmem:[#allocation11 + $0x100] sm:$0xff]  ;;  %v4034_v5 = vld [vmem:[#allocation11 + $0x108] sm:$0xff] }
  0x43   :  { %173 = vst [vmem:[#allocation2 + $0x7] sm:$0x1] %v172_v11  ;;  %s184_s12 = scalar_select %p183_p4, %s3920_s30, 0  ;;  %972 = vmatpush.msrb.mxu0 %v958_v21  ;;  %992 = vmatpush.msrb.mxu1 %v959_v22  ;;  %v940_v54 = vld [vmem:[#allocation11 + $0x110] sm:$0xff]  ;;  %v4036_v6 = vld [vmem:[#allocation11 + $0x138] sm:$0xff]  ;;  %v4042_v8 = vld [vmem:[#allocation11 + $0xe0] sm:$0xff] }
  0x44   :  { %s179_s6 = scalar_lea.vmem [#allocation6], %s5680_s29  ;;  %p191_p6 = scmp.gt.s32.totalorder %s3926_s9, 0  ;;  %1012 = vmatpush.msrb.mxu2 %v960_v16  ;;  %1032 = vmatpush.msrb.mxu3 %v961_v36  ;;  %v4026_v3 = vld [vmem:[#allocation11 + $0xf0] sm:$0xff]  ;;  %v4044_v9 = vld [vmem:[#allocation11 + $0xe8] sm:$0xff]  ;;  %v4046_v10 = vld [vmem:[#allocation11 + $0x118] sm:$0xff] }
  0x45   :  { %v180_v12 = vld [vmem:[%s179_s6] sm:$0x1]  ;;  %p2945_p7 = scmp.lt.s32.totalorder %s3926_s9, 15  ;;  %s5682_s12 = smov (!%p2939_p5, %s184_s12), 15  ;;  %973 = vmatpush.msrb.mxu0 %v954_v34  ;;  %993 = vmatpush.msrb.mxu1 %v955_v35  ;;  %v4087_v21 = vld [vmem:[#allocation11 + $0xc0] sm:$0xff]  ;;  %v4089_v22 = vld [vmem:[#allocation11 + $0xc8] sm:$0xff] }
  0x46   :  { %181 = vst [vmem:[#allocation2 + $0x8] sm:$0x1] %v180_v12  ;;  %s5684_s9 = smov (!%p191_p6, %s3926_s9), 0  ;;  %s187_s0 = scalar_lea.vmem [#allocation6], %s5682_s12  ;;  %1013 = vmatpush.msrb.mxu2 %v956_v20  ;;  %1033 = vmatpush.msrb.mxu3 %v957_v40  ;;  %v4038_v7 = vld [vmem:[#allocation11 + $0xd0] sm:$0xff]  ;;  %v4094_v23 = vld [vmem:[#allocation11 + $0xf8] sm:$0xff] }
  0x47   :  { %v188_v13 = vld [vmem:[%s187_s0] sm:$0x1]  ;;  %s5686_s9 = smov (!%p2945_p7, %s5684_s9), 15  ;;  %s3942_s14 = sld [smem:[#allocation5 + $0xc]]  ;;  %974 = vmatpush.msrb.mxu0 %v950_v38  ;;  %994 = vmatpush.msrb.mxu1 %v951_v39  ;;  %v4129_v38 = vld [vmem:[#allocation11 + $0x80] sm:$0xff]  ;;  %v4131_v39 = vld [vmem:[#allocation11 + $0x88] sm:$0xff] }
  0x48   :  { %189 = vst [vmem:[#allocation2 + $0x9] sm:$0x1] %v188_v13  ;;  %s3944_s15 = sld [smem:[#allocation5 + $0xd]]  ;;  %s195_s16 = scalar_lea.vmem [#allocation6], %s5686_s9  ;;  %1014 = vmatpush.msrb.mxu2 %v952_v33  ;;  %1034 = vmatpush.msrb.mxu3 %v953_v53  ;;  %v4085_v20 = vld [vmem:[#allocation11 + $0xb0] sm:$0xff]  ;;  %v4136_v40 = vld [vmem:[#allocation11 + $0xb8] sm:$0xff] }
  0x49   :  { %v196_v15 = vld [vmem:[%s195_s16] sm:$0x1]  ;;  %s3946_s17 = sld [smem:[#allocation5 + $0xe]]  ;;  %p199_p8 = scmp.gt.s32.totalorder %s3940_s13, 0  ;;  %975 = vmatpush.msrb.mxu0 %v946_v51  ;;  %995 = vmatpush.msrb.mxu1 %v947_v52 }
  0x4a   :  { %v622_v14 = vld [vmem:[#allocation2] sm:$0xff]  ;;  %197 = vst [vmem:[#allocation2 + $0xa] sm:$0x1] %v196_v15  ;;  %s3948_s18 = sld [smem:[#allocation5 + $0xf]]  ;;  %p2951_p9 = scmp.lt.s32.totalorder %s3940_s13, 15  ;;  %1015 = vmatpush.msrb.mxu2 %v948_v37  ;;  %1035 = vmatpush.msrb.mxu3 %v949_v57  ;;  %v4182_v57 = vld [vmem:[#allocation11 + $0x48] sm:$0xff] }
  0x4b   :  { %720 = vmatmul.f32.vlgmr.msra.gmra.mxu0 %v622_v14  ;;  %761 = vmatmul.f32.vlgmr.msra.gmra.mxu1 %v622_v14  ;;  %s3952_s19 = sld [smem:[#allocation5 + $0x10]]  ;;  %v4127_v37 = vld [vmem:[#allocation11 + $0x70] sm:$0xff] }
  0x4c   :  { %802 = vmatmul.f32.vlgmr.msra.gmra.mxu2 %v622_v14  ;;  %843 = vmatmul.f32.vlgmr.msra.gmra.mxu3 %v622_v14  ;;  %s200_s20 = scalar_select %p199_p8, %s3940_s13, 0 }
  0x4d   :  { %p207_p10 = scmp.gt.s32.totalorder %s3942_s14, 0  ;;  %p2957_p11 = scmp.lt.s32.totalorder %s3942_s14, 15  ;;  %1016 = vmatpush.msrb.mxu2 %v944_v50  ;;  %976 = vmatpush.msrb.mxu0 %v942_v55  ;;  %v4174_v55 = vld [vmem:[#allocation11 + $0x78] sm:$0xff] }
  0x4e   :  { %s5688_s20 = smov (!%p2951_p9, %s200_s20), 15  ;;  %p215_p12 = scmp.gt.s32.totalorder %s3944_s15, 0  ;;  %996 = vmatpush.msrb.mxu1 %v943_v56  ;;  %1036 = vmatpush.msrb.mxu3 %v4036_v6  ;;  %v4180_v56 = vld [vmem:[#allocation11 + $0x40] sm:$0xff] }
  0x4f   :  { %s5690_s14 = smov (!%p207_p10, %s3942_s14), 0  ;;  %s203_s21 = scalar_lea.vmem [#allocation6], %s5688_s20  ;;  %1017 = vmatpush.msrb.mxu2 %v940_v54  ;;  %977 = vmatpush.msrb.mxu0 %v4028_v4  ;;  %v4172_v54 = vld [vmem:[#allocation11 + $0x30] sm:$0xff] }
  0x50   :  { %v204_v24 = vld [vmem:[%s203_s21] sm:$0x1]  ;;  %s5692_s14 = smov (!%p2957_p11, %s5690_s14), 15  ;;  %p2963_p13 = scmp.lt.s32.totalorder %s3944_s15, 15  ;;  %997 = vmatpush.msrb.mxu1 %v4034_v5  ;;  %1037 = vmatpush.msrb.mxu3 %v4046_v10 }
  0x51   :  { %205 = vst [vmem:[#allocation2 + $0xb] sm:$0x1] %v204_v24  ;;  %s216_s22 = scalar_select %p215_p12, %s3944_s15, 0  ;;  %1018 = vmatpush.msrb.mxu2 %v4026_v3  ;;  %978 = vmatpush.msrb.mxu0 %v4042_v8  ;;  %v4096_v24 = vld [vmem:[#allocation11 + $0x90] sm:$0xff] }
  0x52   :  { %s211_s2 = scalar_lea.vmem [#allocation6], %s5692_s14  ;;  %p223_p0 = scmp.gt.s32.totalorder %s3946_s17, 0  ;;  %998 = vmatpush.msrb.mxu1 %v4044_v9  ;;  %1038 = vmatpush.msrb.mxu3 %v4094_v23 }
  0x53   :  { %v212_v25 = vld [vmem:[%s211_s2] sm:$0x1]  ;;  %p2969_p1 = scmp.lt.s32.totalorder %s3946_s17, 15  ;;  %s5694_s22 = smov (!%p2963_p13, %s216_s22), 15  ;;  %1019 = vmatpush.msrb.mxu2 %v4038_v7  ;;  %979 = vmatpush.msrb.mxu0 %v4087_v21 }
  0x54   :  { %213 = vst [vmem:[#allocation2 + $0xc] sm:$0x1] %v212_v25  ;;  %s5696_s17 = smov (!%p223_p0, %s3946_s17), 0  ;;  %p231_p2 = scmp.gt.s32.totalorder %s3948_s18, 0  ;;  %v4098_v25 = vld [vmem:[#allocation11 + $0xa0] sm:$0xff]  ;;  %999 = vmatpush.msrb.mxu1 %v4089_v22 }
  0x55   :  { %s219_s23 = scalar_lea.vmem [#allocation6], %s5694_s22  ;;  %s5698_s17 = smov (!%p2969_p1, %s5696_s17), 15  ;;  %1020 = vmatpush.msrb.mxu2 %v4085_v20  ;;  %980 = vmatpush.msrb.mxu0 %v4098_v25 }
  0x56   :  { %v220_v26 = vld [vmem:[%s219_s23] sm:$0x1]  ;;  %s232_s24 = scalar_select %p231_p2, %s3948_s18, 0 }
  0x57   :  { %221 = vst [vmem:[#allocation2 + $0xd] sm:$0x1] %v220_v26  ;;  %p2975_p3 = scmp.lt.s32.totalorder %s3948_s18, 15  ;;  %s227_s25 = scalar_lea.vmem [#allocation6], %s5698_s17  ;;  %v4103_v26 = vld [vmem:[#allocation11 + $0xa8] sm:$0xff]  ;;  %1021 = vmatpush.msrb.mxu2 %v4096_v24  ;;  %981 = vmatpush.msrb.mxu0 %v4129_v38 }
  0x58   :  { %v228_v27 = vld [vmem:[%s227_s25] sm:$0x1]  ;;  %p239_p4 = scmp.gt.s32.totalorder %s3952_s19, 0  ;;  %p2981_p5 = scmp.lt.s32.totalorder %s3952_s19, 15  ;;  %1000 = vmatpush.msrb.mxu1 %v4103_v26 }
  0x59   :  { %229 = vst [vmem:[#allocation2 + $0xe] sm:$0x1] %v228_v27  ;;  %s5700_s24 = smov (!%p2975_p3, %s232_s24), 15  ;;  %s2986_s5 = sld [smem:[#allocation5 + $0x11]]  ;;  %v4105_v27 = vld [vmem:[#allocation11 + $0xd8] sm:$0xff]  ;;  %1022 = vmatpush.msrb.mxu2 %v4127_v37 }
  0x5a   :  { %s5702_s19 = smov (!%p239_p4, %s3952_s19), 0  ;;  %s235_s28 = scalar_lea.vmem [#allocation6], %s5700_s24  ;;  %1039 = vmatpush.msrb.mxu3 %v4105_v27  ;;  %1001 = vmatpush.msrb.mxu1 %v4131_v39 }
  0x5b   :  { %v236_v28 = vld [vmem:[%s235_s28] sm:$0x1]  ;;  %s5704_s19 = smov (!%p2981_p5, %s5702_s19), 15  ;;  %s2992_s29 = sld [smem:[#allocation5 + $0x12]] }
  0x5c   :  { %237 = vst [vmem:[#allocation2 + $0xf] sm:$0x1] %v236_v28  ;;  %s3972_s1 = sld [smem:[#allocation5 + $0x13]]  ;;  %s243_s30 = scalar_lea.vmem [#allocation6], %s5704_s19  ;;  %1040 = vmatpush.msrb.mxu3 %v4136_v40 }
  0x5d   :  { %v244_v29 = vld [vmem:[%s243_s30] sm:$0x1]  ;;  %s3974_s9 = sld [smem:[#allocation5 + $0x14]] }
  0x5e   :  { %245 = vst [vmem:[#allocation2 + $0x10] sm:$0x1] %v244_v29  ;;  %s3976_s10 = sld [smem:[#allocation5 + $0x15]] }
  0x5f   :  { %p247_p6 = scmp.gt.s32.totalorder %s2986_s5, 0  ;;  %p2987_p7 = scmp.lt.s32.totalorder %s2986_s5, 15 }
  0x60   :  { %s3978_s11 = sld [smem:[#allocation5 + $0x16]] }
  0x61   :  { %s5706_s5 = smov (!%p247_p6, %s2986_s5), 0  ;;  %p255_p8 = scmp.gt.s32.totalorder %s2992_s29, 0 }
  0x62   :  { %p2993_p9 = scmp.lt.s32.totalorder %s2992_s29, 15  ;;  %s5708_s5 = smov (!%p2987_p7, %s5706_s5), 15 }
  0x63   :  { %v623_v30 = vld [vmem:[#allocation2 + $0x8] sm:$0xff]  ;;  %s5710_s29 = smov (!%p255_p8, %s2992_s29), 0  ;;  %p263_p10 = scmp.gt.s32.totalorder %s3972_s1, 0 }
  0x64   :  { %723 = vmatmul.f32.gmra.mxu0 %v623_v30  ;;  %764 = vmatmul.f32.gmra.mxu1 %v623_v30  ;;  %s251_s3 = scalar_lea.vmem [#allocation6], %s5708_s5  ;;  %s5712_s29 = smov (!%p2993_p9, %s5710_s29), 15 }
  0x65   :  { %805 = vmatmul.f32.gmra.mxu2 %v623_v30  ;;  %846 = vmatmul.f32.gmra.mxu3 %v623_v30  ;;  %v252_v31 = vld [vmem:[%s251_s3] sm:$0x1]  ;;  %s264_s12 = scalar_select %p263_p10, %s3972_s1, 0 }
  0x66   :  { %253 = vst [vmem:[#allocation2 + $0x11] sm:$0x1] %v252_v31  ;;  %p2999_p11 = scmp.lt.s32.totalorder %s3972_s1, 15  ;;  %s259_s6 = scalar_lea.vmem [#allocation6], %s5712_s29 }
  0x67   :  { %v260_v32 = vld [vmem:[%s259_s6] sm:$0x1]  ;;  %p271_p12 = scmp.gt.s32.totalorder %s3974_s9, 0  ;;  %p3005_p13 = scmp.lt.s32.totalorder %s3974_s9, 15 }
  0x68   :  { %261 = vst [vmem:[#allocation2 + $0x12] sm:$0x1] %v260_v32  ;;  %s5714_s12 = smov (!%p2999_p11, %s264_s12), 15  ;;  %p279_p0 = scmp.gt.s32.totalorder %s3976_s10, 0 }
  0x69   :  { %s272_s13 = scalar_select %p271_p12, %s3974_s9, 0 }
  0x6a   :  { %s267_s0 = scalar_lea.vmem [#allocation6], %s5714_s12  ;;  %p3011_p1 = scmp.lt.s32.totalorder %s3976_s10, 15 }
  0x6b   :  { %v268_v41 = vld [vmem:[%s267_s0] sm:$0x1]  ;;  %s5716_s13 = smov (!%p3005_p13, %s272_s13), 15  ;;  %p287_p2 = scmp.gt.s32.totalorder %s3978_s11, 0 }
  0x6c   :  { %269 = vst [vmem:[#allocation2 + $0x13] sm:$0x1] %v268_v41  ;;  %s280_s14 = scalar_select %p279_p0, %s3976_s10, 0  ;;  %v4138_v41 = vld [vmem:[#allocation11 + $0x50] sm:$0xff] }
  0x6d   :  { %s275_s15 = scalar_lea.vmem [#allocation6], %s5716_s13  ;;  %p3017_p3 = scmp.lt.s32.totalorder %s3978_s11, 15  ;;  %1023 = vmatpush.msrb.mxu2 %v4138_v41 }
  0x6e   :  { %v276_v42 = vld [vmem:[%s275_s15] sm:$0x1]  ;;  %s5718_s14 = smov (!%p3011_p1, %s280_s14), 15  ;;  %s5720_s11 = smov (!%p287_p2, %s3978_s11), 0 }
  0x6f   :  { %277 = vst [vmem:[#allocation2 + $0x14] sm:$0x1] %v276_v42  ;;  %s3022_s16 = sld [smem:[#allocation5 + $0x17]]  ;;  %s283_s17 = scalar_lea.vmem [#allocation6], %s5718_s14  ;;  %v4140_v42 = vld [vmem:[#allocation11 + $0x60] sm:$0xff]  ;;  %1024 = vmatpush.msrb.mxu2 %v4172_v54 }
  0x70   :  { %v284_v43 = vld [vmem:[%s283_s17] sm:$0x1]  ;;  %s5722_s11 = smov (!%p3017_p3, %s5720_s11), 15  ;;  %s3028_s18 = sld [smem:[#allocation5 + $0x18]]  ;;  %982 = vmatpush.msrb.mxu0 %v4140_v42 }
  0x71   :  { %285 = vst [vmem:[#allocation2 + $0x15] sm:$0x1] %v284_v43  ;;  %s3034_s19 = sld [smem:[#allocation5 + $0x19]]  ;;  %s291_s20 = scalar_lea.vmem [#allocation6], %s5722_s11  ;;  %v4144_v43 = vld [vmem:[#allocation11 + $0x68] sm:$0xff] }
  0x72   :  { %v292_v44 = vld [vmem:[%s291_s20] sm:$0x1]  ;;  %s3040_s21 = sld [smem:[#allocation5 + $0x1a]]  ;;  %1002 = vmatpush.msrb.mxu1 %v4144_v43  ;;  %983 = vmatpush.msrb.mxu0 %v4180_v56 }
  0x73   :  { %293 = vst [vmem:[#allocation2 + $0x16] sm:$0x1] %v292_v44  ;;  %s3994_s22 = sld [smem:[#allocation5 + $0x1b]]  ;;  %v4146_v44 = vld [vmem:[#allocation11 + $0x98] sm:$0xff] }
  0x74   :  { %s3996_s2 = sld [smem:[#allocation5 + $0x1c]]  ;;  %1041 = vmatpush.msrb.mxu3 %v4146_v44  ;;  %1003 = vmatpush.msrb.mxu1 %v4182_v57 }
  0x75   :  { %p295_p4 = scmp.gt.s32.totalorder %s3022_s16, 0  ;;  %p3023_p5 = scmp.lt.s32.totalorder %s3022_s16, 15 }
  0x76   :  { %p303_p6 = scmp.gt.s32.totalorder %s3028_s18, 0  ;;  %p3029_p7 = scmp.lt.s32.totalorder %s3028_s18, 15  ;;  %1042 = vmatpush.msrb.mxu3 %v4174_v55 }
  0x77   :  { %s5724_s16 = smov (!%p295_p4, %s3022_s16), 0  ;;  %p311_p8 = scmp.gt.s32.totalorder %s3034_s19, 0 }
  0x78   :  { %s5726_s16 = smov (!%p3023_p5, %s5724_s16), 15  ;;  %s5728_s18 = smov (!%p303_p6, %s3028_s18), 0 }
  0x79   :  { %s299_s23 = scalar_lea.vmem [#allocation6], %s5726_s16  ;;  %s5730_s18 = smov (!%p3029_p7, %s5728_s18), 15 }
  0x7a   :  { %v300_v45 = vld [vmem:[%s299_s23] sm:$0x1]  ;;  %s312_s24 = scalar_select %p311_p8, %s3034_s19, 0 }
  0x7b   :  { %301 = vst [vmem:[#allocation2 + $0x17] sm:$0x1] %v300_v45  ;;  %p3035_p9 = scmp.lt.s32.totalorder %s3034_s19, 15  ;;  %s307_s25 = scalar_lea.vmem [#allocation6], %s5730_s18 }
  0x7c   :  { %v308_v46 = vld [vmem:[%s307_s25] sm:$0x1]  ;;  %p319_p10 = scmp.gt.s32.totalorder %s3040_s21, 0  ;;  %p3041_p11 = scmp.lt.s32.totalorder %s3040_s21, 15 }
  0x7d   :  { %309 = vst [vmem:[#allocation2 + $0x18] sm:$0x1] %v308_v46  ;;  %s5732_s24 = smov (!%p3035_p9, %s312_s24), 15  ;;  %p327_p12 = scmp.gt.s32.totalorder %s3994_s22, 0 }
  0x7e   :  { %s5734_s21 = smov (!%p319_p10, %s3040_s21), 0  ;;  %s315_s5 = scalar_lea.vmem [#allocation6], %s5732_s24 }
  0x7f   :  { %v316_v47 = vld [vmem:[%s315_s5] sm:$0x1]  ;;  %s5736_s21 = smov (!%p3041_p11, %s5734_s21), 15  ;;  %p3047_p13 = scmp.lt.s32.totalorder %s3994_s22, 15 }
  0x80   :  { %317 = vst [vmem:[#allocation2 + $0x19] sm:$0x1] %v316_v47  ;;  %s328_s28 = scalar_select %p327_p12, %s3994_s22, 0 }
  0x81   :  { %s323_s29 = scalar_lea.vmem [#allocation6], %s5736_s21  ;;  %p335_p0 = scmp.gt.s32.totalorder %s3996_s2, 0 }
  0x82   :  { %v624_v48 = vld [vmem:[#allocation2 + $0x10] sm:$0xff]  ;;  %v324_v49 = vld [vmem:[%s323_s29] sm:$0x1]  ;;  %p3053_p1 = scmp.lt.s32.totalorder %s3996_s2, 15  ;;  %s5738_s28 = smov (!%p3047_p13, %s328_s28), 15 }
  0x83   :  { %726 = vmatmul.f32.gmra.mxu0 %v624_v48  ;;  %767 = vmatmul.f32.gmra.mxu1 %v624_v48  ;;  %325 = vst [vmem:[#allocation2 + $0x1a] sm:$0x1] %v324_v49  ;;  %s336_s1 = scalar_select %p335_p0, %s3996_s2, 0 }
  0x84   :  { %808 = vmatmul.f32.gmra.mxu2 %v624_v48  ;;  %849 = vmatmul.f32.gmra.mxu3 %v624_v48  ;;  %s3058_s30 = sld [smem:[#allocation5 + $0x1d]]  ;;  %s331_s9 = scalar_lea.vmem [#allocation6], %s5738_s28 }
  0x85   :  { %v332_v58 = vld [vmem:[%s331_s9] sm:$0x1]  ;;  %s5740_s1 = smov (!%p3053_p1, %s336_s1), 15  ;;  %s3064_s10 = sld [smem:[#allocation5 + $0x1e]] }
  0x86   :  { %333 = vst [vmem:[#allocation2 + $0x1b] sm:$0x1] %v332_v58  ;;  %s3070_s11 = sld [smem:[#allocation5 + $0x1f]]  ;;  %s339_s3 = scalar_lea.vmem [#allocation6], %s5740_s1  ;;  %v4184_v58 = vld [vmem:[#allocation11 + $0x58] sm:$0xff] }
  0x87   :  { %v340_v59 = vld [vmem:[%s339_s3] sm:$0x1]  ;;  %s3076_s12 = sld [smem:[#allocation5 + $0x20]]  ;;  %1043 = vmatpush.msrb.mxu3 %v4184_v58 }
  0x88   :  { %341 = vst [vmem:[#allocation2 + $0x1c] sm:$0x1] %v340_v59  ;;  %s4006_s6 = sld [smem:[#allocation5 + $0x21]]  ;;  %v4190_v59 = vld [vmem:[#allocation11 + $0x10] sm:$0xff] }
  0x89   :  { %s4008_s13 = sld [smem:[#allocation5 + $0x22]]  ;;  %1025 = vmatpush.msrb.mxu2 %v4190_v59 }
  0x8a   :  { %p343_p2 = scmp.gt.s32.totalorder %s3058_s30, 0  ;;  %p3059_p3 = scmp.lt.s32.totalorder %s3058_s30, 15 }
  0x8b   :  { %p351_p4 = scmp.gt.s32.totalorder %s3064_s10, 0  ;;  %p3065_p5 = scmp.lt.s32.totalorder %s3064_s10, 15 }
  0x8c   :  { %s5742_s30 = smov (!%p343_p2, %s3058_s30), 0  ;;  %p359_p6 = scmp.gt.s32.totalorder %s3070_s11, 0 }
  0x8d   :  { %s5744_s30 = smov (!%p3059_p3, %s5742_s30), 15  ;;  %s5746_s10 = smov (!%p351_p4, %s3064_s10), 0 }
  0x8e   :  { %s347_s0 = scalar_lea.vmem [#allocation6], %s5744_s30  ;;  %s5748_s10 = smov (!%p3065_p5, %s5746_s10), 15 }
  0x8f   :  { %v348_v60 = vld [vmem:[%s347_s0] sm:$0x1]  ;;  %s360_s14 = scalar_select %p359_p6, %s3070_s11, 0 }
  0x90   :  { %349 = vst [vmem:[#allocation2 + $0x1d] sm:$0x1] %v348_v60  ;;  %p3071_p7 = scmp.lt.s32.totalorder %s3070_s11, 15  ;;  %s355_s15 = scalar_lea.vmem [#allocation6], %s5748_s10  ;;  %v4192_v60 = vld [vmem:[#allocation11 + $0x20] sm:$0xff] }
  0x91   :  { %v356_v61 = vld [vmem:[%s355_s15] sm:$0x1]  ;;  %p367_p8 = scmp.gt.s32.totalorder %s3076_s12, 0  ;;  %p3077_p9 = scmp.lt.s32.totalorder %s3076_s12, 15  ;;  %984 = vmatpush.msrb.mxu0 %v4192_v60 }
  0x92   :  { %357 = vst [vmem:[#allocation2 + $0x1e] sm:$0x1] %v356_v61  ;;  %s5750_s14 = smov (!%p3071_p7, %s360_s14), 15  ;;  %p375_p10 = scmp.gt.s32.totalorder %s4006_s6, 0  ;;  %v4194_v61 = vld [vmem:[#allocation11 + $0x28] sm:$0xff] }
  0x93   :  { %s5752_s12 = smov (!%p367_p8, %s3076_s12), 0  ;;  %s363_s16 = scalar_lea.vmem [#allocation6], %s5750_s14  ;;  %1004 = vmatpush.msrb.mxu1 %v4194_v61 }
  0x94   :  { %v364_v62 = vld [vmem:[%s363_s16] sm:$0x1]  ;;  %s5754_s12 = smov (!%p3077_p9, %s5752_s12), 15  ;;  %p3083_p11 = scmp.lt.s32.totalorder %s4006_s6, 15 }
  0x95   :  { %365 = vst [vmem:[#allocation2 + $0x1f] sm:$0x1] %v364_v62  ;;  %s376_s17 = scalar_select %p375_p10, %s4006_s6, 0  ;;  %v4199_v62 = vld [vmem:[#allocation11 + $0x38] sm:$0xff] }
  0x96   :  { %s371_s18 = scalar_lea.vmem [#allocation6], %s5754_s12  ;;  %p383_p12 = scmp.gt.s32.totalorder %s4008_s13, 0  ;;  %1044 = vmatpush.msrb.mxu3 %v4199_v62 }
  0x97   :  { %v372_v63 = vld [vmem:[%s371_s18] sm:$0x1]  ;;  %p3089_p13 = scmp.lt.s32.totalorder %s4008_s13, 15  ;;  %s5756_s17 = smov (!%p3083_p11, %s376_s17), 15 }
  0x98   :  { %373 = vst [vmem:[#allocation2 + $0x20] sm:$0x1] %v372_v63  ;;  %s5758_s13 = smov (!%p383_p12, %s4008_s13), 0  ;;  %s4016_s19 = sld [smem:[#allocation5 + $0x23]]  ;;  %v4201_v63 = vld [vmem:[#allocation11] sm:$0xff] }
  0x99   :  { %s379_s20 = scalar_lea.vmem [#allocation6], %s5756_s17  ;;  %s5760_s13 = smov (!%p3089_p13, %s5758_s13), 15  ;;  %985 = vmatpush.msrb.mxu0 %v4201_v63 }
  0x9a   :  { %v380_v0 = vld [vmem:[%s379_s20] sm:$0x1]  ;;  %s4018_s21 = sld [smem:[#allocation5 + $0x24]]  ;;  %s387_s2 = scalar_lea.vmem [#allocation6], %s5760_s13 }
  0x9b   :  { %381 = vst [vmem:[#allocation2 + $0x21] sm:$0x1] %v380_v0  ;;  %s4020_s22 = sld [smem:[#allocation5 + $0x25]]  ;;  %v388_v2 = vld [vmem:[%s387_s2] sm:$0x1]  ;;  %v4203_v0 = vld [vmem:[#allocation11 + $0x8] sm:$0xff] }
  0x9c   :  { %v625_v1 = vld [vmem:[#allocation2 + $0x18] sm:$0xff]  ;;  %s4022_s23 = sld [smem:[#allocation5 + $0x26]]  ;;  %389 = vst [vmem:[#allocation2 + $0x22] sm:$0x1] %v388_v2  ;;  %1005 = vmatpush.msrb.mxu1 %v4203_v0 }
  0x9d   :  { %729 = vmatmul.f32.gmra.mxu0 %v625_v1  ;;  %770 = vmatmul.f32.gmra.mxu1 %v625_v1  ;;  %s4024_s24 = sld [smem:[#allocation5 + $0x27]] }
  0x9e   :  { %811 = vmatmul.f32.gmra.mxu2 %v625_v1  ;;  %852 = vmatmul.f32.gmra.mxu3 %v625_v1  ;;  %p391_p0 = scmp.gt.s32.totalorder %s4016_s19, 0  ;;  %p3095_p1 = scmp.lt.s32.totalorder %s4016_s19, 15  ;;  %v4209_v1 = vld [vmem:[#allocation11 + $0x18] sm:$0xff] }
  0x9f   :  { %s4048_s25 = sld [smem:[#allocation5 + $0x28]]  ;;  %1045 = vmatpush.msrb.mxu3 %v4209_v1 }
  0xa0   :  { %s392_s5 = scalar_select %p391_p0, %s4016_s19, 0 }
  0xa1   :  { %p399_p2 = scmp.gt.s32.totalorder %s4018_s21, 0  ;;  %p3101_p3 = scmp.lt.s32.totalorder %s4018_s21, 15 }
  0xa2   :  { %s5762_s5 = smov (!%p3095_p1, %s392_s5), 15  ;;  %p407_p4 = scmp.gt.s32.totalorder %s4020_s22, 0 }
  0xa3   :  { %s5764_s21 = smov (!%p399_p2, %s4018_s21), 0  ;;  %s395_s28 = scalar_lea.vmem [#allocation6], %s5762_s5 }
  0xa4   :  { %v396_v11 = vld [vmem:[%s395_s28] sm:$0x1]  ;;  %s5766_s21 = smov (!%p3101_p3, %s5764_s21), 15  ;;  %p3107_p5 = scmp.lt.s32.totalorder %s4020_s22, 15 }
  0xa5   :  { %397 = vst [vmem:[#allocation2 + $0x23] sm:$0x1] %v396_v11  ;;  %s408_s29 = scalar_select %p407_p4, %s4020_s22, 0 }
  0xa6   :  { %s403_s1 = scalar_lea.vmem [#allocation6], %s5766_s21  ;;  %p415_p6 = scmp.gt.s32.totalorder %s4022_s23, 0 }
  0xa7   :  { %v404_v12 = vld [vmem:[%s403_s1] sm:$0x1]  ;;  %p3113_p7 = scmp.lt.s32.totalorder %s4022_s23, 15  ;;  %s5768_s29 = smov (!%p3107_p5, %s408_s29), 15 }
  0xa8   :  { %405 = vst [vmem:[#allocation2 + $0x24] sm:$0x1] %v404_v12  ;;  %s5770_s23 = smov (!%p415_p6, %s4022_s23), 0  ;;  %p423_p8 = scmp.gt.s32.totalorder %s4024_s24, 0 }
  0xa9   :  { %s411_s30 = scalar_lea.vmem [#allocation6], %s5768_s29  ;;  %s5772_s23 = smov (!%p3113_p7, %s5770_s23), 15 }
  0xaa   :  { %v412_v13 = vld [vmem:[%s411_s30] sm:$0x1]  ;;  %s424_s9 = scalar_select %p423_p8, %s4024_s24, 0 }
  0xab   :  { %413 = vst [vmem:[#allocation2 + $0x25] sm:$0x1] %v412_v13  ;;  %p3119_p9 = scmp.lt.s32.totalorder %s4024_s24, 15  ;;  %s419_s10 = scalar_lea.vmem [#allocation6], %s5772_s23 }
  0xac   :  { %v420_v14 = vld [vmem:[%s419_s10] sm:$0x1]  ;;  %p431_p10 = scmp.gt.s32.totalorder %s4048_s25, 0  ;;  %p3125_p11 = scmp.lt.s32.totalorder %s4048_s25, 15 }
  0xad   :  { %421 = vst [vmem:[#allocation2 + $0x26] sm:$0x1] %v420_v14  ;;  %s5774_s9 = smov (!%p3119_p9, %s424_s9), 15  ;;  %s3130_s11 = sld [smem:[#allocation5 + $0x29]] }
  0xae   :  { %s5776_s25 = smov (!%p431_p10, %s4048_s25), 0  ;;  %s427_s3 = scalar_lea.vmem [#allocation6], %s5774_s9 }
  0xaf   :  { %v428_v15 = vld [vmem:[%s427_s3] sm:$0x1]  ;;  %s5778_s25 = smov (!%p3125_p11, %s5776_s25), 15  ;;  %s3136_s12 = sld [smem:[#allocation5 + $0x2a]] }
  0xb0   :  { %429 = vst [vmem:[#allocation2 + $0x27] sm:$0x1] %v428_v15  ;;  %s4072_s6 = sld [smem:[#allocation5 + $0x2b]]  ;;  %s435_s13 = scalar_lea.vmem [#allocation6], %s5778_s25 }
  0xb1   :  { %v436_v16 = vld [vmem:[%s435_s13] sm:$0x1]  ;;  %s4074_s0 = sld [smem:[#allocation5 + $0x2c]] }
  0xb2   :  { %437 = vst [vmem:[#allocation2 + $0x28] sm:$0x1] %v436_v16  ;;  %s4076_s14 = sld [smem:[#allocation5 + $0x2d]]  ;;  %v900_v16 = vld [vmem:[#allocation12] sm:$0xff] }
  0xb3   :  { %p439_p12 = scmp.gt.s32.totalorder %s3130_s11, 0  ;;  %p3131_p13 = scmp.lt.s32.totalorder %s3130_s11, 15 }
  0xb4   :  { %s4078_s15 = sld [smem:[#allocation5 + $0x2e]] }
  0xb5   :  { %s5780_s11 = smov (!%p439_p12, %s3130_s11), 0  ;;  %p447_p0 = scmp.gt.s32.totalorder %s3136_s12, 0 }
  0xb6   :  { %p3137_p1 = scmp.lt.s32.totalorder %s3136_s12, 15  ;;  %s5782_s11 = smov (!%p3131_p13, %s5780_s11), 15 }
  0xb7   :  { %v626_v17 = vld [vmem:[#allocation2 + $0x20] sm:$0xff]  ;;  %s5784_s12 = smov (!%p447_p0, %s3136_s12), 0  ;;  %p455_p2 = scmp.gt.s32.totalorder %s4072_s6, 0 }
  0xb8   :  { %732 = vmatmul.f32.gmra.mxu0 %v626_v17  ;;  %773 = vmatmul.f32.gmra.mxu1 %v626_v17  ;;  %s443_s16 = scalar_lea.vmem [#allocation6], %s5782_s11  ;;  %s5786_s12 = smov (!%p3137_p1, %s5784_s12), 15 }
  0xb9   :  { %814 = vmatmul.f32.gmra.mxu2 %v626_v17  ;;  %855 = vmatmul.f32.gmra.mxu3 %v626_v17  ;;  %v444_v18 = vld [vmem:[%s443_s16] sm:$0x1]  ;;  %s456_s17 = scalar_select %p455_p2, %s4072_s6, 0 }
  0xba   :  { %445 = vst [vmem:[#allocation2 + $0x29] sm:$0x1] %v444_v18  ;;  %p3143_p3 = scmp.lt.s32.totalorder %s4072_s6, 15  ;;  %s451_s18 = scalar_lea.vmem [#allocation6], %s5786_s12 }
  0xbb   :  { %v452_v19 = vld [vmem:[%s451_s18] sm:$0x1]  ;;  %p463_p4 = scmp.gt.s32.totalorder %s4074_s0, 0  ;;  %p3149_p5 = scmp.lt.s32.totalorder %s4074_s0, 15 }
  0xbc   :  { %453 = vst [vmem:[#allocation2 + $0x2a] sm:$0x1] %v452_v19  ;;  %s5788_s17 = smov (!%p3143_p3, %s456_s17), 15  ;;  %p471_p6 = scmp.gt.s32.totalorder %s4076_s14, 0 }
  0xbd   :  { %s464_s19 = scalar_select %p463_p4, %s4074_s0, 0 }
  0xbe   :  { %s459_s20 = scalar_lea.vmem [#allocation6], %s5788_s17  ;;  %p3155_p7 = scmp.lt.s32.totalorder %s4076_s14, 15 }
  0xbf   :  { %v460_v28 = vld [vmem:[%s459_s20] sm:$0x1]  ;;  %s5790_s19 = smov (!%p3149_p5, %s464_s19), 15  ;;  %p479_p8 = scmp.gt.s32.totalorder %s4078_s15, 0 }
  0xc0   :  { %461 = vst [vmem:[#allocation2 + $0x2b] sm:$0x1] %v460_v28  ;;  %s472_s21 = scalar_select %p471_p6, %s4076_s14, 0 }
  0xc1   :  { %s467_s22 = scalar_lea.vmem [#allocation6], %s5790_s19  ;;  %p3161_p9 = scmp.lt.s32.totalorder %s4078_s15, 15 }
  0xc2   :  { %v468_v29 = vld [vmem:[%s467_s22] sm:$0x1]  ;;  %s5792_s21 = smov (!%p3155_p7, %s472_s21), 15  ;;  %s5794_s15 = smov (!%p479_p8, %s4078_s15), 0 }
  0xc3   :  { %469 = vst [vmem:[#allocation2 + $0x2c] sm:$0x1] %v468_v29  ;;  %s3166_s2 = sld [smem:[#allocation5 + $0x2f]]  ;;  %s475_s23 = scalar_lea.vmem [#allocation6], %s5792_s21 }
  0xc4   :  { %v476_v30 = vld [vmem:[%s475_s23] sm:$0x1]  ;;  %s5796_s15 = smov (!%p3161_p9, %s5794_s15), 15  ;;  %s3172_s24 = sld [smem:[#allocation5 + $0x30]] }
  0xc5   :  { %477 = vst [vmem:[#allocation2 + $0x2d] sm:$0x1] %v476_v30  ;;  %s3178_s25 = sld [smem:[#allocation5 + $0x31]]  ;;  %s483_s5 = scalar_lea.vmem [#allocation6], %s5796_s15 }
  0xc6   :  { %v484_v31 = vld [vmem:[%s483_s5] sm:$0x1]  ;;  %s3184_s28 = sld [smem:[#allocation5 + $0x32]] }
  0xc7   :  { %485 = vst [vmem:[#allocation2 + $0x2e] sm:$0x1] %v484_v31  ;;  %s4118_s29 = sld [smem:[#allocation5 + $0x33]] }
  0xc8   :  { %s4120_s1 = sld [smem:[#allocation5 + $0x34]]  ;;  %v4227_v17 = vpop.f32.mrf.mxu0  ;;  %v4229_v18 = vpop.f32.mrf.mxu1 }
  0xc9   :  { %p487_p10 = scmp.gt.s32.totalorder %s3166_s2, 0  ;;  %p3167_p11 = scmp.lt.s32.totalorder %s3166_s2, 15 }
  0xca   :  { %p495_p12 = scmp.gt.s32.totalorder %s3172_s24, 0  ;;  %p3173_p13 = scmp.lt.s32.totalorder %s3172_s24, 15 }
  0xcb   :  { %s5798_s2 = smov (!%p487_p10, %s3166_s2), 0  ;;  %p503_p0 = scmp.gt.s32.totalorder %s3178_s25, 0 }
  0xcc   :  { %s5800_s2 = smov (!%p3167_p11, %s5798_s2), 15  ;;  %s5802_s24 = smov (!%p495_p12, %s3172_s24), 0 }
  0xcd   :  { %s491_s30 = scalar_lea.vmem [#allocation6], %s5800_s2  ;;  %s5804_s24 = smov (!%p3173_p13, %s5802_s24), 15 }
  0xce   :  { %v492_v32 = vld [vmem:[%s491_s30] sm:$0x1]  ;;  %s504_s9 = scalar_select %p503_p0, %s3178_s25, 0 }
  0xcf   :  { %493 = vst [vmem:[#allocation2 + $0x2f] sm:$0x1] %v492_v32  ;;  %p3179_p1 = scmp.lt.s32.totalorder %s3178_s25, 15  ;;  %s499_s10 = scalar_lea.vmem [#allocation6], %s5804_s24  ;;  %v4231_v19 = vpop.f32.mrf.mxu2  ;;  %v4233_v28 = vpop.f32.mrf.mxu3 }
  0xd0   :  { %v500_v33 = vld [vmem:[%s499_s10] sm:$0x1]  ;;  %p511_p2 = scmp.gt.s32.totalorder %s3184_s28, 0  ;;  %p3185_p3 = scmp.lt.s32.totalorder %s3184_s28, 15 }
  0xd1   :  { %501 = vst [vmem:[#allocation2 + $0x30] sm:$0x1] %v500_v33  ;;  %s5806_s9 = smov (!%p3179_p1, %s504_s9), 15  ;;  %p519_p4 = scmp.gt.s32.totalorder %s4118_s29, 0 }
  0xd2   :  { %s5808_s28 = smov (!%p511_p2, %s3184_s28), 0  ;;  %s507_s11 = scalar_lea.vmem [#allocation6], %s5806_s9 }
  0xd3   :  { %v508_v34 = vld [vmem:[%s507_s11] sm:$0x1]  ;;  %s5810_s28 = smov (!%p3185_p3, %s5808_s28), 15  ;;  %p3191_p5 = scmp.lt.s32.totalorder %s4118_s29, 15 }
  0xd4   :  { %509 = vst [vmem:[#allocation2 + $0x31] sm:$0x1] %v508_v34  ;;  %s520_s3 = scalar_select %p519_p4, %s4118_s29, 0 }
  0xd5   :  { %s515_s12 = scalar_lea.vmem [#allocation6], %s5810_s28  ;;  %p527_p6 = scmp.gt.s32.totalorder %s4120_s1, 0 }
  0xd6   :  { %v627_v35 = vld [vmem:[#allocation2 + $0x28] sm:$0xff]  ;;  %v516_v36 = vld [vmem:[%s515_s12] sm:$0x1]  ;;  %p3197_p7 = scmp.lt.s32.totalorder %s4120_s1, 15  ;;  %s5812_s3 = smov (!%p3191_p5, %s520_s3), 15 }
  0xd7   :  { %735 = vmatmul.f32.gmra.mxu0 %v627_v35  ;;  %776 = vmatmul.f32.gmra.mxu1 %v627_v35  ;;  %517 = vst [vmem:[#allocation2 + $0x32] sm:$0x1] %v516_v36  ;;  %s528_s6 = scalar_select %p527_p6, %s4120_s1, 0 }
  0xd8   :  { %817 = vmatmul.f32.gmra.mxu2 %v627_v35  ;;  %858 = vmatmul.f32.gmra.mxu3 %v627_v35  ;;  %s3202_s13 = sld [smem:[#allocation5 + $0x35]]  ;;  %s523_s0 = scalar_lea.vmem [#allocation6], %s5812_s3 }
  0xd9   :  { %v524_v45 = vld [vmem:[%s523_s0] sm:$0x1]  ;;  %s5814_s6 = smov (!%p3197_p7, %s528_s6), 15  ;;  %s3208_s14 = sld [smem:[#allocation5 + $0x36]] }
  0xda   :  { %525 = vst [vmem:[#allocation2 + $0x33] sm:$0x1] %v524_v45  ;;  %s3214_s15 = sld [smem:[#allocation5 + $0x37]]  ;;  %s531_s16 = scalar_lea.vmem [#allocation6], %s5814_s6 }
  0xdb   :  { %v532_v46 = vld [vmem:[%s531_s16] sm:$0x1]  ;;  %s3220_s17 = sld [smem:[#allocation5 + $0x38]] }
  0xdc   :  { %533 = vst [vmem:[#allocation2 + $0x34] sm:$0x1] %v532_v46  ;;  %s4154_s18 = sld [smem:[#allocation5 + $0x39]] }
  0xdd   :  { %s4156_s19 = sld [smem:[#allocation5 + $0x3a]] }
  0xde   :  { %p535_p8 = scmp.gt.s32.totalorder %s3202_s13, 0  ;;  %p3203_p9 = scmp.lt.s32.totalorder %s3202_s13, 15 }
  0xdf   :  { %p543_p10 = scmp.gt.s32.totalorder %s3208_s14, 0  ;;  %p3209_p11 = scmp.lt.s32.totalorder %s3208_s14, 15 }
  0xe0   :  { %s5816_s13 = smov (!%p535_p8, %s3202_s13), 0  ;;  %p551_p12 = scmp.gt.s32.totalorder %s3214_s15, 0 }
  0xe1   :  { %s5818_s13 = smov (!%p3203_p9, %s5816_s13), 15  ;;  %s5820_s14 = smov (!%p543_p10, %s3208_s14), 0  ;;  %v4235_v29 = vpop.f32.mrf.mxu0  ;;  %v4237_v30 = vpop.f32.mrf.mxu1 }
  0xe2   :  { %s539_s20 = scalar_lea.vmem [#allocation6], %s5818_s13  ;;  %s5822_s14 = smov (!%p3209_p11, %s5820_s14), 15  ;;  %5491 = vst [vmem:[#allocation24_spill] sm:$0xff] %v4235_v29 }
  0xe3   :  { %v540_v47 = vld [vmem:[%s539_s20] sm:$0x1]  ;;  %s552_s21 = scalar_select %p551_p12, %s3214_s15, 0  ;;  %5492 = vst [vmem:[#allocation25_spill] sm:$0xff] %v4237_v30 }
  0xe4   :  { %541 = vst [vmem:[#allocation2 + $0x35] sm:$0x1] %v540_v47  ;;  %p3215_p13 = scmp.lt.s32.totalorder %s3214_s15, 15  ;;  %s547_s22 = scalar_lea.vmem [#allocation6], %s5822_s14 }
  0xe5   :  { %v548_v48 = vld [vmem:[%s547_s22] sm:$0x1]  ;;  %p559_p0 = scmp.gt.s32.totalorder %s3220_s17, 0  ;;  %p3221_p1 = scmp.lt.s32.totalorder %s3220_s17, 15 }
  0xe6   :  { %549 = vst [vmem:[#allocation2 + $0x36] sm:$0x1] %v548_v48  ;;  %s5824_s21 = smov (!%p3215_p13, %s552_s21), 15  ;;  %p567_p2 = scmp.gt.s32.totalorder %s4154_s18, 0 }
  0xe7   :  { %s5826_s17 = smov (!%p559_p0, %s3220_s17), 0  ;;  %s555_s2 = scalar_lea.vmem [#allocation6], %s5824_s21 }
  0xe8   :  { %v556_v49 = vld [vmem:[%s555_s2] sm:$0x1]  ;;  %s5828_s17 = smov (!%p3221_p1, %s5826_s17), 15  ;;  %p3227_p3 = scmp.lt.s32.totalorder %s4154_s18, 15  ;;  %v4239_v31 = vpop.f32.mrf.mxu2  ;;  %v4241_v32 = vpop.f32.mrf.mxu3 }
  0xe9   :  { %557 = vst [vmem:[#allocation2 + $0x37] sm:$0x1] %v556_v49  ;;  %s568_s23 = scalar_select %p567_p2, %s4154_s18, 0 }
  0xea   :  { %s563_s24 = scalar_lea.vmem [#allocation6], %s5828_s17  ;;  %p575_p4 = scmp.gt.s32.totalorder %s4156_s19, 0  ;;  %5493 = vst [vmem:[#allocation26_spill] sm:$0xff] %v4239_v31 }
  0xeb   :  { %v564_v50 = vld [vmem:[%s563_s24] sm:$0x1]  ;;  %p3233_p5 = scmp.lt.s32.totalorder %s4156_s19, 15  ;;  %s5830_s23 = smov (!%p3227_p3, %s568_s23), 15  ;;  %5494 = vst [vmem:[#allocation27_spill] sm:$0xff] %v4241_v32  ;;  %v4344_v32 = vld [vmem:[#allocation11 + $0x168] sm:$0xff] }
  0xec   :  { %565 = vst [vmem:[#allocation2 + $0x38] sm:$0x1] %v564_v50  ;;  %s5832_s19 = smov (!%p575_p4, %s4156_s19), 0  ;;  %s4164_s25 = sld [smem:[#allocation5 + $0x3b]] }
  0xed   :  { %s571_s5 = scalar_lea.vmem [#allocation6], %s5830_s23  ;;  %s5834_s19 = smov (!%p3233_p5, %s5832_s19), 15  ;;  %5525 = vst [vmem:[#allocation58_spill] sm:$0xff] %v4344_v32 }
  0xee   :  { %v572_v51 = vld [vmem:[%s571_s5] sm:$0x1]  ;;  %s4166_s28 = sld [smem:[#allocation5 + $0x3c]]  ;;  %s579_s29 = scalar_lea.vmem [#allocation6], %s5834_s19 }
  0xef   :  { %573 = vst [vmem:[#allocation2 + $0x39] sm:$0x1] %v572_v51  ;;  %v580_v53 = vld [vmem:[%s579_s29] sm:$0x1]  ;;  %s4168_s1 = sld [smem:[#allocation5 + $0x3d]]  ;;  %s2801_s20 = sshll.u32 %s5403_s8, 4  ;;  %s2802_s20 = int_to_ptr.hbm [resolvable:$true] %s2801_s20 }
  0xf0   :  { %v628_v52 = vld [vmem:[#allocation2 + $0x30] sm:$0xff]  ;;  %581 = vst [vmem:[#allocation2 + $0x3a] sm:$0x1] %v580_v53  ;;  %s4170_s30 = sld [smem:[#allocation5 + $0x3e]]  ;;  %s3787_s8 = smov [#allocation15]  }
  0xf1   :  { %738 = vmatmul.f32.gmra.mxu0 %v628_v52  ;;  %779 = vmatmul.f32.gmra.mxu1 %v628_v52  ;;  %s4186_s9 = sld [smem:[#allocation5 + $0x3f]]  ;;  %s2786_s21 = sshll.u32 %s3787_s8, 4  ;;  %s2787_s21 = int_to_ptr.vmem [resolvable:$true] %s2786_s21 }
  0xf2   :  { %820 = vmatmul.f32.gmra.mxu2 %v628_v52  ;;  %861 = vmatmul.f32.gmra.mxu3 %v628_v52  ;;  %p583_p6 = scmp.gt.s32.totalorder %s4164_s25, 0  ;;  %p3239_p7 = scmp.lt.s32.totalorder %s4164_s25, 15 }
  0xf3   :  { %s2788_s23 = sshll.u32 %s5402_s7, 4  ;;  %s2789_s23 = int_to_ptr.hbm [resolvable:$true] %s2788_s23 }
  0xf4   :  { %s584_s10 = scalar_select %p583_p6, %s4164_s25, 0 }
  0xf5   :  { %p591_p8 = scmp.gt.s32.totalorder %s4166_s28, 0  ;;  %p3245_p9 = scmp.lt.s32.totalorder %s4166_s28, 15 }
  0xf6   :  { %s5836_s10 = smov (!%p3239_p7, %s584_s10), 15  ;;  %p599_p10 = scmp.gt.s32.totalorder %s4168_s1, 0 }
  0xf7   :  { %s5838_s28 = smov (!%p591_p8, %s4166_s28), 0  ;;  %s587_s11 = scalar_lea.vmem [#allocation6], %s5836_s10 }
  0xf8   :  { %v588_v2 = vld [vmem:[%s587_s11] sm:$0x1]  ;;  %s5840_s28 = smov (!%p3245_p9, %s5838_s28), 15  ;;  %p3251_p11 = scmp.lt.s32.totalorder %s4168_s1, 15 }
  0xf9   :  { %589 = vst [vmem:[#allocation2 + $0x3b] sm:$0x1] %v588_v2  ;;  %s600_s3 = scalar_select %p599_p10, %s4168_s1, 0 }
  0xfa   :  { %s595_s12 = scalar_lea.vmem [#allocation6], %s5840_s28  ;;  %p607_p12 = scmp.gt.s32.totalorder %s4170_s30, 0 }
  0xfb   :  { %v596_v11 = vld [vmem:[%s595_s12] sm:$0x1]  ;;  %p3257_p13 = scmp.lt.s32.totalorder %s4170_s30, 15  ;;  %s5842_s3 = smov (!%p3251_p11, %s600_s3), 15 }
  0xfc   :  { %597 = vst [vmem:[#allocation2 + $0x3c] sm:$0x1] %v596_v11  ;;  %s5844_s30 = smov (!%p607_p12, %s4170_s30), 0  ;;  %p615_p0 = scmp.gt.s32.totalorder %s4186_s9, 0 }
  0xfd   :  { %s603_s6 = scalar_lea.vmem [#allocation6], %s5842_s3  ;;  %s5846_s30 = smov (!%p3257_p13, %s5844_s30), 15 }
  0xfe   :  { %v604_v12 = vld [vmem:[%s603_s6] sm:$0x1]  ;;  %s616_s13 = scalar_select %p615_p0, %s4186_s9, 0 }
  0xff   :  { %605 = vst [vmem:[#allocation2 + $0x3d] sm:$0x1] %v604_v12  ;;  %p3263_p1 = scmp.lt.s32.totalorder %s4186_s9, 15  ;;  %s611_s0 = scalar_lea.vmem [#allocation6], %s5846_s30 }
 0x100   :  { %v612_v13 = vld [vmem:[%s611_s0] sm:$0x1]  ;;  %v4243_v33 = vpop.f32.mrf.mxu0  ;;  %v4245_v34 = vpop.f32.mrf.mxu1 }
 0x101   :  { %613 = vst [vmem:[#allocation2 + $0x3e] sm:$0x1] %v612_v13  ;;  %s5848_s13 = smov (!%p3263_p1, %s616_s13), 15 }
 0x102   :  { %s619_s14 = scalar_lea.vmem [#allocation6], %s5848_s13  ;;  %5495 = vst [vmem:[#allocation28_spill] sm:$0xff] %v4243_v33  ;;  %v4342_v33 = vld [vmem:[#allocation11 + $0x160] sm:$0xff] }
 0x103   :  { %v620_v14 = vld [vmem:[%s619_s14] sm:$0x1]  ;;  %5496 = vst [vmem:[#allocation29_spill] sm:$0xff] %v4245_v34  ;;  %v4338_v34 = vld [vmem:[#allocation11 + $0x198] sm:$0xff] }
 0x104   :  { %621 = vst [vmem:[#allocation2 + $0x3f] sm:$0x1] %v620_v14 }
 0x105   :  { %5523 = vst [vmem:[#allocation56_spill] sm:$0xff] %v4338_v34 }
 0x106   :  { %5524 = vst [vmem:[#allocation57_spill] sm:$0xff] %v4342_v33 }
 0x107   :  { %v4247_v35 = vpop.f32.mrf.mxu2  ;;  %v4249_v36 = vpop.f32.mrf.mxu3 }
 0x108   :  { %5497 = vst [vmem:[#allocation30_spill] sm:$0xff] %v4247_v35  ;;  %v4334_v35 = vld [vmem:[#allocation11 + $0x190] sm:$0xff] }
 0x109   :  { %5498 = vst [vmem:[#allocation31_spill] sm:$0xff] %v4249_v36  ;;  %v4332_v36 = vld [vmem:[#allocation11 + $0x188] sm:$0xff] }
 0x10a   :  { %5521 = vst [vmem:[#allocation54_spill] sm:$0xff] %v4332_v36 }
 0x10b   :  { %v629_v15 = vld [vmem:[#allocation2 + $0x38] sm:$0xff]  ;;  %5522 = vst [vmem:[#allocation55_spill] sm:$0xff] %v4334_v35 }
 0x10c   :  { %741 = vmatmul.f32.gmra.mxu0 %v629_v15  ;;  %782 = vmatmul.f32.gmra.mxu1 %v629_v15 }
 0x10d   :  { %823 = vmatmul.f32.gmra.mxu2 %v629_v15  ;;  %864 = vmatmul.f32.gmra.mxu3 %v629_v15 }
 0x114   :  { %986 = vmatmul.f32.vlgmr.msrb.gmra.mxu0 %v900_v16  ;;  %1006 = vmatmul.f32.vlgmr.msrb.gmra.mxu1 %v900_v16 }
 0x115   :  { %1026 = vmatmul.f32.vlgmr.msrb.gmra.mxu2 %v900_v16  ;;  %1046 = vmatmul.f32.vlgmr.msrb.gmra.mxu3 %v900_v16 }
 0x11a   :  { %v4251_v45 = vpop.f32.mrf.mxu0  ;;  %v4253_v46 = vpop.f32.mrf.mxu1 }
 0x11b   :  { %5499 = vst [vmem:[#allocation32_spill] sm:$0xff] %v4251_v45  ;;  %v4330_v45 = vld [vmem:[#allocation11 + $0x180] sm:$0xff] }
 0x11c   :  { %5500 = vst [vmem:[#allocation33_spill] sm:$0xff] %v4253_v46  ;;  %v4326_v46 = vld [vmem:[#allocation11 + $0x1b8] sm:$0xff] }
 0x11d   :  { %5519 = vst [vmem:[#allocation52_spill] sm:$0xff] %v4326_v46 }
 0x11e   :  { %5520 = vst [vmem:[#allocation53_spill] sm:$0xff] %v4330_v45 }
 0x121   :  { %v4255_v47 = vpop.f32.mrf.mxu2  ;;  %v4257_v48 = vpop.f32.mrf.mxu3 }
 0x122   :  { %5501 = vst [vmem:[#allocation34_spill] sm:$0xff] %v4255_v47 }
 0x123   :  { %5502 = vst [vmem:[#allocation35_spill] sm:$0xff] %v4257_v48 }
 0x135   :  { %v4259_v49 = vpop.f32.mrf.mxu0  ;;  %v4261_v50 = vpop.f32.mrf.mxu1 }
 0x136   :  { %5503 = vst [vmem:[#allocation36_spill] sm:$0xff] %v4259_v49  ;;  %v4318_v49 = vld [vmem:[#allocation11 + $0x1b0] sm:$0xff] }
 0x137   :  { %5504 = vst [vmem:[#allocation37_spill] sm:$0xff] %v4261_v50  ;;  %v4283_v50 = vld [vmem:[#allocation11 + $0x1e0] sm:$0xff] }
 0x138   :  { %1205 = vmatpush.msra.mxu0 %v4283_v50 }
 0x13c   :  { %v4263_v51 = vpop.f32.mrf.mxu2  ;;  %v4265_v52 = vpop.f32.mrf.mxu3 }
 0x13d   :  { %5505 = vst [vmem:[#allocation38_spill] sm:$0xff] %v4263_v51  ;;  %v4285_v51 = vld [vmem:[#allocation11 + $0x1e8] sm:$0xff] }
 0x13e   :  { %5506 = vst [vmem:[#allocation39_spill] sm:$0xff] %v4265_v52  ;;  %v4287_v52 = vld [vmem:[#allocation11 + $0x1f0] sm:$0xff]  ;;  %1225 = vmatpush.msra.mxu1 %v4285_v51 }
 0x13f   :  { %1245 = vmatpush.msra.mxu2 %v4287_v52 }
 0x154   :  { %v4267_v53 = vpop.f32.mrf.mxu0  ;;  %v4269_v2 = vpop.f32.mrf.mxu1 }
 0x155   :  { %5507 = vst [vmem:[#allocation40_spill] sm:$0xff] %v4267_v53  ;;  %v4310_v53 = vld [vmem:[#allocation11 + $0x1d8] sm:$0xff] }
 0x156   :  { %5508 = vst [vmem:[#allocation41_spill] sm:$0xff] %v4269_v2  ;;  %v4306_v2 = vld [vmem:[#allocation11 + $0x1d0] sm:$0xff] }
 0x157   :  { %1246 = vmatpush.msra.mxu2 %v4306_v2 }
 0x159   :  { %1247 = vmatpush.msra.mxu2 %v4318_v49 }
 0x15b   :  { %v4271_v11 = vpop.f32.mrf.mxu2  ;;  %v4273_v12 = vpop.f32.mrf.mxu3  ;;  %1248 = vmatpush.msra.mxu2 %v4334_v35  ;;  %v4356_v35 = vld [vmem:[#allocation11 + $0x170] sm:$0xff] }
 0x15c   :  { %5509 = vst [vmem:[#allocation42_spill] sm:$0xff] %v4271_v11  ;;  %v694_v11 = vld [vmem:[%s5399_s4] sm:$0xf]  ;;  %s3786_s4 = smov [#allocation16]  }
 0x15d   :  { %5510 = vst [vmem:[#allocation43_spill] sm:$0xff] %v4273_v12  ;;  %v4304_v12 = vld [vmem:[#allocation11 + $0x1c8] sm:$0xff]  ;;  %v4320_v48 = vperm.slane %v694_v11, 0  ;;  %v4322_v47 = vperm.slane %v694_v11, 1  ;;  %1249 = vmatpush.msra.mxu2 %v4356_v35  ;;  %s2799_s17 = sshll.u32 %s3786_s4, 4  ;;  %s2800_s17 = int_to_ptr.vmem [resolvable:$true] %s2799_s17 }
 0x15e   :  { %1226 = vmatpush.msra.mxu1 %v4304_v12  ;;  %5528 = vst [vmem:[#allocation61_spill] sm:$0xff] %v4356_v35  ;;  %v4380_v35 = vld [vmem:[#allocation11 + $0x128] sm:$0xff] }
 0x15f   :  { %5517 = vst [vmem:[#allocation50_spill] sm:$0xff] %v4320_v48  ;;  %v722_v31 = vadd.f32 %v4227_v17, %v4320_v48  ;;  %v763_v30 = vadd.f32 %v4229_v18, %v4322_v47  ;;  %v4362_v17 = vld [vmem:[#allocation11 + $0x140] sm:$0xff]  ;;  %v4364_v18 = vld [vmem:[#allocation11 + $0x148] sm:$0xff]  ;;  %v4370_v48 = vld [vmem:[#allocation11 + $0x158] sm:$0xff] }
 0x160   :  { %5518 = vst [vmem:[#allocation51_spill] sm:$0xff] %v4322_v47 }
 0x16e   :  { %v4275_v13 = vpop.f32.mrf.mxu0  ;;  %v4277_v14 = vpop.f32.mrf.mxu1 }
 0x16f   :  { %5511 = vst [vmem:[#allocation44_spill] sm:$0xff] %v4275_v13  ;;  %v4294_v13 = vld [vmem:[#allocation11 + $0x1f8] sm:$0xff] }
 0x170   :  { %5512 = vst [vmem:[#allocation45_spill] sm:$0xff] %v4277_v14  ;;  %1265 = vmatpush.msra.mxu3 %v4294_v13 }
 0x172   :  { %1266 = vmatpush.msra.mxu3 %v4310_v53 }
 0x174   :  { %1267 = vmatpush.msra.mxu3 %v4326_v46 }
 0x175   :  { %v4279_v15 = vpop.f32.mrf.mxu2  ;;  %v4281_v16 = vpop.f32.mrf.mxu3 }
 0x176   :  { %5513 = vst [vmem:[#allocation46_spill] sm:$0xff] %v4279_v15  ;;  %1268 = vmatpush.msra.mxu3 %v4338_v34  ;;  %v4358_v34 = vld [vmem:[#allocation11 + $0x178] sm:$0xff] }
 0x177   :  { %5514 = vst [vmem:[#allocation47_spill] sm:$0xff] %v4281_v16  ;;  %v4302_v16 = vld [vmem:[#allocation11 + $0x1c0] sm:$0xff] }
 0x178   :  { %1206 = vmatpush.msra.mxu0 %v4302_v16  ;;  %5529 = vst [vmem:[#allocation62_spill] sm:$0xff] %v4358_v34  ;;  %1269 = vmatpush.msra.mxu3 %v4358_v34  ;;  %v4378_v34 = vld [vmem:[#allocation11 + $0x120] sm:$0xff] }
 0x17a   :  { %1270 = vmatpush.msra.mxu3 %v4370_v48 }
 0x17c   :  { %1271 = vmatpush.msra.mxu3 %v4036_v6 }
 0x17e   :  { %1272 = vmatpush.msra.mxu3 %v4046_v10 }
 0x180   :  { %1273 = vmatpush.msra.mxu3 %v4094_v23 }
 0x182   :  { %1274 = vmatpush.msra.mxu3 %v4105_v27 }
 0x184   :  { %1275 = vmatpush.msra.mxu3 %v4136_v40 }
 0x186   :  { %1276 = vmatpush.msra.mxu3 %v4146_v44 }
 0x188   :  { %1277 = vmatpush.msra.mxu3 %v4174_v55 }
 0x189   :  { %v4296_v14 = vpop.f32.mrf.mxu0  ;;  %v4298_v15 = vpop.f32.mrf.mxu1 }
 0x18a   :  { %5515 = vst [vmem:[#allocation48_spill] sm:$0xff] %v4296_v14  ;;  %v4316_v14 = vld [vmem:[#allocation11 + $0x1a8] sm:$0xff]  ;;  %1278 = vmatpush.msra.mxu3 %v4184_v58 }
 0x18b   :  { %5516 = vst [vmem:[#allocation49_spill] sm:$0xff] %v4298_v15  ;;  %v4314_v15 = vld [vmem:[#allocation11 + $0x1a0] sm:$0xff]  ;;  %1227 = vmatpush.msra.mxu1 %v4316_v14 }
 0x18c   :  { %1207 = vmatpush.msra.mxu0 %v4314_v15  ;;  %1279 = vmatpush.msra.mxu3 %v4199_v62 }
 0x18d   :  { %1228 = vmatpush.msra.mxu1 %v4332_v36 }
 0x18e   :  { %1208 = vmatpush.msra.mxu0 %v4330_v45  ;;  %1280 = vmatpush.msra.mxu3 %v4209_v1 }
 0x18f   :  { %1229 = vmatpush.msra.mxu1 %v4344_v32  ;;  %v4372_v32 = vperm.slane %v694_v11, 2 }
 0x190   :  { %v4350_v29 = vpop.f32.mrf.mxu2  ;;  %v4352_v45 = vpop.f32.mrf.mxu3  ;;  %1209 = vmatpush.msra.mxu0 %v4342_v33  ;;  %v4374_v33 = vperm.slane %v694_v11, 3  ;;  %1500 = vmatpush.msrb.mxu3 %v4294_v13 }
 0x191   :  { %5526 = vst [vmem:[#allocation59_spill] sm:$0xff] %v4350_v29  ;;  %v987_v36 = vpop.f32.mrf.mxu0  ;;  %v1007_v46 = vpop.f32.mrf.mxu1  ;;  %v4366_v29 = vld [vmem:[#allocation11 + $0x150] sm:$0xff]  ;;  %1230 = vmatpush.msra.mxu1 %v4364_v18  ;;  %v804_v11 = vadd.f32 %v4231_v19, %v4372_v32 }
 0x192   :  { %5527 = vst [vmem:[#allocation60_spill] sm:$0xff] %v4352_v45  ;;  %v1050_v45 = vadd.f32 %v987_v36, %v722_v31  ;;  %v1051_v47 = vadd.f32 %v1007_v46, %v763_v30  ;;  %1210 = vmatpush.msra.mxu0 %v4362_v17  ;;  %1250 = vmatpush.msra.mxu2 %v4366_v29  ;;  %v4382_v31 = vld [vmem:[#allocation11 + $0x130] sm:$0xff] }
 0x193   :  { %5530 = vst [vmem:[#allocation63_spill] sm:$0xff] %v4372_v32  ;;  %1231 = vmatpush.msra.mxu1 %v4380_v35  ;;  %v4388_v46 = vld [vmem:[#allocation11 + $0x110] sm:$0xff]  ;;  %1501 = vmatpush.msrb.mxu3 %v4310_v53 }
 0x194   :  { %5531 = vst [vmem:[#allocation64_spill] sm:$0xff] %v4374_v33  ;;  %v3268_v30 = vmul.f32 -1.442695, %v1050_v45  ;;  %v3269_v36 = vmul.f32 -1.442695, %v1051_v47  ;;  %1211 = vmatpush.msra.mxu0 %v4378_v34  ;;  %1251 = vmatpush.msra.mxu2 %v4382_v31  ;;  %v845_v45 = vadd.f32 %v4233_v28, %v4374_v33 }
 0x195   :  { %1232 = vmatpush.msra.mxu1 %v4034_v5 }
 0x196   :  { %3440 = vpow2.f32 %v3268_v30  ;;  %1212 = vmatpush.msra.mxu0 %v4028_v4  ;;  %1252 = vmatpush.msra.mxu2 %v4388_v46 }
 0x197   :  { %3442 = vpow2.f32 %v3269_v36  ;;  %1233 = vmatpush.msra.mxu1 %v4044_v9 }
 0x198   :  { %v1027_v47 = vpop.f32.mrf.mxu2  ;;  %v1047_v6 = vpop.f32.mrf.mxu3  ;;  %1213 = vmatpush.msra.mxu0 %v4042_v8  ;;  %1253 = vmatpush.msra.mxu2 %v4026_v3 }
 0x199   :  { %v1052_v4 = vadd.f32 %v1027_v47, %v804_v11  ;;  %v1053_v30 = vadd.f32 %v1047_v6, %v845_v45  ;;  %1234 = vmatpush.msra.mxu1 %v4089_v22  ;;  %v5533_v11 = vld [vmem:[#allocation53_spill] sm:$0xff]  ;;  %v5534_v45 = vld [vmem:[#allocation54_spill] sm:$0xff] }
 0x19a   :  { %1214 = vmatpush.msra.mxu0 %v4087_v21  ;;  %1254 = vmatpush.msra.mxu2 %v4038_v7 }
 0x19b   :  { %v3270_v5 = vmul.f32 -1.442695, %v1052_v4  ;;  %v3271_v19 = vmul.f32 -1.442695, %v1053_v30  ;;  %1235 = vmatpush.msra.mxu1 %v4103_v26  ;;  %v5535_v30 = vld [vmem:[#allocation55_spill] sm:$0xff] }
 0x19c   :  { %v3441_v10 = vpop.eup %3440  ;;  %1215 = vmatpush.msra.mxu0 %v4098_v25  ;;  %1255 = vmatpush.msra.mxu2 %v4085_v20 }
 0x19d   :  { %v3443_v8 = vpop.eup %3442  ;;  %v4408_v9 = vadd.f32 1.0, %v3441_v10  ;;  %3444 = vpow2.f32 %v3270_v5  ;;  %1236 = vmatpush.msra.mxu1 %v4131_v39  ;;  %v5536_v5 = vld [vmem:[#allocation56_spill] sm:$0xff] }
 0x19e   :  { %v4412_v3 = vadd.f32 1.0, %v3443_v8  ;;  %3446 = vpow2.f32 %v3271_v19  ;;  %1216 = vmatpush.msra.mxu0 %v4129_v38  ;;  %1256 = vmatpush.msra.mxu2 %v4096_v24  ;;  %v901_v8 = vld [vmem:[#allocation14] sm:$0xff] }
 0x19f   :  { %3448 = vrcp.f32 %v4408_v9  ;;  %1237 = vmatpush.msra.mxu1 %v4144_v43  ;;  %v5532_v43 = vld [vmem:[#allocation52_spill] sm:$0xff]  ;;  %vm1075_vm3 = vweird.f32 %v4408_v9  ;;  %v1079_v19 = vand.u32 2147483647, %v4408_v9  ;;  %v1081_v10 = vand.u32 2147483648, %v4408_v9 }
 0x1a0   :  { %3450 = vrcp.f32 %v4412_v3  ;;  %1217 = vmatpush.msra.mxu0 %v4140_v42  ;;  %1257 = vmatpush.msra.mxu2 %v4127_v37  ;;  %vm1090_vm1 = vweird.f32 %v4412_v3  ;;  %v1094_v28 = vand.u32 2147483647, %v4412_v3  ;;  %v1096_v36 = vand.u32 2147483648, %v4412_v3 }
 0x1a1   :  { %1238 = vmatpush.msra.mxu1 %v4182_v57  ;;  %1502 = vmatpush.msrb.mxu3 %v5532_v43  ;;  %vm1080_vm10 = vcmp.eq.f32.partialorder %v1079_v19, 8.507059e+37 }
 0x1a2   :  { %1218 = vmatpush.msra.mxu0 %v4180_v56  ;;  %1258 = vmatpush.msra.mxu2 %v4138_v41  ;;  %vm1095_vm7 = vcmp.eq.f32.partialorder %v1094_v28, 8.507059e+37 }
 0x1a3   :  { %v3445_v7 = vpop.eup %3444  ;;  %1239 = vmatpush.msra.mxu1 %v4194_v61  ;;  %1503 = vmatpush.msrb.mxu3 %v5536_v5 }
 0x1a4   :  { %v3447_v20 = vpop.eup %3446  ;;  %v4428_v21 = vadd.f32 1.0, %v3445_v7  ;;  %1219 = vmatpush.msra.mxu0 %v4192_v60  ;;  %1259 = vmatpush.msra.mxu2 %v4172_v54  ;;  %v5539_v7 = vld [vmem:[#allocation57_spill] sm:$0xff] }
 0x1a5   :  { %v4432_v22 = vpop.eup %3448  ;;  %v4434_v23 = vadd.f32 1.0, %v3447_v20  ;;  %1240 = vmatpush.msra.mxu1 %v4203_v0  ;;  %v5540_v20 = vld [vmem:[#allocation58_spill] sm:$0xff] }
 0x1a6   :  { %v4438_v24 = vpop.eup %3450  ;;  %v1071_v25 = vmul.f32 %v4432_v22, %v4408_v9  ;;  %3452 = vrcp.f32 %v4428_v21  ;;  %1220 = vmatpush.msra.mxu0 %v4201_v63  ;;  %1260 = vmatpush.msra.mxu2 %v4190_v59  ;;  %vm1076_vm2 = vweird.f32 %v4432_v22  ;;  %v1109_v9 = vand.u32 2147483647, %v4428_v21 }
 0x1a7   :  { %v1086_v26 = vmul.f32 %v4438_v24, %v4412_v3  ;;  %3454 = vrcp.f32 %v4434_v23  ;;  %1460 = vmatpush.msrb.mxu1 %v4285_v51  ;;  %vm1091_vm0 = vweird.f32 %v4438_v24  ;;  %v1111_v3 = vand.u32 2147483648, %v4428_v21  ;;  %vm4500_vm6 = vmor %vm1075_vm3, %vm1076_vm2 }
 0x1a8   :  { %v1072_v27 = vsub.f32 1.0, %v1071_v25  ;;  %1440 = vmatpush.msrb.mxu0 %v4283_v50  ;;  %1480 = vmatpush.msrb.mxu2 %v4287_v52  ;;  %vm4485_vm4 = vmor %vm1090_vm1, %vm1091_vm0  ;;  %vm1105_vm8 = vweird.f32 %v4428_v21  ;;  %vm1110_vm11 = vcmp.eq.f32.partialorder %v1109_v9, 8.507059e+37  ;;  %vm1120_vm13 = vweird.f32 %v4434_v23 }
 0x1a9   :  { %v1087_v37 = vsub.f32 1.0, %v1086_v26  ;;  %1461 = vmatpush.msrb.mxu1 %v4304_v12  ;;  %v1124_v19 = vand.u32 2147483647, %v4434_v23 }
 0x1aa   :  { %1441 = vmatpush.msrb.mxu0 %v4302_v16  ;;  %v1073_v38 = vmul.f32 %v4432_v22, %v1072_v27  ;;  %1481 = vmatpush.msrb.mxu2 %v4306_v2  ;;  %v5541_v27 = vld [vmem:[#allocation61_spill] sm:$0xff] }
 0x1ab   :  { %v1088_v39 = vmul.f32 %v4438_v24, %v1087_v37  ;;  %1462 = vmatpush.msrb.mxu1 %v4316_v14  ;;  %v5542_v37 = vld [vmem:[#allocation62_spill] sm:$0xff]  ;;  %vm1125_vm15 = vcmp.eq.f32.partialorder %v1124_v19, 8.507059e+37  ;;  %v4539_v19 = vld [vmem:[#allocation11 + $0x118] sm:$0xff] }
 0x1ac   :  { %v3453_v40 = vpop.eup %3452  ;;  %1442 = vmatpush.msrb.mxu0 %v4314_v15  ;;  %1482 = vmatpush.msrb.mxu2 %v4318_v49  ;;  %v1074_v47 = vadd.f32 %v4432_v22, %v1073_v38 }
 0x1ad   :  { %v1089_v41 = vadd.f32 %v4438_v24, %v1088_v39  ;;  %v1101_v42 = vmul.f32 %v3453_v40, %v4428_v21  ;;  %v4467_v44 = vpop.eup %3454  ;;  %1463 = vmatpush.msrb.mxu1 %v5534_v45  ;;  %vm1106_vm5 = vweird.f32 %v3453_v40  ;;  %1504 = vmatpush.msrb.mxu3 %v5542_v37  ;;  %v1097_v39 = vor.u32 1.1754944e-38, %v1096_v36 }
 0x1ae   :  { %1443 = vmatpush.msrb.mxu0 %v5533_v11  ;;  %v1116_v4 = vmul.f32 %v4467_v44, %v4434_v23  ;;  %1483 = vmatpush.msrb.mxu2 %v5535_v30  ;;  %vm1107_vm9 = vmor %vm1105_vm8, %vm1106_vm5  ;;  %vm1121_vm12 = vweird.f32 %v4467_v44 }
 0x1af   :  { %v1102_v6 = vsub.f32 1.0, %v1101_v42  ;;  %1464 = vmatpush.msrb.mxu1 %v5540_v20  ;;  %v1093_v25 = vsel %vm4485_vm4, %v4438_v24, %v1089_v41  ;;  %v1078_v24 = vsel %vm4500_vm6, %v4432_v22, %v1074_v47  ;;  %1505 = vmatpush.msrb.mxu3 %v4370_v48  ;;  %vm1122_vm14 = vmor %vm1120_vm13, %vm1121_vm12 }
 0x1b0   :  { %1444 = vmatpush.msrb.mxu0 %v5539_v7  ;;  %1484 = vmatpush.msrb.mxu2 %v5541_v27  ;;  %v1117_v42 = vsub.f32 1.0, %v1116_v4  ;;  %v1098_v36 = vsel %vm1095_vm7, %v1097_v39, %v1093_v25  ;;  %v1112_v4 = vor.u32 1.1754944e-38, %v1111_v3 }
 0x1b1   :  { %v1103_v26 = vmul.f32 %v3453_v40, %v1102_v6  ;;  %1465 = vmatpush.msrb.mxu1 %v4364_v18  ;;  %v1082_v6 = vor.u32 1.1754944e-38, %v1081_v10 }
 0x1b2   :  { %1445 = vmatpush.msrb.mxu0 %v4362_v17  ;;  %1485 = vmatpush.msrb.mxu2 %v4366_v29  ;;  %v1118_v47 = vmul.f32 %v4467_v44, %v1117_v42 }
 0x1b3   :  { %v1104_v41 = vadd.f32 %v3453_v40, %v1103_v26  ;;  %1466 = vmatpush.msrb.mxu1 %v4380_v35  ;;  %v1083_v21 = vsel %vm1080_vm10, %v1082_v6, %v1078_v24  ;;  %v1130_v26 = vmul.f32 %v1098_v36, %v901_v8  ;;  %v5546_v6 = vld [vmem:[#allocation24_spill] sm:$0xff]  ;;  %v5547_v36 = vld [vmem:[#allocation51_spill] sm:$0xff] }
 0x1b4   :  { %1446 = vmatpush.msrb.mxu0 %v4378_v34  ;;  %1486 = vmatpush.msrb.mxu2 %v4382_v31  ;;  %v1119_v3 = vadd.f32 %v4467_v44, %v1118_v47  ;;  %v4532_v47 = vld [vmem:[#allocation11 + $0x138] sm:$0xff] }
 0x1b5   :  { %v1108_v22 = vsel %vm1107_vm9, %v3453_v40, %v1104_v41  ;;  %v1126_v40 = vand.u32 2147483648, %v4434_v23  ;;  %v5545_v41 = vld [vmem:[#allocation50_spill] sm:$0xff]  ;;  %1506 = vmatpush.msrb.mxu3 %v4532_v47 }
 0x1b6   :  { %v1113_v28 = vsel %vm1110_vm11, %v1112_v4, %v1108_v22  ;;  %1487 = vmatpush.msrb.mxu2 %v4388_v46  ;;  %v1123_v9 = vsel %vm1122_vm14, %v4467_v44, %v1119_v3  ;;  %v725_v8 = vadd.f32 %v5546_v6, %v5545_v41  ;;  %v5548_v4 = vld [vmem:[#allocation25_spill] sm:$0xff]  ;;  %v4535_v3 = vld [vmem:[#allocation11 + $0x100] sm:$0xff]  ;;  %v4550_v6 = vld [vmem:[#allocation11 + $0xe8] sm:$0xff] }
 0x1b7   :  { %v1131_v10 = vmul.f32 %v1113_v28, %v1083_v21  ;;  %v1127_v38 = vor.u32 1.1754944e-38, %v1126_v40  ;;  %v766_v22 = vadd.f32 %v5548_v4, %v5547_v36  ;;  %v4537_v40 = vld [vmem:[#allocation11 + $0x108] sm:$0xff]  ;;  %1447 = vmatpush.msrb.mxu0 %v4535_v3  ;;  %1507 = vmatpush.msrb.mxu3 %v4539_v19  ;;  %v4582_v36 = vld [vmem:[#allocation11 + $0x80] sm:$0xff] }
 0x1b8   :  { %1467 = vmatpush.msrb.mxu1 %v4537_v40  ;;  %v4588_v41 = vld [vmem:[#allocation11 + $0x88] sm:$0xff] }
 0x1b9   :  { %v4518_v25 = vadd.f32 %v1131_v10, %v1130_v26  ;;  %v1128_v42 = vsel %vm1125_vm15, %v1127_v38, %v1123_v9  ;;  %v5549_v9 = vld [vmem:[#allocation26_spill] sm:$0xff] }
 0x1ba   :  { %v807_v38 = vadd.f32 %v5549_v9, %v4372_v32  ;;  %1468 = vmatpush.msrb.mxu1 %v4550_v6  ;;  %v4568_v9 = vld [vmem:[#allocation11 + $0xd8] sm:$0xff] }
 0x1bb   :  { %1136 = vst [vmem:[#allocation16] sm:$0xff] %v4518_v25  ;;  %3456 = vtanh.f32 %v4518_v25  ;;  %v4580_v32 = vld [vmem:[#allocation11 + $0xb8] sm:$0xff] }
 0x1bc   :  { %5551 = vst [vmem:[#allocation52_spill] sm:$0xff] %v4568_v9 }
 0x1c1   :  { %v3457_v39 = vpop.eup %3456 }
 0x1c2   :  { %v1134_v24 = vmul.f32 %v3457_v39, %v1128_v42  ;;  %v5550_v39 = vld [vmem:[#allocation27_spill] sm:$0xff] }
 0x1c3   :  { %v848_v42 = vadd.f32 %v5550_v39, %v4374_v33 }
 0x1c4   :  { %1135 = vst [vmem:[#allocation15] sm:$0xff] %v1134_v24  ;;  %1221 = vmatmul.f32.vlgmr.msra.gmra.mxu0 %v1134_v24  ;;  %1241 = vmatmul.f32.vlgmr.msra.gmra.mxu1 %v1134_v24 }
 0x1c5   :  { %1261 = vmatmul.f32.vlgmr.msra.gmra.mxu2 %v1134_v24  ;;  %1281 = vmatmul.f32.vlgmr.msra.gmra.mxu3 %v1134_v24  ;;  %v4548_v24 = vld [vmem:[#allocation11 + $0xe0] sm:$0xff] }
 0x1c6   :  { %1448 = vmatpush.msrb.mxu0 %v4548_v24 }
 0x241   :  { %v1222_v23 = vpop.f32.mrf.mxu0  ;;  %v1242_v21 = vpop.f32.mrf.mxu1 }
 0x242   :  { %v1285_v28 = vadd.f32 %v1222_v23, %v725_v8  ;;  %v1286_v44 = vadd.f32 %v1242_v21, %v766_v22  ;;  %v4552_v8 = vld [vmem:[#allocation11 + $0xf0] sm:$0xff]  ;;  %v4556_v23 = vld [vmem:[#allocation11 + $0xf8] sm:$0xff] }
 0x243   :  { %1488 = vmatpush.msrb.mxu2 %v4552_v8  ;;  %1508 = vmatpush.msrb.mxu3 %v4556_v23 }
 0x244   :  { %v3272_v26 = vmul.f32 -1.442695, %v1285_v28  ;;  %v3273_v10 = vmul.f32 -1.442695, %v1286_v44  ;;  %v4560_v44 = vld [vmem:[#allocation11 + $0xc0] sm:$0xff] }
 0x245   :  { %1449 = vmatpush.msrb.mxu0 %v4560_v44  ;;  %1509 = vmatpush.msrb.mxu3 %v4568_v9  ;;  %v4590_v9 = vld [vmem:[#allocation11 + $0x90] sm:$0xff] }
 0x246   :  { %3458 = vpow2.f32 %v3272_v26  ;;  %v4562_v26 = vld [vmem:[#allocation11 + $0xc8] sm:$0xff]  ;;  %5555 = vst [vmem:[#allocation56_spill] sm:$0xff] %v4590_v9 }
 0x247   :  { %3460 = vpow2.f32 %v3273_v10  ;;  %v4564_v10 = vld [vmem:[#allocation11 + $0xd0] sm:$0xff]  ;;  %1469 = vmatpush.msrb.mxu1 %v4562_v26  ;;  %1510 = vmatpush.msrb.mxu3 %v4580_v32 }
 0x248   :  { %v1262_v4 = vpop.f32.mrf.mxu2  ;;  %v1282_v22 = vpop.f32.mrf.mxu3  ;;  %1489 = vmatpush.msrb.mxu2 %v4564_v10 }
 0x249   :  { %v1287_v21 = vadd.f32 %v1262_v4, %v807_v38  ;;  %v1288_v28 = vadd.f32 %v1282_v22, %v848_v42  ;;  %v4572_v38 = vld [vmem:[#allocation11 + $0xa0] sm:$0xff]  ;;  %v4574_v42 = vld [vmem:[#allocation11 + $0xa8] sm:$0xff]  ;;  %v4578_v22 = vld [vmem:[#allocation11 + $0xb0] sm:$0xff] }
 0x24a   :  { %5552 = vst [vmem:[#allocation53_spill] sm:$0xff] %v4572_v38  ;;  %1450 = vmatpush.msrb.mxu0 %v4572_v38  ;;  %1470 = vmatpush.msrb.mxu1 %v4574_v42  ;;  %v4592_v38 = vld [vmem:[#allocation11 + $0x98] sm:$0xff] }
 0x24b   :  { %v3274_v39 = vmul.f32 -1.442695, %v1287_v21  ;;  %v3275_v33 = vmul.f32 -1.442695, %v1288_v28  ;;  %5553 = vst [vmem:[#allocation54_spill] sm:$0xff] %v4574_v42  ;;  %1490 = vmatpush.msrb.mxu2 %v4578_v22  ;;  %1511 = vmatpush.msrb.mxu3 %v4592_v38 }
 0x24c   :  { %v3459_v4 = vpop.eup %3458  ;;  %5554 = vst [vmem:[#allocation55_spill] sm:$0xff] %v4578_v22  ;;  %1451 = vmatpush.msrb.mxu0 %v4582_v36  ;;  %1471 = vmatpush.msrb.mxu1 %v4588_v41  ;;  %v4602_v22 = vld [vmem:[#allocation11 + $0x70] sm:$0xff] }
 0x24d   :  { %v3461_v21 = vpop.eup %3460  ;;  %v4584_v28 = vadd.f32 1.0, %v3459_v4  ;;  %3462 = vpow2.f32 %v3274_v39  ;;  %5556 = vst [vmem:[#allocation57_spill] sm:$0xff] %v4592_v38  ;;  %v4598_v4 = vld [vmem:[#allocation11 + $0x60] sm:$0xff]  ;;  %v4600_v39 = vld [vmem:[#allocation11 + $0x68] sm:$0xff]  ;;  %1491 = vmatpush.msrb.mxu2 %v4590_v9  ;;  %1512 = vmatpush.msrb.mxu3 %v4174_v55 }
 0x24e   :  { %v4594_v42 = vadd.f32 1.0, %v3461_v21  ;;  %3464 = vpow2.f32 %v3275_v33  ;;  %5557 = vst [vmem:[#allocation58_spill] sm:$0xff] %v4600_v39  ;;  %1452 = vmatpush.msrb.mxu0 %v4598_v4  ;;  %1472 = vmatpush.msrb.mxu1 %v4600_v39  ;;  %v4610_v33 = vld [vmem:[#allocation11 + $0x50] sm:$0xff] }
 0x24f   :  { %5558 = vst [vmem:[#allocation61_spill] sm:$0xff] %v4602_v22  ;;  %3466 = vrcp.f32 %v4584_v28  ;;  %1492 = vmatpush.msrb.mxu2 %v4602_v22  ;;  %1513 = vmatpush.msrb.mxu3 %v4184_v58  ;;  %vm1310_vm3 = vweird.f32 %v4584_v28 }
 0x250   :  { %3468 = vrcp.f32 %v4594_v42  ;;  %1453 = vmatpush.msrb.mxu0 %v4180_v56  ;;  %1473 = vmatpush.msrb.mxu1 %v4182_v57  ;;  %vm1325_vm1 = vweird.f32 %v4594_v42 }
 0x251   :  { %1493 = vmatpush.msrb.mxu2 %v4610_v33  ;;  %1514 = vmatpush.msrb.mxu3 %v4199_v62 }
 0x252   :  { %1454 = vmatpush.msrb.mxu0 %v4192_v60  ;;  %1474 = vmatpush.msrb.mxu1 %v4194_v61 }
 0x253   :  { %v3463_v21 = vpop.eup %3462  ;;  %1494 = vmatpush.msrb.mxu2 %v4172_v54  ;;  %1515 = vmatpush.msrb.mxu3 %v4209_v1  ;;  %v1329_v1 = vand.u32 2147483647, %v4594_v42 }
 0x254   :  { %v3465_v38 = vpop.eup %3464  ;;  %v4618_v9 = vadd.f32 1.0, %v3463_v21  ;;  %1455 = vmatpush.msrb.mxu0 %v4201_v63  ;;  %1475 = vmatpush.msrb.mxu1 %v4203_v0 }
 0x255   :  { %v4622_v39 = vpop.eup %3466  ;;  %v4624_v22 = vadd.f32 1.0, %v3465_v38  ;;  %1495 = vmatpush.msrb.mxu2 %v4190_v59  ;;  %1735 = vmatpush.msra.mxu3 %v4294_v13  ;;  %vm1330_vm7 = vcmp.eq.f32.partialorder %v1329_v1, 8.507059e+37  ;;  %v5564_v38 = vld [vmem:[#allocation53_spill] sm:$0xff] }
 0x256   :  { %v4628_v55 = vpop.eup %3468  ;;  %v1306_v56 = vmul.f32 %v4622_v39, %v4584_v28  ;;  %3470 = vrcp.f32 %v4618_v9  ;;  %1675 = vmatpush.msra.mxu0 %v4283_v50  ;;  %1695 = vmatpush.msra.mxu1 %v4285_v51  ;;  %v1331_v50 = vand.u32 2147483648, %v4594_v42  ;;  %vm1311_vm2 = vweird.f32 %v4622_v39 }
 0x257   :  { %v1321_v57 = vmul.f32 %v4628_v55, %v4594_v42  ;;  %3472 = vrcp.f32 %v4624_v22  ;;  %1715 = vmatpush.msra.mxu2 %v4287_v52  ;;  %1736 = vmatpush.msra.mxu3 %v4310_v53  ;;  %vm1326_vm0 = vweird.f32 %v4628_v55  ;;  %v1314_v53 = vand.u32 2147483647, %v4584_v28  ;;  %vm4690_vm6 = vmor %vm1310_vm3, %vm1311_vm2  ;;  %v5565_v42 = vld [vmem:[#allocation54_spill] sm:$0xff] }
 0x258   :  { %v1307_v54 = vsub.f32 1.0, %v1306_v56  ;;  %1676 = vmatpush.msra.mxu0 %v4302_v16  ;;  %1696 = vmatpush.msra.mxu1 %v4304_v12  ;;  %vm4675_vm4 = vmor %vm1325_vm1, %vm1326_vm0  ;;  %v1346_v13 = vand.u32 2147483648, %v4618_v9  ;;  %v1344_v16 = vand.u32 2147483647, %v4618_v9  ;;  %vm1340_vm8 = vweird.f32 %v4618_v9  ;;  %v5568_v56 = vld [vmem:[#allocation57_spill] sm:$0xff]  ;;  %v5575_v12 = vld [vmem:[#allocation63_spill] sm:$0xff] }
 0x259   :  { %v1322_v58 = vsub.f32 1.0, %v1321_v57  ;;  %1716 = vmatpush.msra.mxu2 %v4306_v2  ;;  %1737 = vmatpush.msra.mxu3 %v5532_v43  ;;  %v1316_v2 = vand.u32 2147483648, %v4584_v28  ;;  %vm1315_vm10 = vcmp.eq.f32.partialorder %v1314_v53, 8.507059e+37  ;;  %vm1355_vm13 = vweird.f32 %v4624_v22  ;;  %v5566_v28 = vld [vmem:[#allocation55_spill] sm:$0xff] }
 0x25a   :  { %v1308_v59 = vmul.f32 %v4622_v39, %v1307_v54  ;;  %1677 = vmatpush.msra.mxu0 %v4314_v15  ;;  %1697 = vmatpush.msra.mxu1 %v4316_v14  ;;  %vm1345_vm11 = vcmp.eq.f32.partialorder %v1344_v16, 8.507059e+37  ;;  %v5578_v16 = vld [vmem:[#allocation31_spill] sm:$0xff] }
 0x25b   :  { %v1323_v60 = vmul.f32 %v4628_v55, %v1322_v58  ;;  %1717 = vmatpush.msra.mxu2 %v4318_v49  ;;  %1738 = vmatpush.msra.mxu3 %v5536_v5  ;;  %v5570_v58 = vld [vmem:[#allocation61_spill] sm:$0xff] }
 0x25c   :  { %v3471_v61 = vpop.eup %3470  ;;  %1678 = vmatpush.msra.mxu0 %v5533_v11  ;;  %1698 = vmatpush.msra.mxu1 %v5534_v45  ;;  %v1309_v51 = vadd.f32 %v4622_v39, %v1308_v59  ;;  %v1332_v11 = vor.u32 1.1754944e-38, %v1331_v50 }
 0x25d   :  { %v1324_v62 = vadd.f32 %v4628_v55, %v1323_v60  ;;  %v1336_v63 = vmul.f32 %v3471_v61, %v4618_v9  ;;  %v4657_v0 = vpop.eup %3472  ;;  %1718 = vmatpush.msra.mxu2 %v5535_v30  ;;  %vm1341_vm5 = vweird.f32 %v3471_v61  ;;  %1739 = vmatpush.msra.mxu3 %v5542_v37  ;;  %v1359_v9 = vand.u32 2147483647, %v4624_v22  ;;  %v5571_v60 = vld [vmem:[#allocation50_spill] sm:$0xff] }
 0x25e   :  { %v1351_v49 = vmul.f32 %v4657_v0, %v4624_v22  ;;  %1679 = vmatpush.msra.mxu0 %v5539_v7  ;;  %1699 = vmatpush.msra.mxu1 %v5540_v20  ;;  %v1313_v30 = vsel %vm4690_vm6, %v4622_v39, %v1309_v51  ;;  %v1317_v7 = vor.u32 1.1754944e-38, %v1316_v2  ;;  %vm1342_vm9 = vmor %vm1340_vm8, %vm1341_vm5  ;;  %vm1356_vm12 = vweird.f32 %v4657_v0 }
 0x25f   :  { %v1337_v52 = vsub.f32 1.0, %v1336_v63  ;;  %v1328_v14 = vsel %vm4675_vm4, %v4628_v55, %v1324_v62  ;;  %1719 = vmatpush.msra.mxu2 %v5541_v27  ;;  %1740 = vmatpush.msra.mxu3 %v4370_v48  ;;  %v1347_v27 = vor.u32 1.1754944e-38, %v1346_v13  ;;  %vm1357_vm14 = vmor %vm1355_vm13, %vm1356_vm12  ;;  %v5567_v55 = vld [vmem:[#allocation56_spill] sm:$0xff]  ;;  %vm1360_vm15 = vcmp.eq.f32.partialorder %v1359_v9, 8.507059e+37  ;;  %v5573_v63 = vld [vmem:[#allocation51_spill] sm:$0xff] }
 0x260   :  { %v1352_v45 = vsub.f32 1.0, %v1351_v49  ;;  %1680 = vmatpush.msra.mxu0 %v4362_v17  ;;  %1700 = vmatpush.msra.mxu1 %v4364_v18  ;;  %v1333_v20 = vsel %vm1330_vm7, %v1332_v11, %v1328_v14  ;;  %v1318_v18 = vsel %vm1315_vm10, %v1317_v7, %v1313_v30  ;;  %v5576_v13 = vld [vmem:[#allocation30_spill] sm:$0xff]  ;;  %v4768_v9 = vld [vmem:[#allocation11 + $0x30] sm:$0xff] }
 0x261   :  { %v1338_v15 = vmul.f32 %v3471_v61, %v1337_v52  ;;  %1720 = vmatpush.msra.mxu2 %v4366_v29  ;;  %1741 = vmatpush.msra.mxu3 %v4532_v47  ;;  %v1365_v37 = vmul.f32 %v1333_v20, %v4518_v25  ;;  %v5563_v25 = vld [vmem:[#allocation52_spill] sm:$0xff]  ;;  %v810_v14 = vadd.f32 %v5576_v13, %v5575_v12 }
 0x262   :  { %1681 = vmatpush.msra.mxu0 %v4378_v34  ;;  %1701 = vmatpush.msra.mxu1 %v4380_v35  ;;  %v1353_v48 = vmul.f32 %v4657_v0, %v1352_v45  ;;  %5579 = vst [vmem:[#allocation62_spill] sm:$0xff] %v4768_v9 }
 0x263   :  { %v1339_v5 = vadd.f32 %v3471_v61, %v1338_v15  ;;  %1721 = vmatpush.msra.mxu2 %v4382_v31  ;;  %1742 = vmatpush.msra.mxu3 %v4539_v19  ;;  %v5577_v15 = vld [vmem:[#allocation64_spill] sm:$0xff] }
 0x264   :  { %1682 = vmatpush.msra.mxu0 %v4535_v3  ;;  %1702 = vmatpush.msra.mxu1 %v4537_v40  ;;  %v1354_v31 = vadd.f32 %v4657_v0, %v1353_v48  ;;  %v851_v43 = vadd.f32 %v5578_v16, %v5577_v15  ;;  %v4759_v48 = vld [vmem:[#allocation11 + $0x58] sm:$0xff] }
 0x265   :  { %v1343_v17 = vsel %vm1342_vm9, %v3471_v61, %v1339_v5  ;;  %1722 = vmatpush.msra.mxu2 %v4388_v46  ;;  %1743 = vmatpush.msra.mxu3 %v4556_v23  ;;  %v1361_v46 = vand.u32 2147483648, %v4624_v22  ;;  %v5569_v22 = vld [vmem:[#allocation58_spill] sm:$0xff]  ;;  %v5572_v61 = vld [vmem:[#allocation28_spill] sm:$0xff] }
 0x266   :  { %v1348_v29 = vsel %vm1345_vm11, %v1347_v27, %v1343_v17  ;;  %1683 = vmatpush.msra.mxu0 %v4548_v24  ;;  %1703 = vmatpush.msra.mxu1 %v4550_v6  ;;  %v1358_v39 = vsel %vm1357_vm14, %v4657_v0, %v1354_v31  ;;  %v728_v62 = vadd.f32 %v5572_v61, %v5571_v60  ;;  %v5574_v0 = vld [vmem:[#allocation29_spill] sm:$0xff]  ;;  %v4753_v17 = vld [vmem:[#allocation11 + $0x40] sm:$0xff] }
 0x267   :  { %v1366_v34 = vmul.f32 %v1348_v29, %v1318_v18  ;;  %1723 = vmatpush.msra.mxu2 %v4552_v8  ;;  %1744 = vmatpush.msra.mxu3 %v5563_v25  ;;  %v1362_v21 = vor.u32 1.1754944e-38, %v1361_v46  ;;  %v769_v1 = vadd.f32 %v5574_v0, %v5573_v63  ;;  %v4751_v27 = vld [vmem:[#allocation11 + $0x78] sm:$0xff]  ;;  %v4757_v29 = vld [vmem:[#allocation11 + $0x48] sm:$0xff] }
 0x268   :  { %1684 = vmatpush.msra.mxu0 %v4560_v44  ;;  %1704 = vmatpush.msra.mxu1 %v4562_v26  ;;  %v4766_v46 = vld [vmem:[#allocation11 + $0x28] sm:$0xff]  ;;  %v4783_v61 = vld [vmem:[#allocation11 + $0x18] sm:$0xff] }
 0x269   :  { %v4715_v35 = vadd.f32 %v1366_v34, %v1365_v37  ;;  %1724 = vmatpush.msra.mxu2 %v4564_v10  ;;  %1745 = vmatpush.msra.mxu3 %v4580_v32  ;;  %v1363_v54 = vsel %vm1360_vm15, %v1362_v21, %v1358_v39  ;;  %v4761_v37 = vld [vmem:[#allocation11 + $0x20] sm:$0xff]  ;;  %v4770_v39 = vld [vmem:[#allocation11 + $0x38] sm:$0xff]  ;;  %5584 = vst [vmem:[#allocation52_spill] sm:$0xff] %v4783_v61 }
 0x26a   :  { %1685 = vmatpush.msra.mxu0 %v5564_v38  ;;  %1705 = vmatpush.msra.mxu1 %v5565_v42  ;;  %5580 = vst [vmem:[#allocation24_spill] sm:$0xff] %v4770_v39 }
 0x26b   :  { %1371 = vst [vmem:[#allocation16 + $0x8] sm:$0xff] %v4715_v35  ;;  %3474 = vtanh.f32 %v4715_v35  ;;  %1725 = vmatpush.msra.mxu2 %v5566_v28  ;;  %1746 = vmatpush.msra.mxu3 %v5568_v56 }
 0x26c   :  { %1686 = vmatpush.msra.mxu0 %v4582_v36  ;;  %1706 = vmatpush.msra.mxu1 %v4588_v41 }
 0x26d   :  { %1726 = vmatpush.msra.mxu2 %v5567_v55  ;;  %1747 = vmatpush.msra.mxu3 %v4751_v27 }
 0x26e   :  { %1687 = vmatpush.msra.mxu0 %v4598_v4  ;;  %1707 = vmatpush.msra.mxu1 %v5569_v22 }
 0x26f   :  { %1727 = vmatpush.msra.mxu2 %v5570_v58  ;;  %1748 = vmatpush.msra.mxu3 %v4759_v48 }
 0x270   :  { %1688 = vmatpush.msra.mxu0 %v4753_v17  ;;  %1708 = vmatpush.msra.mxu1 %v4757_v29 }
 0x271   :  { %v3475_v57 = vpop.eup %3474  ;;  %1728 = vmatpush.msra.mxu2 %v4610_v33  ;;  %1749 = vmatpush.msra.mxu3 %v4770_v39 }
 0x272   :  { %v1369_v59 = vmul.f32 %v3475_v57, %v1363_v54  ;;  %1689 = vmatpush.msra.mxu0 %v4761_v37  ;;  %v4774_v57 = vld [vmem:[#allocation11] sm:$0xff]  ;;  %v4776_v54 = vld [vmem:[#allocation11 + $0x8] sm:$0xff]  ;;  %1709 = vmatpush.msra.mxu1 %v4766_v46 }
 0x273   :  { %5581 = vst [vmem:[#allocation25_spill] sm:$0xff] %v4774_v57  ;;  %1729 = vmatpush.msra.mxu2 %v4768_v9  ;;  %1750 = vmatpush.msra.mxu3 %v4783_v61 }
 0x274   :  { %1370 = vst [vmem:[#allocation15 + $0x8] sm:$0xff] %v1369_v59  ;;  %1456 = vmatmul.f32.vlgmr.msrb.gmra.mxu0 %v1369_v59  ;;  %1476 = vmatmul.f32.vlgmr.msrb.gmra.mxu1 %v1369_v59 }
 0x275   :  { %1496 = vmatmul.f32.vlgmr.msrb.gmra.mxu2 %v1369_v59  ;;  %1516 = vmatmul.f32.vlgmr.msrb.gmra.mxu3 %v1369_v59  ;;  %5582 = vst [vmem:[#allocation26_spill] sm:$0xff] %v4776_v54  ;;  %v4778_v59 = vld [vmem:[#allocation11 + $0x10] sm:$0xff] }
 0x276   :  { %5583 = vst [vmem:[#allocation27_spill] sm:$0xff] %v4778_v59  ;;  %1690 = vmatpush.msra.mxu0 %v4774_v57  ;;  %1710 = vmatpush.msra.mxu1 %v4776_v54 }
 0x277   :  { %1730 = vmatpush.msra.mxu2 %v4778_v59 }
 0x2f1   :  { %v1457_v50 = vpop.f32.mrf.mxu0  ;;  %v1477_v51 = vpop.f32.mrf.mxu1 }
 0x2f2   :  { %v1520_v52 = vadd.f32 %v1457_v50, %v728_v62  ;;  %v1521_v49 = vadd.f32 %v1477_v51, %v769_v1 }
 0x2f4   :  { %v3276_v53 = vmul.f32 -1.442695, %v1520_v52  ;;  %v3277_v2 = vmul.f32 -1.442695, %v1521_v49 }
 0x2f6   :  { %3476 = vpow2.f32 %v3276_v53 }
 0x2f7   :  { %3478 = vpow2.f32 %v3277_v2 }
 0x2f8   :  { %v1497_v11 = vpop.f32.mrf.mxu2  ;;  %v1517_v45 = vpop.f32.mrf.mxu3 }
 0x2f9   :  { %v1522_v30 = vadd.f32 %v1497_v11, %v810_v14  ;;  %v1523_v5 = vadd.f32 %v1517_v45, %v851_v43 }
 0x2fb   :  { %v3278_v7 = vmul.f32 -1.442695, %v1522_v30  ;;  %v3279_v20 = vmul.f32 -1.442695, %v1523_v5 }
 0x2fc   :  { %v3477_v18 = vpop.eup %3476 }
 0x2fd   :  { %v3479_v34 = vpop.eup %3478  ;;  %v4763_v31 = vadd.f32 1.0, %v3477_v18  ;;  %3480 = vpow2.f32 %v3278_v7 }
 0x2fe   :  { %v1537_v21 = vadd.f32 1.0, %v3479_v34  ;;  %3482 = vpow2.f32 %v3279_v20 }
 0x2ff   :  { %3484 = vrcp.f32 %v4763_v31  ;;  %vm1545_vm3 = vweird.f32 %v4763_v31 }
 0x300   :  { %3486 = vrcp.f32 %v1537_v21  ;;  %vm1560_vm1 = vweird.f32 %v1537_v21  ;;  %v1564_v5 = vand.u32 2147483647, %v1537_v21  ;;  %v1566_v7 = vand.u32 2147483648, %v1537_v21 }
 0x302   :  { %vm1565_vm7 = vcmp.eq.f32.partialorder %v1564_v5, 8.507059e+37 }
 0x303   :  { %v3481_v62 = vpop.eup %3480 }
 0x304   :  { %v3483_v0 = vpop.eup %3482  ;;  %v1538_v1 = vadd.f32 1.0, %v3481_v62  ;;  %v1549_v62 = vand.u32 2147483647, %v4763_v31 }
 0x305   :  { %v3485_v50 = vpop.eup %3484  ;;  %v1539_v51 = vadd.f32 1.0, %v3483_v0  ;;  %v1551_v0 = vand.u32 2147483648, %v4763_v31 }
 0x306   :  { %v3487_v52 = vpop.eup %3486  ;;  %v1541_v49 = vmul.f32 %v3485_v50, %v4763_v31  ;;  %3488 = vrcp.f32 %v1538_v1  ;;  %vm1546_vm2 = vweird.f32 %v3485_v50  ;;  %vm1575_vm8 = vweird.f32 %v1538_v1 }
 0x307   :  { %v1556_v53 = vmul.f32 %v3487_v52, %v1537_v21  ;;  %3490 = vrcp.f32 %v1539_v51  ;;  %vm1561_vm0 = vweird.f32 %v3487_v52  ;;  %vm1547_vm6 = vmor %vm1545_vm3, %vm1546_vm2  ;;  %vm1550_vm10 = vcmp.eq.f32.partialorder %v1549_v62, 8.507059e+37  ;;  %v4819_v62 = vld [vmem:[#allocation11 + $0x1d8] sm:$0xff] }
 0x308   :  { %v1542_v2 = vsub.f32 1.0, %v1541_v49  ;;  %vm1562_vm4 = vmor %vm1560_vm1, %vm1561_vm0  ;;  %v1581_v49 = vand.u32 2147483648, %v1538_v1  ;;  %vm1590_vm13 = vweird.f32 %v1539_v51  ;;  %v1594_v5 = vand.u32 2147483647, %v1539_v51 }
 0x309   :  { %v1557_v13 = vsub.f32 1.0, %v1556_v53 }
 0x30a   :  { %v1543_v14 = vmul.f32 %v3485_v50, %v1542_v2  ;;  %v1582_v54 = vor.u32 1.1754944e-38, %v1581_v49  ;;  %vm1595_vm15 = vcmp.eq.f32.partialorder %v1594_v5, 8.507059e+37  ;;  %v4825_v49 = vld [vmem:[#allocation11 + $0x1a8] sm:$0xff]  ;;  %v4859_v5 = vld [vmem:[#allocation11 + $0x178] sm:$0xff] }
 0x30b   :  { %v1558_v16 = vmul.f32 %v3487_v52, %v1557_v13  ;;  %v1579_v13 = vand.u32 2147483647, %v1538_v1  ;;  %5590 = vst [vmem:[#allocation56_spill] sm:$0xff] %v4859_v5 }
 0x30c   :  { %v3489_v43 = vpop.eup %3488  ;;  %v1544_v20 = vadd.f32 %v3485_v50, %v1543_v14 }
 0x30d   :  { %v1559_v11 = vadd.f32 %v3487_v52, %v1558_v16  ;;  %v1571_v45 = vmul.f32 %v3489_v43, %v1538_v1  ;;  %v3491_v30 = vpop.eup %3490  ;;  %vm1576_vm5 = vweird.f32 %v3489_v43  ;;  %v1567_v16 = vor.u32 1.1754944e-38, %v1566_v7 }
 0x30e   :  { %v1586_v34 = vmul.f32 %v3491_v30, %v1539_v51  ;;  %v1548_v21 = vsel %vm1547_vm6, %v3485_v50, %v1544_v20  ;;  %vm1577_vm9 = vmor %vm1575_vm8, %vm1576_vm5  ;;  %vm1580_vm11 = vcmp.eq.f32.partialorder %v1579_v13, 8.507059e+37  ;;  %vm1591_vm12 = vweird.f32 %v3491_v30  ;;  %v4813_v20 = vld [vmem:[#allocation11 + $0x1c8] sm:$0xff]  ;;  %v4835_v13 = vld [vmem:[#allocation11 + $0x180] sm:$0xff] }
 0x30f   :  { %v1572_v18 = vsub.f32 1.0, %v1571_v45  ;;  %v1563_v53 = vsel %vm1562_vm4, %v3487_v52, %v1559_v11  ;;  %v1552_v45 = vor.u32 1.1754944e-38, %v1551_v0  ;;  %v1596_v1 = vand.u32 2147483648, %v1539_v51  ;;  %vm1592_vm14 = vmor %vm1590_vm13, %vm1591_vm12  ;;  %v4807_v51 = vld [vmem:[#allocation11 + $0x1f8] sm:$0xff]  ;;  %v4823_v0 = vld [vmem:[#allocation11 + $0x1a0] sm:$0xff] }
 0x310   :  { %v1587_v61 = vsub.f32 1.0, %v1586_v34  ;;  %v1568_v59 = vsel %vm1565_vm7, %v1567_v16, %v1563_v53  ;;  %1970 = vmatpush.msrb.mxu3 %v4807_v51  ;;  %v4815_v34 = vld [vmem:[#allocation11 + $0x1d0] sm:$0xff]  ;;  %v4837_v16 = vld [vmem:[#allocation11 + $0x188] sm:$0xff] }
 0x311   :  { %v1573_v2 = vmul.f32 %v3489_v43, %v1572_v18  ;;  %v1553_v31 = vsel %vm1550_vm10, %v1552_v45, %v1548_v21  ;;  %v1600_v11 = vmul.f32 %v1568_v59, %v4715_v35  ;;  %v1597_v7 = vor.u32 1.1754944e-38, %v1596_v1  ;;  %v4799_v35 = vld [vmem:[#allocation11 + $0x1e0] sm:$0xff]  ;;  %v4803_v59 = vld [vmem:[#allocation11 + $0x1f0] sm:$0xff] }
 0x312   :  { %v1588_v52 = vmul.f32 %v3491_v30, %v1587_v61  ;;  %1910 = vmatpush.msrb.mxu0 %v4799_v35  ;;  %1950 = vmatpush.msrb.mxu2 %v4803_v59  ;;  %v4827_v53 = vld [vmem:[#allocation11 + $0x1b0] sm:$0xff]  ;;  %v4847_v45 = vld [vmem:[#allocation11 + $0x160] sm:$0xff] }
 0x313   :  { %v1574_v14 = vadd.f32 %v3489_v43, %v1573_v2  ;;  %1971 = vmatpush.msrb.mxu3 %v4819_v62  ;;  %v4831_v2 = vld [vmem:[#allocation11 + $0x1b8] sm:$0xff]  ;;  %v4839_v21 = vld [vmem:[#allocation11 + $0x190] sm:$0xff] }
 0x314   :  { %v1589_v50 = vadd.f32 %v3491_v30, %v1588_v52  ;;  %1951 = vmatpush.msrb.mxu2 %v4815_v34  ;;  %v4851_v52 = vld [vmem:[#allocation11 + $0x170] sm:$0xff] }
 0x315   :  { %v1578_v57 = vsel %vm1577_vm9, %v3489_v43, %v1574_v14  ;;  %1972 = vmatpush.msrb.mxu3 %v4831_v2  ;;  %v4843_v14 = vld [vmem:[#allocation11 + $0x198] sm:$0xff]  ;;  %5587 = vst [vmem:[#allocation55_spill] sm:$0xff] %v4851_v52 }
 0x316   :  { %v1583_v39 = vsel %vm1580_vm11, %v1582_v54, %v1578_v57  ;;  %v1593_v43 = vsel %vm1592_vm14, %v3491_v30, %v1589_v50  ;;  %v4811_v30 = vld [vmem:[#allocation11 + $0x1c0] sm:$0xff]  ;;  %1952 = vmatpush.msrb.mxu2 %v4827_v53  ;;  %v5589_v50 = vld [vmem:[#allocation33_spill] sm:$0xff] }
 0x317   :  { %v1601_v18 = vmul.f32 %v1583_v39, %v1553_v31  ;;  %v1598_v54 = vsel %vm1595_vm15, %v1597_v7, %v1593_v43  ;;  %v4801_v39 = vld [vmem:[#allocation11 + $0x1e8] sm:$0xff]  ;;  %1911 = vmatpush.msrb.mxu0 %v4811_v30  ;;  %1973 = vmatpush.msrb.mxu3 %v4843_v14  ;;  %v772_v1 = vadd.f32 %v5589_v50, %v5573_v63  ;;  %v4871_v63 = vld [vmem:[#allocation11 + $0x158] sm:$0xff] }
 0x318   :  { %1930 = vmatpush.msrb.mxu1 %v4801_v39  ;;  %1953 = vmatpush.msrb.mxu2 %v4839_v21  ;;  %v4849_v31 = vld [vmem:[#allocation11 + $0x168] sm:$0xff] }
 0x319   :  { %v4795_v9 = vadd.f32 %v1601_v18, %v1600_v11  ;;  %1912 = vmatpush.msrb.mxu0 %v4823_v0  ;;  %5586 = vst [vmem:[#allocation54_spill] sm:$0xff] %v4849_v31  ;;  %v5588_v11 = vld [vmem:[#allocation32_spill] sm:$0xff]  ;;  %1974 = vmatpush.msrb.mxu3 %v4859_v5 }
 0x31a   :  { %1931 = vmatpush.msrb.mxu1 %v4813_v20  ;;  %v731_v18 = vadd.f32 %v5588_v11, %v5571_v60  ;;  %1954 = vmatpush.msrb.mxu2 %v4851_v52  ;;  %v4875_v60 = vld [vmem:[#allocation11 + $0x120] sm:$0xff]  ;;  %v4879_v5 = vld [vmem:[#allocation11 + $0x130] sm:$0xff] }
 0x31b   :  { %5585 = vst [vmem:[#allocation53_spill] sm:$0xff] %v4795_v9  ;;  %3492 = vtanh.f32 %v4795_v9  ;;  %1913 = vmatpush.msrb.mxu0 %v4835_v13  ;;  %1975 = vmatpush.msrb.mxu3 %v4871_v63 }
 0x31c   :  { %1606 = vst [vmem:[#allocation16 + $0x10] sm:$0xff] %v4795_v9  ;;  %1932 = vmatpush.msrb.mxu1 %v4825_v49  ;;  %v4877_v9 = vld [vmem:[#allocation11 + $0x128] sm:$0xff] }
 0x31d   :  { %1914 = vmatpush.msrb.mxu0 %v4847_v45  ;;  %1976 = vmatpush.msrb.mxu3 %v4532_v47 }
 0x31e   :  { %1933 = vmatpush.msrb.mxu1 %v4837_v16 }
 0x31f   :  { %1977 = vmatpush.msrb.mxu3 %v4539_v19 }
 0x320   :  { %1934 = vmatpush.msrb.mxu1 %v4849_v31 }
 0x321   :  { %v3493_v57 = vpop.eup %3492  ;;  %1978 = vmatpush.msrb.mxu3 %v4556_v23 }
 0x322   :  { %v1604_v61 = vmul.f32 %v3493_v57, %v1598_v54  ;;  %v4863_v57 = vld [vmem:[#allocation11 + $0x140] sm:$0xff]  ;;  %v4865_v54 = vld [vmem:[#allocation11 + $0x148] sm:$0xff] }
 0x323   :  { %1915 = vmatpush.msrb.mxu0 %v4863_v57  ;;  %1935 = vmatpush.msrb.mxu1 %v4865_v54 }
 0x324   :  { %1605 = vst [vmem:[#allocation15 + $0x10] sm:$0xff] %v1604_v61  ;;  %1691 = vmatmul.f32.vlgmr.msra.gmra.mxu0 %v1604_v61  ;;  %1711 = vmatmul.f32.vlgmr.msra.gmra.mxu1 %v1604_v61 }
 0x325   :  { %1731 = vmatmul.f32.vlgmr.msra.gmra.mxu2 %v1604_v61  ;;  %1751 = vmatmul.f32.vlgmr.msra.gmra.mxu3 %v1604_v61  ;;  %v4867_v61 = vld [vmem:[#allocation11 + $0x150] sm:$0xff] }
 0x326   :  { %1955 = vmatpush.msrb.mxu2 %v4867_v61  ;;  %1916 = vmatpush.msrb.mxu0 %v4875_v60 }
 0x327   :  { %1936 = vmatpush.msrb.mxu1 %v4877_v9  ;;  %1979 = vmatpush.msrb.mxu3 %v5563_v25  ;;  %v5595_v25 = vld [vmem:[#allocation25_spill] sm:$0xff] }
 0x328   :  { %1956 = vmatpush.msrb.mxu2 %v4879_v5  ;;  %1917 = vmatpush.msrb.mxu0 %v4535_v3 }
 0x329   :  { %1937 = vmatpush.msrb.mxu1 %v4537_v40  ;;  %1980 = vmatpush.msrb.mxu3 %v4580_v32 }
 0x32a   :  { %1918 = vmatpush.msrb.mxu0 %v4548_v24 }
 0x32b   :  { %1938 = vmatpush.msrb.mxu1 %v4550_v6  ;;  %1981 = vmatpush.msrb.mxu3 %v5568_v56 }
 0x32c   :  { %1919 = vmatpush.msrb.mxu0 %v4560_v44 }
 0x32d   :  { %1939 = vmatpush.msrb.mxu1 %v4562_v26  ;;  %1982 = vmatpush.msrb.mxu3 %v4751_v27  ;;  %v5593_v26 = vld [vmem:[#allocation62_spill] sm:$0xff] }
 0x32e   :  { %1920 = vmatpush.msrb.mxu0 %v5564_v38  ;;  %v5596_v38 = vld [vmem:[#allocation26_spill] sm:$0xff] }
 0x32f   :  { %1940 = vmatpush.msrb.mxu1 %v5565_v42  ;;  %1983 = vmatpush.msrb.mxu3 %v4759_v48 }
 0x330   :  { %1921 = vmatpush.msrb.mxu0 %v4582_v36 }
 0x331   :  { %1941 = vmatpush.msrb.mxu1 %v4588_v41 }
 0x332   :  { %1922 = vmatpush.msrb.mxu0 %v4598_v4 }
 0x333   :  { %1942 = vmatpush.msrb.mxu1 %v5569_v22 }
 0x334   :  { %1923 = vmatpush.msrb.mxu0 %v4753_v17 }
 0x335   :  { %1943 = vmatpush.msrb.mxu1 %v4757_v29 }
 0x336   :  { %1924 = vmatpush.msrb.mxu0 %v4761_v37 }
 0x337   :  { %1944 = vmatpush.msrb.mxu1 %v4766_v46 }
 0x338   :  { %1925 = vmatpush.msrb.mxu0 %v5595_v25 }
 0x339   :  { %1945 = vmatpush.msrb.mxu1 %v5596_v38 }
 0x33a   :  { %2145 = vmatpush.msra.mxu0 %v4799_v35 }
 0x33b   :  { %2165 = vmatpush.msra.mxu1 %v4801_v39 }
 0x33c   :  { %2146 = vmatpush.msra.mxu0 %v4811_v30 }
 0x33d   :  { %2166 = vmatpush.msra.mxu1 %v4813_v20 }
 0x33e   :  { %2147 = vmatpush.msra.mxu0 %v4823_v0 }
 0x33f   :  { %2167 = vmatpush.msra.mxu1 %v4825_v49 }
 0x340   :  { %2148 = vmatpush.msra.mxu0 %v4835_v13 }
 0x341   :  { %2168 = vmatpush.msra.mxu1 %v4837_v16 }
 0x342   :  { %2149 = vmatpush.msra.mxu0 %v4847_v45 }
 0x344   :  { %2150 = vmatpush.msra.mxu0 %v4863_v57 }
 0x346   :  { %2151 = vmatpush.msra.mxu0 %v4875_v60 }
 0x3a1   :  { %v1692_v43 = vpop.f32.mrf.mxu0  ;;  %v1712_v7 = vpop.f32.mrf.mxu1 }
 0x3a2   :  { %v1755_v11 = vadd.f32 %v1692_v43, %v731_v18  ;;  %v1756_v50 = vadd.f32 %v1712_v7, %v772_v1  ;;  %v4885_v18 = vld [vmem:[#allocation11 + $0x110] sm:$0xff]  ;;  %v5591_v1 = vld [vmem:[#allocation34_spill] sm:$0xff]  ;;  %v5592_v7 = vld [vmem:[#allocation35_spill] sm:$0xff] }
 0x3a3   :  { %v813_v43 = vadd.f32 %v5591_v1, %v5575_v12  ;;  %1957 = vmatpush.msrb.mxu2 %v4885_v18 }
 0x3a4   :  { %v3280_v52 = vmul.f32 -1.442695, %v1755_v11  ;;  %v3281_v31 = vmul.f32 -1.442695, %v1756_v50  ;;  %v854_v11 = vadd.f32 %v5592_v7, %v5577_v15 }
 0x3a5   :  { %1958 = vmatpush.msrb.mxu2 %v4552_v8 }
 0x3a6   :  { %3494 = vpow2.f32 %v3280_v52 }
 0x3a7   :  { %3496 = vpow2.f32 %v3281_v31  ;;  %1959 = vmatpush.msrb.mxu2 %v4564_v10  ;;  %v5594_v10 = vld [vmem:[#allocation24_spill] sm:$0xff] }
 0x3a8   :  { %v1732_v50 = vpop.f32.mrf.mxu2  ;;  %v1752_v47 = vpop.f32.mrf.mxu3  ;;  %1984 = vmatpush.msrb.mxu3 %v5594_v10 }
 0x3a9   :  { %v1757_v3 = vadd.f32 %v1732_v50, %v813_v43  ;;  %v1758_v52 = vadd.f32 %v1752_v47, %v854_v11  ;;  %1960 = vmatpush.msrb.mxu2 %v5566_v28  ;;  %v5597_v28 = vld [vmem:[#allocation27_spill] sm:$0xff] }
 0x3ab   :  { %v3282_v40 = vmul.f32 -1.442695, %v1757_v3  ;;  %v3283_v31 = vmul.f32 -1.442695, %v1758_v52  ;;  %1961 = vmatpush.msrb.mxu2 %v5567_v55  ;;  %v5598_v55 = vld [vmem:[#allocation52_spill] sm:$0xff] }
 0x3ac   :  { %v3495_v19 = vpop.eup %3494  ;;  %1985 = vmatpush.msrb.mxu3 %v5598_v55 }
 0x3ad   :  { %v3497_v24 = vpop.eup %3496  ;;  %v4905_v6 = vadd.f32 1.0, %v3495_v19  ;;  %3498 = vpow2.f32 %v3282_v40  ;;  %1962 = vmatpush.msrb.mxu2 %v5570_v58 }
 0x3ae   :  { %v4909_v8 = vadd.f32 1.0, %v3497_v24  ;;  %3500 = vpow2.f32 %v3283_v31  ;;  %2205 = vmatpush.msra.mxu3 %v4807_v51 }
 0x3af   :  { %3502 = vrcp.f32 %v4905_v6  ;;  %1963 = vmatpush.msrb.mxu2 %v4610_v33  ;;  %vm1780_vm3 = vweird.f32 %v4905_v6  ;;  %v1784_v19 = vand.u32 2147483647, %v4905_v6  ;;  %v1786_v24 = vand.u32 2147483648, %v4905_v6 }
 0x3b0   :  { %3504 = vrcp.f32 %v4909_v8  ;;  %2206 = vmatpush.msra.mxu3 %v4819_v62  ;;  %vm1795_vm1 = vweird.f32 %v4909_v8  ;;  %v1799_v47 = vand.u32 2147483647, %v4909_v8  ;;  %v1801_v3 = vand.u32 2147483648, %v4909_v8 }
 0x3b1   :  { %1964 = vmatpush.msrb.mxu2 %v5593_v26  ;;  %vm1785_vm10 = vcmp.eq.f32.partialorder %v1784_v19, 8.507059e+37 }
 0x3b2   :  { %2207 = vmatpush.msra.mxu3 %v4831_v2  ;;  %vm1800_vm7 = vcmp.eq.f32.partialorder %v1799_v47, 8.507059e+37 }
 0x3b3   :  { %v3499_v32 = vpop.eup %3498  ;;  %1965 = vmatpush.msrb.mxu2 %v5597_v28 }
 0x3b4   :  { %v3501_v41 = vpop.eup %3500  ;;  %v4925_v36 = vadd.f32 1.0, %v3499_v32  ;;  %2208 = vmatpush.msra.mxu3 %v4843_v14 }
 0x3b5   :  { %v4929_v23 = vpop.eup %3502  ;;  %v4931_v44 = vadd.f32 1.0, %v3501_v41  ;;  %2185 = vmatpush.msra.mxu2 %v4803_v59  ;;  %v5601_v41 = vld [vmem:[#allocation54_spill] sm:$0xff] }
 0x3b6   :  { %v4935_v4 = vpop.eup %3504  ;;  %v1776_v33 = vmul.f32 %v4929_v23, %v4905_v6  ;;  %3506 = vrcp.f32 %v4925_v36  ;;  %vm1781_vm2 = vweird.f32 %v4929_v23  ;;  %v1816_v32 = vand.u32 2147483648, %v4925_v36  ;;  %2169 = vmatpush.msra.mxu1 %v5601_v41 }
 0x3b7   :  { %v1791_v42 = vmul.f32 %v4935_v4, %v4909_v8  ;;  %3508 = vrcp.f32 %v4931_v44  ;;  %2186 = vmatpush.msra.mxu2 %v4815_v34  ;;  %vm1796_vm0 = vweird.f32 %v4935_v4  ;;  %v1814_v6 = vand.u32 2147483647, %v4925_v36  ;;  %vm4997_vm6 = vmor %vm1780_vm3, %vm1781_vm2 }
 0x3b8   :  { %v1777_v56 = vsub.f32 1.0, %v1776_v33  ;;  %vm4982_vm4 = vmor %vm1795_vm1, %vm1796_vm0  ;;  %2170 = vmatpush.msra.mxu1 %v4865_v54  ;;  %vm1810_vm8 = vweird.f32 %v4925_v36  ;;  %vm1825_vm13 = vweird.f32 %v4931_v44  ;;  %v1829_v19 = vand.u32 2147483647, %v4931_v44 }
 0x3b9   :  { %v1792_v22 = vsub.f32 1.0, %v1791_v42  ;;  %2187 = vmatpush.msra.mxu2 %v4827_v53  ;;  %vm1815_vm11 = vcmp.eq.f32.partialorder %v1814_v6, 8.507059e+37 }
 0x3ba   :  { %v1778_v58 = vmul.f32 %v4929_v23, %v1777_v56  ;;  %v5602_v56 = vld [vmem:[#allocation55_spill] sm:$0xff]  ;;  %2171 = vmatpush.msra.mxu1 %v4877_v9  ;;  %vm1830_vm15 = vcmp.eq.f32.partialorder %v1829_v19, 8.507059e+37  ;;  %v5037_v19 = vld [vmem:[#allocation11 + $0x118] sm:$0xff] }
 0x3bb   :  { %v1793_v1 = vmul.f32 %v4935_v4, %v1792_v22  ;;  %2188 = vmatpush.msra.mxu2 %v4839_v21  ;;  %v5603_v22 = vld [vmem:[#allocation56_spill] sm:$0xff] }
 0x3bc   :  { %v3507_v43 = vpop.eup %3506  ;;  %v1779_v52 = vadd.f32 %v4929_v23, %v1778_v58  ;;  %2209 = vmatpush.msra.mxu3 %v5603_v22 }
 0x3bd   :  { %v1794_v7 = vadd.f32 %v4935_v4, %v1793_v1  ;;  %v1806_v11 = vmul.f32 %v3507_v43, %v4925_v36  ;;  %v4964_v50 = vpop.eup %3508  ;;  %vm1811_vm5 = vweird.f32 %v3507_v43  ;;  %2189 = vmatpush.msra.mxu2 %v5602_v56  ;;  %v1802_v1 = vor.u32 1.1754944e-38, %v1801_v3 }
 0x3be   :  { %v1821_v31 = vmul.f32 %v4964_v50, %v4931_v44  ;;  %2210 = vmatpush.msra.mxu3 %v4871_v63  ;;  %vm1812_vm9 = vmor %vm1810_vm8, %vm1811_vm5  ;;  %v1817_v3 = vor.u32 1.1754944e-38, %v1816_v32  ;;  %vm1826_vm12 = vweird.f32 %v4964_v50 }
 0x3bf   :  { %v1807_v40 = vsub.f32 1.0, %v1806_v11  ;;  %v1798_v33 = vsel %vm4982_vm4, %v4935_v4, %v1794_v7  ;;  %v1783_v4 = vsel %vm4997_vm6, %v4929_v23, %v1779_v52  ;;  %2190 = vmatpush.msra.mxu2 %v4867_v61  ;;  %v5606_v52 = vld [vmem:[#allocation53_spill] sm:$0xff]  ;;  %vm1827_vm14 = vmor %vm1825_vm13, %vm1826_vm12 }
 0x3c0   :  { %v1822_v11 = vsub.f32 1.0, %v1821_v31  ;;  %v1803_v8 = vsel %vm1800_vm7, %v1802_v1, %v1798_v33 }
 0x3c1   :  { %v1808_v42 = vmul.f32 %v3507_v43, %v1807_v40  ;;  %v1787_v40 = vor.u32 1.1754944e-38, %v1786_v24  ;;  %2191 = vmatpush.msra.mxu2 %v4879_v5 }
 0x3c2   :  { %v1823_v47 = vmul.f32 %v4964_v50, %v1822_v11 }
 0x3c3   :  { %v1809_v7 = vadd.f32 %v3507_v43, %v1808_v42  ;;  %v1788_v23 = vsel %vm1785_vm10, %v1787_v40, %v1783_v4  ;;  %v1835_v42 = vmul.f32 %v1803_v8, %v5606_v52  ;;  %2192 = vmatpush.msra.mxu2 %v4885_v18  ;;  %v5608_v40 = vld [vmem:[#allocation36_spill] sm:$0xff]  ;;  %v5030_v52 = vld [vmem:[#allocation11 + $0x138] sm:$0xff] }
 0x3c4   :  { %v1824_v32 = vadd.f32 %v4964_v50, %v1823_v47  ;;  %2211 = vmatpush.msra.mxu3 %v5030_v52 }
 0x3c5   :  { %v1813_v31 = vsel %vm1812_vm9, %v3507_v43, %v1809_v7  ;;  %v1831_v43 = vand.u32 2147483648, %v4931_v44  ;;  %v5607_v7 = vld [vmem:[#allocation50_spill] sm:$0xff] }
 0x3c6   :  { %v1818_v36 = vsel %vm1815_vm11, %v1817_v3, %v1813_v31  ;;  %v1828_v6 = vsel %vm1827_vm14, %v4964_v50, %v1824_v32  ;;  %v734_v8 = vadd.f32 %v5608_v40, %v5607_v7  ;;  %v5609_v3 = vld [vmem:[#allocation51_spill] sm:$0xff]  ;;  %v5610_v31 = vld [vmem:[#allocation37_spill] sm:$0xff]  ;;  %v5033_v32 = vld [vmem:[#allocation11 + $0x100] sm:$0xff]  ;;  %2212 = vmatpush.msra.mxu3 %v5037_v19 }
 0x3c7   :  { %v1836_v24 = vmul.f32 %v1818_v36, %v1788_v23  ;;  %v1832_v58 = vor.u32 1.1754944e-38, %v1831_v43  ;;  %v775_v23 = vadd.f32 %v5610_v31, %v5609_v3  ;;  %v5035_v43 = vld [vmem:[#allocation11 + $0x108] sm:$0xff]  ;;  %2152 = vmatpush.msra.mxu0 %v5033_v32  ;;  %v5080_v3 = vld [vmem:[#allocation11 + $0x80] sm:$0xff] }
 0x3c8   :  { %2172 = vmatpush.msra.mxu1 %v5035_v43  ;;  %v5048_v40 = vld [vmem:[#allocation11 + $0xe8] sm:$0xff] }
 0x3c9   :  { %v5016_v33 = vadd.f32 %v1836_v24, %v1835_v42  ;;  %v1833_v11 = vsel %vm1830_vm15, %v1832_v58, %v1828_v6  ;;  %v5611_v6 = vld [vmem:[#allocation38_spill] sm:$0xff]  ;;  %v5086_v7 = vld [vmem:[#allocation11 + $0x88] sm:$0xff] }
 0x3ca   :  { %v816_v58 = vadd.f32 %v5611_v6, %v5575_v12  ;;  %2173 = vmatpush.msra.mxu1 %v5048_v40  ;;  %v5066_v6 = vld [vmem:[#allocation11 + $0xd8] sm:$0xff] }
 0x3cb   :  { %1841 = vst [vmem:[#allocation16 + $0x18] sm:$0xff] %v5016_v33  ;;  %3510 = vtanh.f32 %v5016_v33  ;;  %v5078_v12 = vld [vmem:[#allocation11 + $0xb8] sm:$0xff] }
 0x3cc   :  { %5613 = vst [vmem:[#allocation57_spill] sm:$0xff] %v5066_v6 }
 0x3d1   :  { %v3511_v1 = vpop.eup %3510 }
 0x3d2   :  { %v1839_v4 = vmul.f32 %v3511_v1, %v1833_v11  ;;  %v5612_v1 = vld [vmem:[#allocation39_spill] sm:$0xff] }
 0x3d3   :  { %v857_v11 = vadd.f32 %v5612_v1, %v5577_v15 }
 0x3d4   :  { %1840 = vst [vmem:[#allocation15 + $0x18] sm:$0xff] %v1839_v4  ;;  %1926 = vmatmul.f32.vlgmr.msrb.gmra.mxu0 %v1839_v4  ;;  %1946 = vmatmul.f32.vlgmr.msrb.gmra.mxu1 %v1839_v4 }
 0x3d5   :  { %1966 = vmatmul.f32.vlgmr.msrb.gmra.mxu2 %v1839_v4  ;;  %1986 = vmatmul.f32.vlgmr.msrb.gmra.mxu3 %v1839_v4  ;;  %v5046_v4 = vld [vmem:[#allocation11 + $0xe0] sm:$0xff] }
 0x3d6   :  { %2153 = vmatpush.msra.mxu0 %v5046_v4 }
 0x451   :  { %v1927_v44 = vpop.f32.mrf.mxu0  ;;  %v1947_v36 = vpop.f32.mrf.mxu1 }
 0x452   :  { %v1990_v47 = vadd.f32 %v1927_v44, %v734_v8  ;;  %v1991_v50 = vadd.f32 %v1947_v36, %v775_v23  ;;  %v5050_v8 = vld [vmem:[#allocation11 + $0xf0] sm:$0xff]  ;;  %v5054_v44 = vld [vmem:[#allocation11 + $0xf8] sm:$0xff] }
 0x453   :  { %2193 = vmatpush.msra.mxu2 %v5050_v8  ;;  %2213 = vmatpush.msra.mxu3 %v5054_v44 }
 0x454   :  { %v3284_v42 = vmul.f32 -1.442695, %v1990_v47  ;;  %v3285_v24 = vmul.f32 -1.442695, %v1991_v50  ;;  %v5058_v50 = vld [vmem:[#allocation11 + $0xc0] sm:$0xff] }
 0x455   :  { %2154 = vmatpush.msra.mxu0 %v5058_v50  ;;  %2214 = vmatpush.msra.mxu3 %v5066_v6  ;;  %v5088_v6 = vld [vmem:[#allocation11 + $0x90] sm:$0xff] }
 0x456   :  { %3512 = vpow2.f32 %v3284_v42  ;;  %v5060_v42 = vld [vmem:[#allocation11 + $0xc8] sm:$0xff]  ;;  %5617 = vst [vmem:[#allocation29_spill] sm:$0xff] %v5088_v6 }
 0x457   :  { %3514 = vpow2.f32 %v3285_v24  ;;  %v5062_v24 = vld [vmem:[#allocation11 + $0xd0] sm:$0xff]  ;;  %2174 = vmatpush.msra.mxu1 %v5060_v42  ;;  %2215 = vmatpush.msra.mxu3 %v5078_v12 }
 0x458   :  { %v1967_v31 = vpop.f32.mrf.mxu2  ;;  %v1987_v23 = vpop.f32.mrf.mxu3  ;;  %2194 = vmatpush.msra.mxu2 %v5062_v24 }
 0x459   :  { %v1992_v36 = vadd.f32 %v1967_v31, %v816_v58  ;;  %v1993_v47 = vadd.f32 %v1987_v23, %v857_v11  ;;  %v5070_v58 = vld [vmem:[#allocation11 + $0xa0] sm:$0xff]  ;;  %v5072_v11 = vld [vmem:[#allocation11 + $0xa8] sm:$0xff]  ;;  %v5076_v23 = vld [vmem:[#allocation11 + $0xb0] sm:$0xff] }
 0x45a   :  { %5614 = vst [vmem:[#allocation58_spill] sm:$0xff] %v5070_v58  ;;  %2155 = vmatpush.msra.mxu0 %v5070_v58  ;;  %2175 = vmatpush.msra.mxu1 %v5072_v11  ;;  %v5090_v58 = vld [vmem:[#allocation11 + $0x98] sm:$0xff] }
 0x45b   :  { %v3286_v1 = vmul.f32 -1.442695, %v1992_v36  ;;  %v3287_v15 = vmul.f32 -1.442695, %v1993_v47  ;;  %5615 = vst [vmem:[#allocation61_spill] sm:$0xff] %v5072_v11  ;;  %2195 = vmatpush.msra.mxu2 %v5076_v23  ;;  %2216 = vmatpush.msra.mxu3 %v5090_v58 }
 0x45c   :  { %v3513_v31 = vpop.eup %3512  ;;  %5616 = vst [vmem:[#allocation28_spill] sm:$0xff] %v5076_v23  ;;  %2156 = vmatpush.msra.mxu0 %v5080_v3  ;;  %2176 = vmatpush.msra.mxu1 %v5086_v7  ;;  %v5100_v23 = vld [vmem:[#allocation11 + $0x70] sm:$0xff] }
 0x45d   :  { %v3515_v36 = vpop.eup %3514  ;;  %v5082_v47 = vadd.f32 1.0, %v3513_v31  ;;  %3516 = vpow2.f32 %v3286_v1  ;;  %5618 = vst [vmem:[#allocation30_spill] sm:$0xff] %v5090_v58  ;;  %v5096_v31 = vld [vmem:[#allocation11 + $0x60] sm:$0xff]  ;;  %v5098_v1 = vld [vmem:[#allocation11 + $0x68] sm:$0xff]  ;;  %2196 = vmatpush.msra.mxu2 %v5088_v6  ;;  %2217 = vmatpush.msra.mxu3 %v4751_v27 }
 0x45e   :  { %v5092_v11 = vadd.f32 1.0, %v3515_v36  ;;  %3518 = vpow2.f32 %v3287_v15  ;;  %5619 = vst [vmem:[#allocation31_spill] sm:$0xff] %v5098_v1  ;;  %2157 = vmatpush.msra.mxu0 %v5096_v31  ;;  %2177 = vmatpush.msra.mxu1 %v5098_v1  ;;  %v5108_v15 = vld [vmem:[#allocation11 + $0x50] sm:$0xff] }
 0x45f   :  { %5620 = vst [vmem:[#allocation32_spill] sm:$0xff] %v5100_v23  ;;  %3520 = vrcp.f32 %v5082_v47  ;;  %2197 = vmatpush.msra.mxu2 %v5100_v23  ;;  %2218 = vmatpush.msra.mxu3 %v4759_v48  ;;  %vm2015_vm3 = vweird.f32 %v5082_v47 }
 0x460   :  { %3522 = vrcp.f32 %v5092_v11  ;;  %2158 = vmatpush.msra.mxu0 %v4753_v17  ;;  %2178 = vmatpush.msra.mxu1 %v4757_v29  ;;  %vm2030_vm1 = vweird.f32 %v5092_v11 }
 0x461   :  { %2198 = vmatpush.msra.mxu2 %v5108_v15  ;;  %2219 = vmatpush.msra.mxu3 %v5594_v10 }
 0x462   :  { %2159 = vmatpush.msra.mxu0 %v4761_v37  ;;  %2179 = vmatpush.msra.mxu1 %v4766_v46 }
 0x463   :  { %v3517_v36 = vpop.eup %3516  ;;  %2199 = vmatpush.msra.mxu2 %v5593_v26  ;;  %2220 = vmatpush.msra.mxu3 %v5598_v55 }
 0x464   :  { %v3519_v58 = vpop.eup %3518  ;;  %v5116_v6 = vadd.f32 1.0, %v3517_v36  ;;  %2160 = vmatpush.msra.mxu0 %v5595_v25  ;;  %2180 = vmatpush.msra.mxu1 %v5596_v38 }
 0x465   :  { %v5120_v1 = vpop.eup %3520  ;;  %v5122_v23 = vadd.f32 1.0, %v3519_v58  ;;  %2200 = vmatpush.msra.mxu2 %v5597_v28  ;;  %2440 = vmatpush.msrb.mxu3 %v4807_v51  ;;  %v5626_v58 = vld [vmem:[#allocation58_spill] sm:$0xff] }
 0x466   :  { %v5126_v27 = vpop.eup %3522  ;;  %v2011_v17 = vmul.f32 %v5120_v1, %v5082_v47  ;;  %3524 = vrcp.f32 %v5116_v6  ;;  %2380 = vmatpush.msrb.mxu0 %v4799_v35  ;;  %2400 = vmatpush.msrb.mxu1 %v4801_v39  ;;  %vm2016_vm2 = vweird.f32 %v5120_v1  ;;  %vm2045_vm8 = vweird.f32 %v5116_v6 }
 0x467   :  { %v2026_v29 = vmul.f32 %v5126_v27, %v5092_v11  ;;  %3526 = vrcp.f32 %v5122_v23  ;;  %2420 = vmatpush.msrb.mxu2 %v4803_v59  ;;  %2441 = vmatpush.msrb.mxu3 %v4819_v62  ;;  %vm2031_vm0 = vweird.f32 %v5126_v27  ;;  %vm5188_vm6 = vmor %vm2015_vm3, %vm2016_vm2  ;;  %vm2060_vm13 = vweird.f32 %v5122_v23 }
 0x468   :  { %v2012_v48 = vsub.f32 1.0, %v2011_v17  ;;  %2381 = vmatpush.msrb.mxu0 %v4811_v30  ;;  %2401 = vmatpush.msrb.mxu1 %v4813_v20  ;;  %v2034_v30 = vand.u32 2147483647, %v5092_v11  ;;  %v2036_v20 = vand.u32 2147483648, %v5092_v11  ;;  %vm5173_vm4 = vmor %vm2030_vm1, %vm2031_vm0  ;;  %v5627_v11 = vld [vmem:[#allocation61_spill] sm:$0xff]  ;;  %v5630_v17 = vld [vmem:[#allocation30_spill] sm:$0xff] }
 0x469   :  { %v2027_v37 = vsub.f32 1.0, %v2026_v29  ;;  %2421 = vmatpush.msrb.mxu2 %v4815_v34  ;;  %2442 = vmatpush.msrb.mxu3 %v4831_v2  ;;  %v5637_v2 = vld [vmem:[#allocation63_spill] sm:$0xff] }
 0x46a   :  { %v2013_v46 = vmul.f32 %v5120_v1, %v2012_v48  ;;  %2382 = vmatpush.msrb.mxu0 %v4823_v0  ;;  %2402 = vmatpush.msrb.mxu1 %v4825_v49  ;;  %v2019_v49 = vand.u32 2147483647, %v5082_v47  ;;  %vm2035_vm7 = vcmp.eq.f32.partialorder %v2034_v30, 8.507059e+37 }
 0x46b   :  { %v2028_v26 = vmul.f32 %v5126_v27, %v2027_v37  ;;  %2422 = vmatpush.msrb.mxu2 %v4827_v53  ;;  %2443 = vmatpush.msrb.mxu3 %v4843_v14  ;;  %v2021_v53 = vand.u32 2147483648, %v5082_v47  ;;  %v2049_v14 = vand.u32 2147483647, %v5116_v6  ;;  %v5628_v47 = vld [vmem:[#allocation28_spill] sm:$0xff] }
 0x46c   :  { %v3525_v35 = vpop.eup %3524  ;;  %2383 = vmatpush.msrb.mxu0 %v4835_v13  ;;  %2403 = vmatpush.msrb.mxu1 %v4837_v16  ;;  %v2014_v34 = vadd.f32 %v5120_v1, %v2013_v46  ;;  %v2051_v13 = vand.u32 2147483648, %v5116_v6  ;;  %vm2020_vm10 = vcmp.eq.f32.partialorder %v2019_v49, 8.507059e+37  ;;  %v5632_v37 = vld [vmem:[#allocation32_spill] sm:$0xff] }
 0x46d   :  { %v2029_v39 = vadd.f32 %v5126_v27, %v2028_v26  ;;  %v2041_v59 = vmul.f32 %v3525_v35, %v5116_v6  ;;  %v5155_v51 = vpop.eup %3526  ;;  %2423 = vmatpush.msrb.mxu2 %v4839_v21  ;;  %vm2046_vm5 = vweird.f32 %v3525_v35  ;;  %2444 = vmatpush.msrb.mxu3 %v5603_v22  ;;  %v2022_v55 = vor.u32 1.1754944e-38, %v2021_v53  ;;  %v5633_v26 = vld [vmem:[#allocation50_spill] sm:$0xff] }
 0x46e   :  { %v2056_v0 = vmul.f32 %v5155_v51, %v5122_v23  ;;  %2384 = vmatpush.msrb.mxu0 %v4847_v45  ;;  %2404 = vmatpush.msrb.mxu1 %v5601_v41  ;;  %v2037_v45 = vor.u32 1.1754944e-38, %v2036_v20  ;;  %v2018_v38 = vsel %vm5188_vm6, %v5120_v1, %v2014_v34  ;;  %vm2047_vm9 = vmor %vm2045_vm8, %vm2046_vm5  ;;  %vm2050_vm11 = vcmp.eq.f32.partialorder %v2049_v14, 8.507059e+37  ;;  %v5640_v14 = vld [vmem:[#allocation43_spill] sm:$0xff] }
 0x46f   :  { %v2042_v62 = vsub.f32 1.0, %v2041_v59  ;;  %v2033_v16 = vsel %vm5173_vm4, %v5126_v27, %v2029_v39  ;;  %2424 = vmatpush.msrb.mxu2 %v5602_v56  ;;  %2445 = vmatpush.msrb.mxu3 %v4871_v63  ;;  %v2052_v56 = vor.u32 1.1754944e-38, %v2051_v13  ;;  %vm2061_vm12 = vweird.f32 %v5155_v51  ;;  %v5629_v27 = vld [vmem:[#allocation29_spill] sm:$0xff]  ;;  %v5635_v59 = vld [vmem:[#allocation51_spill] sm:$0xff]  ;;  %v5638_v13 = vld [vmem:[#allocation42_spill] sm:$0xff] }
 0x470   :  { %v2057_v25 = vsub.f32 1.0, %v2056_v0  ;;  %2385 = vmatpush.msrb.mxu0 %v4863_v57  ;;  %2405 = vmatpush.msrb.mxu1 %v4865_v54  ;;  %v2038_v41 = vsel %vm2035_vm7, %v2037_v45, %v2033_v16  ;;  %v2023_v54 = vsel %vm2020_vm10, %v2022_v55, %v2018_v38  ;;  %v2064_v6 = vand.u32 2147483647, %v5122_v23  ;;  %vm2062_vm14 = vmor %vm2060_vm13, %vm2061_vm12 }
 0x471   :  { %v2043_v21 = vmul.f32 %v3525_v35, %v2042_v62  ;;  %2425 = vmatpush.msrb.mxu2 %v4867_v61  ;;  %2446 = vmatpush.msrb.mxu3 %v5030_v52  ;;  %v2070_v22 = vmul.f32 %v2038_v41, %v5016_v33  ;;  %v5625_v33 = vld [vmem:[#allocation57_spill] sm:$0xff]  ;;  %v819_v16 = vadd.f32 %v5638_v13, %v5637_v2 }
 0x472   :  { %2386 = vmatpush.msrb.mxu0 %v4875_v60  ;;  %2406 = vmatpush.msrb.mxu1 %v4877_v9  ;;  %v2058_v63 = vmul.f32 %v5155_v51, %v2057_v25  ;;  %vm2065_vm15 = vcmp.eq.f32.partialorder %v2064_v6, 8.507059e+37  ;;  %v5266_v6 = vld [vmem:[#allocation11 + $0x30] sm:$0xff] }
 0x473   :  { %v2044_v28 = vadd.f32 %v3525_v35, %v2043_v21  ;;  %2426 = vmatpush.msrb.mxu2 %v4879_v5  ;;  %2447 = vmatpush.msrb.mxu3 %v5037_v19  ;;  %v5639_v21 = vld [vmem:[#allocation64_spill] sm:$0xff]  ;;  %5641 = vst [vmem:[#allocation33_spill] sm:$0xff] %v5266_v6 }
 0x474   :  { %2387 = vmatpush.msrb.mxu0 %v5033_v32  ;;  %2407 = vmatpush.msrb.mxu1 %v5035_v43  ;;  %v2059_v5 = vadd.f32 %v5155_v51, %v2058_v63  ;;  %v860_v10 = vadd.f32 %v5640_v14, %v5639_v21  ;;  %v5257_v63 = vld [vmem:[#allocation11 + $0x58] sm:$0xff] }
 0x475   :  { %v2048_v57 = vsel %vm2047_vm9, %v3525_v35, %v2044_v28  ;;  %2427 = vmatpush.msrb.mxu2 %v4885_v18  ;;  %2448 = vmatpush.msrb.mxu3 %v5054_v44  ;;  %v2066_v18 = vand.u32 2147483648, %v5122_v23  ;;  %v5631_v23 = vld [vmem:[#allocation31_spill] sm:$0xff]  ;;  %v5634_v35 = vld [vmem:[#allocation40_spill] sm:$0xff] }
 0x476   :  { %v2053_v61 = vsel %vm2050_vm11, %v2052_v56, %v2048_v57  ;;  %2388 = vmatpush.msrb.mxu0 %v5046_v4  ;;  %2408 = vmatpush.msrb.mxu1 %v5048_v40  ;;  %v2063_v1 = vsel %vm2062_vm14, %v5155_v51, %v2059_v5  ;;  %v737_v39 = vadd.f32 %v5634_v35, %v5633_v26  ;;  %v5636_v51 = vld [vmem:[#allocation41_spill] sm:$0xff]  ;;  %v5251_v57 = vld [vmem:[#allocation11 + $0x40] sm:$0xff] }
 0x477   :  { %v2071_v60 = vmul.f32 %v2053_v61, %v2023_v54  ;;  %2428 = vmatpush.msrb.mxu2 %v5050_v8  ;;  %2449 = vmatpush.msrb.mxu3 %v5625_v33  ;;  %v2067_v36 = vor.u32 1.1754944e-38, %v2066_v18  ;;  %v778_v30 = vadd.f32 %v5636_v51, %v5635_v59  ;;  %v5249_v56 = vld [vmem:[#allocation11 + $0x78] sm:$0xff]  ;;  %v5255_v61 = vld [vmem:[#allocation11 + $0x48] sm:$0xff] }
 0x478   :  { %2389 = vmatpush.msrb.mxu0 %v5058_v50  ;;  %2409 = vmatpush.msrb.mxu1 %v5060_v42  ;;  %v5264_v18 = vld [vmem:[#allocation11 + $0x28] sm:$0xff]  ;;  %v5281_v35 = vld [vmem:[#allocation11 + $0x18] sm:$0xff] }
 0x479   :  { %v5213_v9 = vadd.f32 %v2071_v60, %v2070_v22  ;;  %2429 = vmatpush.msrb.mxu2 %v5062_v24  ;;  %2450 = vmatpush.msrb.mxu3 %v5078_v12  ;;  %v2068_v48 = vsel %vm2065_vm15, %v2067_v36, %v2063_v1  ;;  %v5259_v22 = vld [vmem:[#allocation11 + $0x20] sm:$0xff]  ;;  %v5268_v1 = vld [vmem:[#allocation11 + $0x38] sm:$0xff]  ;;  %5646 = vst [vmem:[#allocation25_spill] sm:$0xff] %v5281_v35 }
 0x47a   :  { %2390 = vmatpush.msrb.mxu0 %v5626_v58  ;;  %2410 = vmatpush.msrb.mxu1 %v5627_v11  ;;  %5642 = vst [vmem:[#allocation34_spill] sm:$0xff] %v5268_v1 }
 0x47b   :  { %2076 = vst [vmem:[#allocation16 + $0x20] sm:$0xff] %v5213_v9  ;;  %3528 = vtanh.f32 %v5213_v9  ;;  %2430 = vmatpush.msrb.mxu2 %v5628_v47  ;;  %2451 = vmatpush.msrb.mxu3 %v5630_v17 }
 0x47c   :  { %2391 = vmatpush.msrb.mxu0 %v5080_v3  ;;  %2411 = vmatpush.msrb.mxu1 %v5086_v7 }
 0x47d   :  { %2431 = vmatpush.msrb.mxu2 %v5629_v27  ;;  %2452 = vmatpush.msrb.mxu3 %v5249_v56 }
 0x47e   :  { %2392 = vmatpush.msrb.mxu0 %v5096_v31  ;;  %2412 = vmatpush.msrb.mxu1 %v5631_v23 }
 0x47f   :  { %2432 = vmatpush.msrb.mxu2 %v5632_v37  ;;  %2453 = vmatpush.msrb.mxu3 %v5257_v63 }
 0x480   :  { %2393 = vmatpush.msrb.mxu0 %v5251_v57  ;;  %2413 = vmatpush.msrb.mxu1 %v5255_v61 }
 0x481   :  { %v3529_v29 = vpop.eup %3528  ;;  %2433 = vmatpush.msrb.mxu2 %v5108_v15  ;;  %2454 = vmatpush.msrb.mxu3 %v5268_v1 }
 0x482   :  { %v2074_v46 = vmul.f32 %v3529_v29, %v2068_v48  ;;  %2394 = vmatpush.msrb.mxu0 %v5259_v22  ;;  %v5272_v29 = vld [vmem:[#allocation11] sm:$0xff]  ;;  %v5274_v48 = vld [vmem:[#allocation11 + $0x8] sm:$0xff]  ;;  %2414 = vmatpush.msrb.mxu1 %v5264_v18 }
 0x483   :  { %5643 = vst [vmem:[#allocation35_spill] sm:$0xff] %v5272_v29  ;;  %2434 = vmatpush.msrb.mxu2 %v5266_v6  ;;  %2455 = vmatpush.msrb.mxu3 %v5281_v35 }
 0x484   :  { %2075 = vst [vmem:[#allocation15 + $0x20] sm:$0xff] %v2074_v46  ;;  %2161 = vmatmul.f32.vlgmr.msra.gmra.mxu0 %v2074_v46  ;;  %2181 = vmatmul.f32.vlgmr.msra.gmra.mxu1 %v2074_v46 }
 0x485   :  { %2201 = vmatmul.f32.vlgmr.msra.gmra.mxu2 %v2074_v46  ;;  %2221 = vmatmul.f32.vlgmr.msra.gmra.mxu3 %v2074_v46  ;;  %5644 = vst [vmem:[#allocation62_spill] sm:$0xff] %v5274_v48  ;;  %v5276_v46 = vld [vmem:[#allocation11 + $0x10] sm:$0xff] }
 0x486   :  { %5645 = vst [vmem:[#allocation24_spill] sm:$0xff] %v5276_v46  ;;  %2395 = vmatpush.msrb.mxu0 %v5272_v29  ;;  %2415 = vmatpush.msrb.mxu1 %v5274_v48 }
 0x487   :  { %2435 = vmatpush.msrb.mxu2 %v5276_v46 }
 0x501   :  { %v2162_v20 = vpop.f32.mrf.mxu0  ;;  %v2182_v34 = vpop.f32.mrf.mxu1 }
 0x502   :  { %v2225_v62 = vadd.f32 %v2162_v20, %v737_v39  ;;  %v2226_v0 = vadd.f32 %v2182_v34, %v778_v30 }
 0x504   :  { %v3288_v49 = vmul.f32 -1.442695, %v2225_v62  ;;  %v3289_v53 = vmul.f32 -1.442695, %v2226_v0 }
 0x506   :  { %3530 = vpow2.f32 %v3288_v49 }
 0x507   :  { %3532 = vpow2.f32 %v3289_v53 }
 0x508   :  { %v2202_v45 = vpop.f32.mrf.mxu2  ;;  %v2222_v25 = vpop.f32.mrf.mxu3 }
 0x509   :  { %v2227_v38 = vadd.f32 %v2202_v45, %v819_v16  ;;  %v2228_v28 = vadd.f32 %v2222_v25, %v860_v10 }
 0x50b   :  { %v3290_v55 = vmul.f32 -1.442695, %v2227_v38  ;;  %v3291_v41 = vmul.f32 -1.442695, %v2228_v28 }
 0x50c   :  { %v3531_v54 = vpop.eup %3530 }
 0x50d   :  { %v3533_v60 = vpop.eup %3532  ;;  %v5261_v5 = vadd.f32 1.0, %v3531_v54  ;;  %3534 = vpow2.f32 %v3290_v55 }
 0x50e   :  { %v2242_v36 = vadd.f32 1.0, %v3533_v60  ;;  %3536 = vpow2.f32 %v3291_v41 }
 0x50f   :  { %3538 = vrcp.f32 %v5261_v5  ;;  %vm2250_vm3 = vweird.f32 %v5261_v5 }
 0x510   :  { %3540 = vrcp.f32 %v2242_v36  ;;  %vm2265_vm1 = vweird.f32 %v2242_v36  ;;  %v2269_v28 = vand.u32 2147483647, %v2242_v36  ;;  %v2271_v55 = vand.u32 2147483648, %v2242_v36 }
 0x512   :  { %vm2270_vm7 = vcmp.eq.f32.partialorder %v2269_v28, 8.507059e+37 }
 0x513   :  { %v3535_v39 = vpop.eup %3534 }
 0x514   :  { %v3537_v51 = vpop.eup %3536  ;;  %v2243_v30 = vadd.f32 1.0, %v3535_v39  ;;  %v2254_v39 = vand.u32 2147483647, %v5261_v5 }
 0x515   :  { %v3539_v20 = vpop.eup %3538  ;;  %v2244_v34 = vadd.f32 1.0, %v3537_v51  ;;  %v2256_v51 = vand.u32 2147483648, %v5261_v5 }
 0x516   :  { %v3541_v62 = vpop.eup %3540  ;;  %v2246_v0 = vmul.f32 %v3539_v20, %v5261_v5  ;;  %3542 = vrcp.f32 %v2243_v30  ;;  %vm2251_vm2 = vweird.f32 %v3539_v20  ;;  %vm2280_vm8 = vweird.f32 %v2243_v30 }
 0x517   :  { %v2261_v49 = vmul.f32 %v3541_v62, %v2242_v36  ;;  %3544 = vrcp.f32 %v2244_v34  ;;  %vm2266_vm0 = vweird.f32 %v3541_v62  ;;  %vm2252_vm6 = vmor %vm2250_vm3, %vm2251_vm2  ;;  %vm2255_vm10 = vcmp.eq.f32.partialorder %v2254_v39, 8.507059e+37  ;;  %v2610_v39 = vld [vmem:[#allocation11 + $0x1d8] sm:$0xff] }
 0x518   :  { %v2247_v53 = vsub.f32 1.0, %v2246_v0  ;;  %vm2267_vm4 = vmor %vm2265_vm1, %vm2266_vm0  ;;  %v2286_v0 = vand.u32 2147483648, %v2243_v30  ;;  %vm2295_vm13 = vweird.f32 %v2244_v34  ;;  %v2299_v28 = vand.u32 2147483647, %v2244_v34 }
 0x519   :  { %v2262_v13 = vsub.f32 1.0, %v2261_v49 }
 0x51a   :  { %v2248_v16 = vmul.f32 %v3539_v20, %v2247_v53  ;;  %v2287_v48 = vor.u32 1.1754944e-38, %v2286_v0  ;;  %vm2300_vm15 = vcmp.eq.f32.partialorder %v2299_v28, 8.507059e+37  ;;  %v2604_v0 = vld [vmem:[#allocation11 + $0x1a8] sm:$0xff]  ;;  %v2598_v28 = vld [vmem:[#allocation11 + $0x178] sm:$0xff] }
 0x51b   :  { %v2263_v14 = vmul.f32 %v3541_v62, %v2262_v13  ;;  %v2284_v13 = vand.u32 2147483647, %v2243_v30 }
 0x51c   :  { %v3543_v10 = vpop.eup %3542  ;;  %v2249_v41 = vadd.f32 %v3539_v20, %v2248_v16 }
 0x51d   :  { %v2264_v45 = vadd.f32 %v3541_v62, %v2263_v14  ;;  %v2276_v25 = vmul.f32 %v3543_v10, %v2243_v30  ;;  %v3545_v38 = vpop.eup %3544  ;;  %vm2281_vm5 = vweird.f32 %v3543_v10  ;;  %v2272_v14 = vor.u32 1.1754944e-38, %v2271_v55 }
 0x51e   :  { %v2291_v60 = vmul.f32 %v3545_v38, %v2244_v34  ;;  %v2253_v36 = vsel %vm2252_vm6, %v3539_v20, %v2249_v41  ;;  %vm2282_vm9 = vmor %vm2280_vm8, %vm2281_vm5  ;;  %vm2285_vm11 = vcmp.eq.f32.partialorder %v2284_v13, 8.507059e+37  ;;  %vm2296_vm12 = vweird.f32 %v3545_v38  ;;  %v2614_v41 = vld [vmem:[#allocation11 + $0x1f8] sm:$0xff]  ;;  %v2599_v13 = vld [vmem:[#allocation11 + $0x180] sm:$0xff] }
 0x51f   :  { %v2277_v54 = vsub.f32 1.0, %v2276_v25  ;;  %v2268_v49 = vsel %vm2267_vm4, %v3541_v62, %v2264_v45  ;;  %v2257_v25 = vor.u32 1.1754944e-38, %v2256_v51  ;;  %v2301_v30 = vand.u32 2147483648, %v2244_v34  ;;  %vm2297_vm14 = vmor %vm2295_vm13, %vm2296_vm12  ;;  %2675 = vmatpush.msra.mxu3 %v2614_v41  ;;  %v2607_v34 = vld [vmem:[#allocation11 + $0x1c0] sm:$0xff] }
 0x520   :  { %v2292_v35 = vsub.f32 1.0, %v2291_v60  ;;  %v2273_v46 = vsel %vm2270_vm7, %v2272_v14, %v2268_v49  ;;  %v2609_v60 = vld [vmem:[#allocation11 + $0x1d0] sm:$0xff]  ;;  %v2603_v51 = vld [vmem:[#allocation11 + $0x1a0] sm:$0xff]  ;;  %v2600_v14 = vld [vmem:[#allocation11 + $0x188] sm:$0xff] }
 0x521   :  { %v2278_v53 = vmul.f32 %v3543_v10, %v2277_v54  ;;  %v2258_v5 = vsel %vm2255_vm10, %v2257_v25, %v2253_v36  ;;  %v2305_v45 = vmul.f32 %v2273_v46, %v5213_v9  ;;  %v2302_v55 = vor.u32 1.1754944e-38, %v2301_v30  ;;  %v2611_v9 = vld [vmem:[#allocation11 + $0x1e0] sm:$0xff]  ;;  %v2613_v46 = vld [vmem:[#allocation11 + $0x1f0] sm:$0xff]  ;;  %2676 = vmatpush.msra.mxu3 %v2610_v39 }
 0x522   :  { %v2293_v62 = vmul.f32 %v3545_v38, %v2292_v35  ;;  %2615 = vmatpush.msra.mxu0 %v2611_v9  ;;  %2655 = vmatpush.msra.mxu2 %v2613_v46  ;;  %v2605_v49 = vld [vmem:[#allocation11 + $0x1b0] sm:$0xff]  ;;  %v2595_v25 = vld [vmem:[#allocation11 + $0x160] sm:$0xff]  ;;  %v2594_v46 = vld [vmem:[#allocation11 + $0x158] sm:$0xff] }
 0x523   :  { %v2279_v16 = vadd.f32 %v3543_v10, %v2278_v53  ;;  %v2606_v53 = vld [vmem:[#allocation11 + $0x1b8] sm:$0xff]  ;;  %v2601_v36 = vld [vmem:[#allocation11 + $0x190] sm:$0xff]  ;;  %v2587_v41 = vld [vmem:[#allocation11 + $0x120] sm:$0xff] }
 0x524   :  { %v2294_v20 = vadd.f32 %v3545_v38, %v2293_v62  ;;  %2616 = vmatpush.msra.mxu0 %v2607_v34  ;;  %2656 = vmatpush.msra.mxu2 %v2609_v60  ;;  %v2597_v62 = vld [vmem:[#allocation11 + $0x170] sm:$0xff]  ;;  %v2588_v34 = vld [vmem:[#allocation11 + $0x128] sm:$0xff] }
 0x525   :  { %v2283_v29 = vsel %vm2282_vm9, %v3543_v10, %v2279_v16  ;;  %2677 = vmatpush.msra.mxu3 %v2606_v53  ;;  %v2602_v16 = vld [vmem:[#allocation11 + $0x198] sm:$0xff]  ;;  %v5650_v53 = vld [vmem:[#allocation47_spill] sm:$0xff] }
 0x526   :  { %v2288_v1 = vsel %vm2285_vm11, %v2287_v48, %v2283_v29  ;;  %v2298_v10 = vsel %vm2297_vm14, %v3545_v38, %v2294_v20  ;;  %v2608_v38 = vld [vmem:[#allocation11 + $0x1c8] sm:$0xff]  ;;  %2617 = vmatpush.msra.mxu0 %v2603_v51  ;;  %2657 = vmatpush.msra.mxu2 %v2605_v49  ;;  %v5648_v20 = vld [vmem:[#allocation45_spill] sm:$0xff]  ;;  %v2585_v51 = vld [vmem:[#allocation11 + $0x110] sm:$0xff] }
 0x527   :  { %v2306_v54 = vmul.f32 %v2288_v1, %v2258_v5  ;;  %v2303_v48 = vsel %vm2300_vm15, %v2302_v55, %v2298_v10  ;;  %v2612_v1 = vld [vmem:[#allocation11 + $0x1e8] sm:$0xff]  ;;  %2678 = vmatpush.msra.mxu3 %v2602_v16  ;;  %v781_v30 = vadd.f32 %v5648_v20, %v5635_v59 }
 0x528   :  { %2635 = vmatpush.msra.mxu1 %v2612_v1  ;;  %2618 = vmatpush.msra.mxu0 %v2599_v13  ;;  %v2596_v5 = vld [vmem:[#allocation11 + $0x168] sm:$0xff]  ;;  %v863_v13 = vadd.f32 %v5650_v53, %v5639_v21 }
 0x529   :  { %v5293_v6 = vadd.f32 %v2306_v54, %v2305_v45  ;;  %2658 = vmatpush.msra.mxu2 %v2601_v36  ;;  %v5647_v45 = vld [vmem:[#allocation44_spill] sm:$0xff]  ;;  %2679 = vmatpush.msra.mxu3 %v2598_v28 }
 0x52a   :  { %2636 = vmatpush.msra.mxu1 %v2608_v38  ;;  %v740_v54 = vadd.f32 %v5647_v45, %v5633_v26  ;;  %2619 = vmatpush.msra.mxu0 %v2595_v25  ;;  %v2589_v38 = vld [vmem:[#allocation11 + $0x130] sm:$0xff] }
 0x52b   :  { %2311 = vst [vmem:[#allocation16 + $0x28] sm:$0xff] %v5293_v6  ;;  %3546 = vtanh.f32 %v5293_v6  ;;  %2659 = vmatpush.msra.mxu2 %v2597_v62  ;;  %2680 = vmatpush.msra.mxu3 %v2594_v46 }
 0x52c   :  { %2637 = vmatpush.msra.mxu1 %v2604_v0  ;;  %v5649_v0 = vld [vmem:[#allocation46_spill] sm:$0xff] }
 0x52d   :  { %2681 = vmatpush.msra.mxu3 %v5030_v52  ;;  %v822_v49 = vadd.f32 %v5649_v0, %v5637_v2 }
 0x52e   :  { %2638 = vmatpush.msra.mxu1 %v2600_v14 }
 0x52f   :  { %2682 = vmatpush.msra.mxu3 %v5037_v19 }
 0x530   :  { %2639 = vmatpush.msra.mxu1 %v2596_v5 }
 0x531   :  { %v3547_v29 = vpop.eup %3546  ;;  %2683 = vmatpush.msra.mxu3 %v5054_v44 }
 0x532   :  { %v2309_v35 = vmul.f32 %v3547_v29, %v2303_v48  ;;  %v2591_v29 = vld [vmem:[#allocation11 + $0x140] sm:$0xff]  ;;  %v2592_v48 = vld [vmem:[#allocation11 + $0x148] sm:$0xff] }
 0x533   :  { %2620 = vmatpush.msra.mxu0 %v2591_v29  ;;  %2640 = vmatpush.msra.mxu1 %v2592_v48 }
 0x534   :  { %2310 = vst [vmem:[#allocation15 + $0x28] sm:$0xff] %v2309_v35  ;;  %2396 = vmatmul.f32.vlgmr.msrb.gmra.mxu0 %v2309_v35  ;;  %2416 = vmatmul.f32.vlgmr.msrb.gmra.mxu1 %v2309_v35 }
 0x535   :  { %2436 = vmatmul.f32.vlgmr.msrb.gmra.mxu2 %v2309_v35  ;;  %2456 = vmatmul.f32.vlgmr.msrb.gmra.mxu3 %v2309_v35  ;;  %v2593_v35 = vld [vmem:[#allocation11 + $0x150] sm:$0xff] }
 0x536   :  { %2660 = vmatpush.msra.mxu2 %v2593_v35  ;;  %2621 = vmatpush.msra.mxu0 %v2587_v41 }
 0x537   :  { %2641 = vmatpush.msra.mxu1 %v2588_v34  ;;  %2684 = vmatpush.msra.mxu3 %v5625_v33 }
 0x538   :  { %2661 = vmatpush.msra.mxu2 %v2589_v38  ;;  %2622 = vmatpush.msra.mxu0 %v5033_v32 }
 0x539   :  { %2642 = vmatpush.msra.mxu1 %v5035_v43  ;;  %2685 = vmatpush.msra.mxu3 %v5078_v12 }
 0x53a   :  { %2662 = vmatpush.msra.mxu2 %v2585_v51  ;;  %2623 = vmatpush.msra.mxu0 %v5046_v4 }
 0x53b   :  { %2643 = vmatpush.msra.mxu1 %v5048_v40  ;;  %2686 = vmatpush.msra.mxu3 %v5630_v17 }
 0x53c   :  { %2663 = vmatpush.msra.mxu2 %v5050_v8  ;;  %2624 = vmatpush.msra.mxu0 %v5058_v50 }
 0x53d   :  { %2644 = vmatpush.msra.mxu1 %v5060_v42  ;;  %2687 = vmatpush.msra.mxu3 %v5249_v56  ;;  %v5651_v42 = vld [vmem:[#allocation33_spill] sm:$0xff] }
 0x53e   :  { %2664 = vmatpush.msra.mxu2 %v5062_v24  ;;  %2625 = vmatpush.msra.mxu0 %v5626_v58  ;;  %v5652_v24 = vld [vmem:[#allocation34_spill] sm:$0xff] }
 0x53f   :  { %2645 = vmatpush.msra.mxu1 %v5627_v11  ;;  %2688 = vmatpush.msra.mxu3 %v5257_v63  ;;  %v5654_v58 = vld [vmem:[#allocation62_spill] sm:$0xff] }
 0x540   :  { %2665 = vmatpush.msra.mxu2 %v5628_v47  ;;  %2626 = vmatpush.msra.mxu0 %v5080_v3  ;;  %v5655_v47 = vld [vmem:[#allocation24_spill] sm:$0xff] }
 0x541   :  { %2646 = vmatpush.msra.mxu1 %v5086_v7  ;;  %2689 = vmatpush.msra.mxu3 %v5652_v24 }
 0x542   :  { %2666 = vmatpush.msra.mxu2 %v5629_v27  ;;  %2627 = vmatpush.msra.mxu0 %v5096_v31  ;;  %v5656_v27 = vld [vmem:[#allocation25_spill] sm:$0xff] }
 0x543   :  { %2647 = vmatpush.msra.mxu1 %v5631_v23  ;;  %2690 = vmatpush.msra.mxu3 %v5656_v27 }
 0x544   :  { %2667 = vmatpush.msra.mxu2 %v5632_v37  ;;  %2628 = vmatpush.msra.mxu0 %v5251_v57 }
 0x545   :  { %2648 = vmatpush.msra.mxu1 %v5255_v61 }
 0x546   :  { %2668 = vmatpush.msra.mxu2 %v5108_v15  ;;  %2629 = vmatpush.msra.mxu0 %v5259_v22  ;;  %v5653_v15 = vld [vmem:[#allocation35_spill] sm:$0xff] }
 0x547   :  { %2649 = vmatpush.msra.mxu1 %v5264_v18 }
 0x548   :  { %2669 = vmatpush.msra.mxu2 %v5651_v42  ;;  %2630 = vmatpush.msra.mxu0 %v5653_v15  ;;  %v5659_v42 = vld [vmem:[#allocation59_spill] sm:$0xff] }
 0x549   :  { %2650 = vmatpush.msra.mxu1 %v5654_v58  ;;  %v825_v24 = vadd.f32 %v5659_v42, %v5637_v2 }
 0x54a   :  { %2670 = vmatpush.msra.mxu2 %v5655_v47 }
 0x5b1   :  { %v2397_v10 = vpop.f32.mrf.mxu0  ;;  %v2417_v55 = vpop.f32.mrf.mxu1 }
 0x5b2   :  { %v2460_v9 = vadd.f32 %v2397_v10, %v740_v54  ;;  %v2461_v1 = vadd.f32 %v2417_v55, %v781_v30 }
 0x5b4   :  { %v3292_v60 = vmul.f32 -1.442695, %v2460_v9  ;;  %v3293_v39 = vmul.f32 -1.442695, %v2461_v1 }
 0x5b6   :  { %3548 = vpow2.f32 %v3292_v60 }
 0x5b7   :  { %3550 = vpow2.f32 %v3293_v39 }
 0x5b8   :  { %v2437_v14 = vpop.f32.mrf.mxu2  ;;  %v2457_v36 = vpop.f32.mrf.mxu3 }
 0x5b9   :  { %v2462_v52 = vadd.f32 %v2437_v14, %v822_v49  ;;  %v2463_v32 = vadd.f32 %v2457_v36, %v863_v13 }
 0x5bb   :  { %v3294_v43 = vmul.f32 -1.442695, %v2462_v52  ;;  %v3295_v16 = vmul.f32 -1.442695, %v2463_v32 }
 0x5bc   :  { %v3549_v19 = vpop.eup %3548 }
 0x5bd   :  { %v3551_v4 = vpop.eup %3550  ;;  %v5319_v40 = vadd.f32 1.0, %v3549_v19  ;;  %3552 = vpow2.f32 %v3294_v43 }
 0x5be   :  { %v5323_v8 = vadd.f32 1.0, %v3551_v4  ;;  %3554 = vpow2.f32 %v3295_v16  ;;  %v5657_v16 = vld [vmem:[#allocation48_spill] sm:$0xff]  ;;  %v5658_v4 = vld [vmem:[#allocation49_spill] sm:$0xff] }
 0x5bf   :  { %3556 = vrcp.f32 %v5319_v40  ;;  %vm2485_vm3 = vweird.f32 %v5319_v40  ;;  %v2489_v54 = vand.u32 2147483647, %v5319_v40  ;;  %v2491_v20 = vand.u32 2147483648, %v5319_v40 }
 0x5c0   :  { %3558 = vrcp.f32 %v5323_v8  ;;  %vm2500_vm1 = vweird.f32 %v5323_v8  ;;  %v2504_v18 = vand.u32 2147483647, %v5323_v8  ;;  %v2506_v25 = vand.u32 2147483648, %v5323_v8 }
 0x5c1   :  { %v2492_v1 = vor.u32 1.1754944e-38, %v2491_v20  ;;  %vm2490_vm10 = vcmp.eq.f32.partialorder %v2489_v54, 8.507059e+37  ;;  %v743_v19 = vadd.f32 %v5657_v16, %v5633_v26 }
 0x5c2   :  { %v2507_v29 = vor.u32 1.1754944e-38, %v2506_v25  ;;  %vm2505_vm7 = vcmp.eq.f32.partialorder %v2504_v18, 8.507059e+37 }
 0x5c3   :  { %v3553_v12 = vpop.eup %3552 }
 0x5c4   :  { %v3555_v7 = vpop.eup %3554  ;;  %v2478_v3 = vadd.f32 1.0, %v3553_v12 }
 0x5c5   :  { %v3557_v44 = vpop.eup %3556  ;;  %v5341_v50 = vadd.f32 1.0, %v3555_v7 }
 0x5c6   :  { %v3559_v31 = vpop.eup %3558  ;;  %v2481_v33 = vmul.f32 %v3557_v44, %v5319_v40  ;;  %3560 = vrcp.f32 %v2478_v3  ;;  %vm2486_vm2 = vweird.f32 %v3557_v44  ;;  %v2521_v30 = vand.u32 2147483648, %v2478_v3 }
 0x5c7   :  { %v2496_v11 = vmul.f32 %v3559_v31, %v5323_v8  ;;  %3562 = vrcp.f32 %v5341_v50  ;;  %vm2501_vm0 = vweird.f32 %v3559_v31  ;;  %v2519_v55 = vand.u32 2147483647, %v2478_v3  ;;  %vm2487_vm6 = vmor %vm2485_vm3, %vm2486_vm2 }
 0x5c8   :  { %v2482_v17 = vsub.f32 1.0, %v2481_v33  ;;  %vm2502_vm4 = vmor %vm2500_vm1, %vm2501_vm0  ;;  %vm2515_vm8 = vweird.f32 %v2478_v3  ;;  %v2522_v41 = vor.u32 1.1754944e-38, %v2521_v30  ;;  %v2536_v13 = vand.u32 2147483648, %v5341_v50 }
 0x5c9   :  { %v2497_v23 = vsub.f32 1.0, %v2496_v11  ;;  %vm2520_vm11 = vcmp.eq.f32.partialorder %v2519_v55, 8.507059e+37  ;;  %vm2530_vm13 = vweird.f32 %v5341_v50  ;;  %v2534_v14 = vand.u32 2147483647, %v5341_v50 }
 0x5ca   :  { %v2483_v37 = vmul.f32 %v3557_v44, %v2482_v17  ;;  %v2537_v52 = vor.u32 1.1754944e-38, %v2536_v13  ;;  %v784_v40 = vadd.f32 %v5658_v4, %v5635_v59 }
 0x5cb   :  { %v2498_v56 = vmul.f32 %v3559_v31, %v2497_v23  ;;  %vm2535_vm15 = vcmp.eq.f32.partialorder %v2534_v14, 8.507059e+37 }
 0x5cc   :  { %v3561_v57 = vpop.eup %3560  ;;  %v2484_v5 = vadd.f32 %v3557_v44, %v2483_v37 }
 0x5cd   :  { %v2499_v61 = vadd.f32 %v3559_v31, %v2498_v56  ;;  %v2511_v63 = vmul.f32 %v3561_v57, %v2478_v3  ;;  %v3563_v22 = vpop.eup %3562  ;;  %vm2516_vm5 = vweird.f32 %v3561_v57 }
 0x5ce   :  { %v2526_v45 = vmul.f32 %v3563_v22, %v5341_v50  ;;  %v2488_v35 = vsel %vm2487_vm6, %v3557_v44, %v2484_v5  ;;  %vm2517_vm9 = vmor %vm2515_vm8, %vm2516_vm5  ;;  %vm2531_vm12 = vweird.f32 %v3563_v22 }
 0x5cf   :  { %v2512_v62 = vsub.f32 1.0, %v2511_v63  ;;  %v2503_v28 = vsel %vm2502_vm4, %v3559_v31, %v2499_v61  ;;  %v2493_v38 = vsel %vm2490_vm10, %v2492_v1, %v2488_v35  ;;  %vm2532_vm14 = vmor %vm2530_vm13, %vm2531_vm12  ;;  %v5660_v31 = vld [vmem:[#allocation60_spill] sm:$0xff] }
 0x5d0   :  { %v2527_v48 = vsub.f32 1.0, %v2526_v45  ;;  %v2508_v46 = vsel %vm2505_vm7, %v2507_v29, %v2503_v28  ;;  %v866_v33 = vadd.f32 %v5660_v31, %v5639_v21 }
 0x5d1   :  { %v2513_v10 = vmul.f32 %v3561_v57, %v2512_v62  ;;  %v2540_v51 = vmul.f32 %v2508_v46, %v5293_v6 }
 0x5d2   :  { %v2528_v39 = vmul.f32 %v3563_v22, %v2527_v48 }
 0x5d3   :  { %v2514_v9 = vadd.f32 %v3561_v57, %v2513_v10 }
 0x5d4   :  { %v2529_v53 = vadd.f32 %v3563_v22, %v2528_v39 }
 0x5d5   :  { %v2518_v34 = vsel %vm2517_vm9, %v3561_v57, %v2514_v9 }
 0x5d6   :  { %v2523_v60 = vsel %vm2520_vm11, %v2522_v41, %v2518_v34  ;;  %v2533_v36 = vsel %vm2532_vm14, %v3563_v22, %v2529_v53 }
 0x5d7   :  { %v2541_v0 = vmul.f32 %v2523_v60, %v2493_v38  ;;  %v2538_v32 = vsel %vm2535_vm15, %v2537_v52, %v2533_v36 }
 0x5d9   :  { %v5360_v49 = vadd.f32 %v2541_v0, %v2540_v51 }
 0x5db   :  { %2546 = vst [vmem:[#allocation16 + $0x30] sm:$0xff] %v5360_v49  ;;  %3564 = vtanh.f32 %v5360_v49 }
 0x5e1   :  { %v3565_v6 = vpop.eup %3564 }
 0x5e2   :  { %v2544_v43 = vmul.f32 %v3565_v6, %v2538_v32 }
 0x5e4   :  { %2545 = vst [vmem:[#allocation15 + $0x30] sm:$0xff] %v2544_v43  ;;  %2631 = vmatmul.f32.vlgmr.msra.gmra.mxu0 %v2544_v43  ;;  %2651 = vmatmul.f32.vlgmr.msra.gmra.mxu1 %v2544_v43 }
 0x5e5   :  { %2671 = vmatmul.f32.vlgmr.msra.gmra.mxu2 %v2544_v43  ;;  %2691 = vmatmul.f32.vlgmr.msra.gmra.mxu3 %v2544_v43 }
 0x661   :  { %v2632_v8 = vpop.f32.mrf.mxu0  ;;  %v2652_v12 = vpop.f32.mrf.mxu1 }
 0x662   :  { %v2695_v7 = vadd.f32 %v2632_v8, %v743_v19  ;;  %v2696_v3 = vadd.f32 %v2652_v12, %v784_v40 }
 0x664   :  { %v3296_v44 = vmul.f32 -1.442695, %v2695_v7  ;;  %v3297_v50 = vmul.f32 -1.442695, %v2696_v3 }
 0x666   :  { %3566 = vpow2.f32 %v3296_v44 }
 0x667   :  { %3568 = vpow2.f32 %v3297_v50 }
 0x668   :  { %v2672_v15 = vpop.f32.mrf.mxu2  ;;  %v2692_v58 = vpop.f32.mrf.mxu3 }
 0x669   :  { %v2697_v26 = vadd.f32 %v2672_v15, %v825_v24  ;;  %v2698_v11 = vadd.f32 %v2692_v58, %v866_v33 }
 0x66b   :  { %v3298_v47 = vmul.f32 -1.442695, %v2697_v26  ;;  %v3299_v59 = vmul.f32 -1.442695, %v2698_v11 }
 0x66c   :  { %v3567_v27 = vpop.eup %3566 }
 0x66d   :  { %v3569_v17 = vpop.eup %3568  ;;  %v2711_v23 = vadd.f32 1.0, %v3567_v27  ;;  %3570 = vpow2.f32 %v3298_v47 }
 0x66e   :  { %v2712_v37 = vadd.f32 1.0, %v3569_v17  ;;  %3572 = vpow2.f32 %v3299_v59 }
 0x66f   :  { %3574 = vrcp.f32 %v2711_v23  ;;  %vm2720_vm3 = vweird.f32 %v2711_v23  ;;  %v2724_v9 = vand.u32 2147483647, %v2711_v23  ;;  %v2726_v1 = vand.u32 2147483648, %v2711_v23 }
 0x670   :  { %3576 = vrcp.f32 %v2712_v37  ;;  %vm2735_vm1 = vweird.f32 %v2712_v37  ;;  %v2739_v10 = vand.u32 2147483647, %v2712_v37  ;;  %v2741_v55 = vand.u32 2147483648, %v2712_v37 }
 0x671   :  { %v2727_v53 = vor.u32 1.1754944e-38, %v2726_v1  ;;  %vm2725_vm10 = vcmp.eq.f32.partialorder %v2724_v9, 8.507059e+37 }
 0x672   :  { %v2742_v60 = vor.u32 1.1754944e-38, %v2741_v55  ;;  %vm2740_vm7 = vcmp.eq.f32.partialorder %v2739_v10, 8.507059e+37 }
 0x673   :  { %v3571_v56 = vpop.eup %3570 }
 0x674   :  { %v3573_v2 = vpop.eup %3572  ;;  %v2713_v57 = vadd.f32 1.0, %v3571_v56 }
 0x675   :  { %v3575_v61 = vpop.eup %3574  ;;  %v5375_v21 = vadd.f32 1.0, %v3573_v2 }
 0x676   :  { %v3577_v63 = vpop.eup %3576  ;;  %v2716_v22 = vmul.f32 %v3575_v61, %v2711_v23  ;;  %3578 = vrcp.f32 %v2713_v57  ;;  %vm2721_vm2 = vweird.f32 %v3575_v61  ;;  %v2756_v46 = vand.u32 2147483648, %v2713_v57 }
 0x677   :  { %v2731_v18 = vmul.f32 %v3577_v63, %v2712_v37  ;;  %3580 = vrcp.f32 %v5375_v21  ;;  %vm2736_vm0 = vweird.f32 %v3577_v63  ;;  %v2754_v38 = vand.u32 2147483647, %v2713_v57  ;;  %vm2722_vm6 = vmor %vm2720_vm3, %vm2721_vm2 }
 0x678   :  { %v2717_v25 = vsub.f32 1.0, %v2716_v22  ;;  %vm2737_vm4 = vmor %vm2735_vm1, %vm2736_vm0  ;;  %vm2750_vm8 = vweird.f32 %v2713_v57  ;;  %v2757_v14 = vor.u32 1.1754944e-38, %v2756_v46  ;;  %v2771_v40 = vand.u32 2147483648, %v5375_v21 }
 0x679   :  { %v2732_v5 = vsub.f32 1.0, %v2731_v18  ;;  %vm2755_vm11 = vcmp.eq.f32.partialorder %v2754_v38, 8.507059e+37  ;;  %vm2765_vm13 = vweird.f32 %v5375_v21  ;;  %v2769_v8 = vand.u32 2147483647, %v5375_v21 }
 0x67a   :  { %v2718_v62 = vmul.f32 %v3575_v61, %v2717_v25  ;;  %v2772_v12 = vor.u32 1.1754944e-38, %v2771_v40 }
 0x67b   :  { %v2733_v45 = vmul.f32 %v3577_v63, %v2732_v5  ;;  %vm2770_vm15 = vcmp.eq.f32.partialorder %v2769_v8, 8.507059e+37 }
 0x67c   :  { %v3579_v54 = vpop.eup %3578  ;;  %v2719_v29 = vadd.f32 %v3575_v61, %v2718_v62 }
 0x67d   :  { %v2734_v20 = vadd.f32 %v3577_v63, %v2733_v45  ;;  %v2746_v30 = vmul.f32 %v3579_v54, %v2713_v57  ;;  %v3581_v28 = vpop.eup %3580  ;;  %vm2751_vm5 = vweird.f32 %v3579_v54 }
 0x67e   :  { %v2761_v35 = vmul.f32 %v3581_v28, %v5375_v21  ;;  %v2723_v51 = vsel %vm2722_vm6, %v3575_v61, %v2719_v29  ;;  %vm2752_vm9 = vmor %vm2750_vm8, %vm2751_vm5  ;;  %vm2766_vm12 = vweird.f32 %v3581_v28 }
 0x67f   :  { %v2747_v48 = vsub.f32 1.0, %v2746_v30  ;;  %v2738_v41 = vsel %vm2737_vm4, %v3577_v63, %v2734_v20  ;;  %v2728_v52 = vsel %vm2725_vm10, %v2727_v53, %v2723_v51  ;;  %vm2767_vm14 = vmor %vm2765_vm13, %vm2766_vm12 }
 0x680   :  { %v2762_v39 = vsub.f32 1.0, %v2761_v35  ;;  %v2743_v13 = vsel %vm2740_vm7, %v2742_v60, %v2738_v41 }
 0x681   :  { %v2748_v34 = vmul.f32 %v3579_v54, %v2747_v48  ;;  %v2775_v43 = vmul.f32 %v2743_v13, %v5360_v49 }
 0x682   :  { %v2763_v32 = vmul.f32 %v3581_v28, %v2762_v39 }
 0x683   :  { %v2749_v0 = vadd.f32 %v3579_v54, %v2748_v34 }
 0x684   :  { %v2764_v4 = vadd.f32 %v3581_v28, %v2763_v32 }
 0x685   :  { %v2753_v36 = vsel %vm2752_vm9, %v3579_v54, %v2749_v0 }
 0x686   :  { %v2758_v6 = vsel %vm2755_vm11, %v2757_v14, %v2753_v36  ;;  %v2768_v49 = vsel %vm2767_vm14, %v3581_v28, %v2764_v4 }
 0x687   :  { %v2776_v16 = vmul.f32 %v2758_v6, %v2728_v52  ;;  %v2773_v3 = vsel %vm2770_vm15, %v2772_v12, %v2768_v49 }
 0x689   :  { %v2777_v19 = vadd.f32 %v2776_v16, %v2775_v43 }
 0x68b   :  { %3582 = vtanh.f32 %v2777_v19  ;;  %2781 = vst [vmem:[#allocation16 + $0x38] sm:$0xff] %v2777_v19 }
 0x68c   :  { %2807 = dma.vmem_to_hbm [thread:$0]  %s2800_s17, 1024, %s2802_s20, [#allocation17], %s3782_s26, %s3782_s26, %s3783_s27  }
 0x691   :  { %v3583_v7 = vpop.eup %3582 }
 0x692   :  { %v2779_v44 = vmul.f32 %v3583_v7, %v2773_v3 }
 0x694   :  { %2780 = vst [vmem:[#allocation15 + $0x38] sm:$0xff] %v2779_v44 }
 0x695   :  { %2794 = dma.vmem_to_hbm [thread:$0]  %s2787_s21, 1024, %s2789_s23, [#allocation8], %s3782_s26, %s3782_s26, %s3783_s27  }
 0x696   :  { %3772 = dma.done.wait [#allocation8], 1024  }
 0x697   :  { %3773 = vsyncadd [#allocation8], 4294966272 }
 0x698   :  { %3774 = dma.done.wait [#allocation17], 1024  }
 0x699   :  { %3775 = vsyncadd [#allocation17], 4294966272 }
 0x69a   :  { %2816 = vsyncpa [#allocation7], 1 }
 0x69b   :  { %2817 = vsyncpa [#allocation10], 1 }
 0x69c   :  { %2818 = vsyncpa [#allocation13], 1 }
 0x69d   :  { %2819 = vsyncpa [#allocation8], 1 }
 0x69e   :  { %2820 = vsyncpa [#allocation17], 1 }

</bundles_post_ra>
